<compile_context>
chip_gen: v7x
topology: tpu7x:2x2x1
jax: 0.10.0
libtpu: 0.0.40
codegen_flags: <defaults>
</compile_context>

<pallas_src>
import functools

import jax
import jax.numpy as jnp
import numpy as np
from jax.experimental import pallas as pl
from jax.experimental.pallas import tpu as pltpu


def position_encoding(feature_size, d_model):
    pos = jnp.arange(feature_size, dtype=jnp.float32)[:, None]
    _2i = jnp.arange(0, d_model, 2, dtype=jnp.float32)
    angle = pos / (10000.0 ** (_2i / d_model))
    pe = jnp.zeros((feature_size, d_model), jnp.float32)
    pe = pe.at[:, 0::2].set(jnp.sin(angle))
    pe = pe.at[:, 1::2].set(jnp.cos(angle))
    return pe


def _decoder_kernel(dec_ref, fqcat_ref, f_ref, fpq_ref,
                    wihx_ref, wch_ref, wfq_ref, whgh_ref, ws_ref, we_ref, gc_ref,
                    pred_ref, *, F, D, T):
    b = f_ref.shape[0]                       # batch rows handled by this block

    # ---- loop-invariant compute (hoisted out of the recurrence) ----
    # Decoder-input half of the LSTM gates, all T steps in one matmul.
    gates_x = jnp.dot(dec_ref[...].reshape(T * b, D), wihx_ref[...],
                      preferred_element_type=jnp.float32)              # (T*b, 4D)
    # w_f(f) + w_q(q) fused into a single K=2D matmul.
    fq = jnp.dot(fqcat_ref[...].reshape(b * F, 2 * D), wfq_ref[...],
                 preferred_element_type=jnp.float32)                   # (b*F, D)
    f3 = f_ref[...]                                                    # (b, F, D) f32
    fpq3 = fpq_ref[...]                                                # (b, F, D) f32

    # ---- recurrent state (values; T is static and small -> full unroll) ----
    h = jnp.zeros((b, D), jnp.float32)
    cp = jnp.zeros((b, D), jnp.float32)        # c_prime
    cell = jnp.zeros((b, D), jnp.float32)      # LSTM cell state
    s = jnp.zeros((b * F, D), jnp.float32)     # coverage accumulator

    for t in range(T):
        # Re-read small weight tiles from VMEM each step (cheap vld slot) so
        # they need not stay resident in vregs across the whole T-unroll.
        wch = wch_ref[...]                     # (2D, 4D)  [w_ih_c ; w_hh]
        whgh = whgh_ref[...]                   # (D, 2D)   [w_h | g_h]
        ws = ws_ref[...]                       # (D, D)
        we = we_ref[...]                       # (D, D)
        gc = gc_ref[...]                       # (D, D)    c-half of g

        # ---- LSTMCell(d_model*2, d_model, bias=False) ----
        # input = concat([decoder_inputs[:, t], c_prime], -1); the decoder-input
        # half was hoisted (gates_x), the recurrent half is one fused matmul.
        ch = jnp.concatenate([cp, h], axis=-1).astype(wch.dtype)       # (b, 2D)
        gates = gates_x[t * b:(t + 1) * b, :] + jnp.dot(
            ch, wch, preferred_element_type=jnp.float32)               # (b, 4D)
        i_g = jax.nn.sigmoid(gates[:, 0:D])
        f_g = jax.nn.sigmoid(gates[:, D:2 * D])
        g_g = jnp.tanh(gates[:, 2 * D:3 * D])
        o_g = jax.nn.sigmoid(gates[:, 3 * D:4 * D])
        cell = f_g * cell + i_g * g_g
        h = o_g * jnp.tanh(cell)

        # ---- attention energies ----
        # h @ [w_h | g_h]: w_h(h) for the energies, and the h-half of the
        # output projection, in a single push.
        hw = jnp.dot(h.astype(whgh.dtype), whgh,
                     preferred_element_type=jnp.float32)               # (b, 2D)
        wh_h = hw[:, 0:D]
        gh_h = hw[:, D:2 * D]
        ws_s = jnp.dot(s.astype(ws.dtype), ws,
                       preferred_element_type=jnp.float32)             # (b*F, D)
        pre = jnp.tanh((fq + ws_s).reshape(b, F, D) + wh_h[:, None, :])
        e = jnp.dot(pre.reshape(b * F, D).astype(we.dtype), we,
                    preferred_element_type=jnp.float32)                # (b*F, D)

        # softmax over the d_model axis (matches torch.softmax(e, dim=-1))
        m = jnp.max(e, axis=-1, keepdims=True)
        p = jnp.exp(e - m)
        alpha = p * pl.reciprocal(jnp.sum(p, axis=-1, keepdims=True), approx=True)

        s = s + alpha
        alpha3 = alpha.reshape(b, F, D)
        c = jnp.sum(alpha3 * f3, axis=1)                               # (b, D)
        cp = jnp.sum(alpha3 * fpq3, axis=1)                            # (b, D)

        # prediction = g(concat([c, h], -1)) = c @ g_c + h @ g_h
        pred = jnp.dot(c.astype(gc.dtype), gc,
                       preferred_element_type=jnp.float32) + gh_h      # (b, D)
        pred_ref[t] = pred.astype(pred_ref.dtype)                      # per-step store


def attention_based_decoder(f, decoder_input_ids, params, *, batch_block=None):
    B, F, D = f.shape
    T = decoder_input_ids.shape[1]
    bb = B if batch_block is None else batch_block
    assert B % bb == 0, (B, bb)

    f32, bf16 = jnp.float32, jnp.bfloat16

    # Embedding gather is plain-JAX glue; decoder inputs laid out time-major.
    dec = params["embedding"][decoder_input_ids].astype(f32)            # (B, T, D)
    dec_tm = jnp.transpose(dec, (1, 0, 2)).astype(bf16)                 # (T, B, D)

    q = position_encoding(F, D)                                         # (F, D)
    f_f32 = f.astype(f32)                                               # (B, F, D)
    fpq = f_f32 + q[None]                                               # (B, F, D)  f + q
    # Fused [f | q] operand for the single (B*F, 2D) @ (2D, D) attention matmul.
    fq_cat = jnp.concatenate(
        [f_f32, jnp.broadcast_to(q[None], (B, F, D))], axis=-1).astype(bf16)  # (B, F, 2D)

    wih_t = params["w_ih"].T                                            # (2D, 4D)
    wihx = wih_t[:D].astype(bf16)                                       # (D, 4D)  x-half
    w_ch = jnp.concatenate([wih_t[D:], params["w_hh"].T],
                           axis=0).astype(bf16)                         # (2D, 4D)
    w_fq = jnp.concatenate([params["w_f"].T, params["w_q"].T],
                           axis=0).astype(bf16)                         # (2D, D)
    g_t = params["g"].T                                                 # (2D, D)
    w_hgh = jnp.concatenate([params["w_h"].T, g_t[D:]],
                            axis=1).astype(bf16)                        # (D, 2D)
    g_c = g_t[:D].astype(bf16)                                          # (D, D)
    w_s = params["w_s"].T.astype(bf16)                                  # (D, D)
    w_e = params["w_e"].T.astype(bf16)                                  # (D, D)

    kernel = functools.partial(_decoder_kernel, F=F, D=D, T=T)

    def full2d(shape):
        return pl.BlockSpec(shape, lambda i: (0, 0))

    pred_t = pl.pallas_call(
        kernel,
        out_shape=jax.ShapeDtypeStruct((T, B, D), f32),
        grid=(B // bb,),
        in_specs=[
            pl.BlockSpec((T, bb, D), lambda i: (0, i, 0)),        # decoder inputs
            pl.BlockSpec((bb, F, 2 * D), lambda i: (i, 0, 0)),    # [f | q]
            pl.BlockSpec((bb, F, D), lambda i: (i, 0, 0)),        # f
            pl.BlockSpec((bb, F, D), lambda i: (i, 0, 0)),        # f + q
            full2d((D, 4 * D)),                                   # w_ih (x half)
            full2d((2 * D, 4 * D)),                               # [w_ih_c ; w_hh]
            full2d((2 * D, D)),                                   # [w_f ; w_q]
            full2d((D, 2 * D)),                                   # [w_h | g_h]
            full2d((D, D)),                                       # w_s
            full2d((D, D)),                                       # w_e
            full2d((D, D)),                                       # g_c
        ],
        out_specs=pl.BlockSpec((T, bb, D), lambda i: (0, i, 0)),
        compiler_params=pltpu.CompilerParams(
            dimension_semantics=("parallel",)),
    )(dec_tm, fq_cat, f_f32, fpq, wihx, w_ch, w_fq, w_hgh, w_s, w_e, g_c)

    return jnp.transpose(pred_t, (1, 0, 2))                             # (B, T, D)


def reference_decoder(f, decoder_input_ids, params):
    """Pure-JAX mirror of the PyTorch forward, for correctness checking."""
    B, F, D = f.shape
    T = decoder_input_ids.shape[1]
    dec = params["embedding"][decoder_input_ids].astype(jnp.float32)
    q = position_encoding(F, D)
    s = jnp.zeros_like(f)
    h = jnp.zeros((B, D), jnp.float32)
    cp = jnp.zeros((B, D), jnp.float32)
    cell = jnp.zeros((B, D), jnp.float32)
    preds = []
    for t in range(T):
        x = jnp.concatenate([dec[:, t], cp], axis=-1)
        gates = x @ params["w_ih"].T + h @ params["w_hh"].T
        i_g = jax.nn.sigmoid(gates[:, :D])
        f_g = jax.nn.sigmoid(gates[:, D:2 * D])
        g_g = jnp.tanh(gates[:, 2 * D:3 * D])
        o_g = jax.nn.sigmoid(gates[:, 3 * D:])
        cell = f_g * cell + i_g * g_g
        h = o_g * jnp.tanh(cell)
        pre = jnp.tanh((h @ params["w_h"].T)[:, None, :]
                       + f @ params["w_f"].T
                       + (q @ params["w_q"].T)[None]
                       + s @ params["w_s"].T)
        e = pre @ params["w_e"].T
        alpha = jax.nn.softmax(e, axis=-1)
        s = s + alpha
        c = jnp.sum(alpha * f, axis=1)
        cp = jnp.sum(alpha * (f + q[None]), axis=1)
        preds.append(jnp.concatenate([c, h], axis=-1) @ params["g"].T)
    return jnp.stack(preds, axis=1)


def _uniform(key, shape, fan_in):
    k = 1.0 / np.sqrt(fan_in)
    return jax.random.uniform(key, shape, jnp.float32, -k, k)


if __name__ == "__main__":
    B, F, D, T, VOCAB = 2, 16, 32, 8, 50

    root = jax.random.PRNGKey(0)
    keys = jax.random.split(root, 12)

    params = {
        "embedding": jax.random.normal(keys[0], (VOCAB, D), jnp.float32),
        "w_ih": _uniform(keys[1], (4 * D, 2 * D), D),   # LSTMCell input weights
        "w_hh": _uniform(keys[2], (4 * D, D), D),       # LSTMCell hidden weights
        "w_e": _uniform(keys[3], (D, D), D),
        "w_h": _uniform(keys[4], (D, D), D),
        "w_f": _uniform(keys[5], (D, D), D),
        "w_q": _uniform(keys[6], (D, D), D),
        "w_s": _uniform(keys[7], (D, D), D),
        "g": _uniform(keys[8], (D, 2 * D), 2 * D),
    }

    f = jax.random.normal(keys[9], (B, F, D), jnp.float32)
    decoder_input_ids = jax.random.randint(keys[10], (B, T), 0, VOCAB)

    out = attention_based_decoder(f, decoder_input_ids, params)
    out = jax.block_until_ready(out)

    # Reference at highest matmul precision (true f32); kernel uses bf16 MXU
    # operands with f32 accumulation, so compare with a bf16-sized tolerance.
    with jax.default_matmul_precision("highest"):
        ref = jax.block_until_ready(reference_decoder(f, decoder_input_ids, params))

    assert out.shape == (B, T, D), out.shape
    diff = float(np.max(np.abs(np.asarray(out) - np.asarray(ref))))
    assert np.allclose(np.asarray(out), np.asarray(ref), atol=3e-2, rtol=3e-2), (
        "max abs diff = %g" % diff)

    print("KERNEL_OK")
</pallas_src>

<mosaic_0001>
module attributes {stable_mosaic.version = 11 : i64} {
  func.func @_decoder_kernel(%arg0: i32, %arg1: memref<8x2x32xbf16, #tpu.memory_space<vmem>>, %arg2: memref<2x16x64xbf16, #tpu.memory_space<vmem>>, %arg3: memref<2x16x32xf32, #tpu.memory_space<vmem>>, %arg4: memref<2x16x32xf32, #tpu.memory_space<vmem>>, %arg5: memref<32x128xbf16, #tpu.memory_space<vmem>>, %arg6: memref<64x128xbf16, #tpu.memory_space<vmem>>, %arg7: memref<64x32xbf16, #tpu.memory_space<vmem>>, %arg8: memref<32x64xbf16, #tpu.memory_space<vmem>>, %arg9: memref<32x32xbf16, #tpu.memory_space<vmem>>, %arg10: memref<32x32xbf16, #tpu.memory_space<vmem>>, %arg11: memref<32x32xbf16, #tpu.memory_space<vmem>>, %arg12: memref<8x2x32xf32, #tpu.memory_space<vmem>>) attributes {dimension_semantics = [#tpu.dimension_semantics<parallel>], iteration_bounds = array<i64: 1>, scalar_prefetch = 0 : i64, scratch_operands = 0 : i64, tpu.core_type = #tpu.core_type<tc>, window_params = [{transform_indices = @transform_0, window_bounds = array<i64: 8, 2, 32>}, {transform_indices = @transform_1, window_bounds = array<i64: 2, 16, 64>}, {transform_indices = @transform_2, window_bounds = array<i64: 2, 16, 32>}, {transform_indices = @transform_3, window_bounds = array<i64: 2, 16, 32>}, {pipeline_mode = #tpu.pipeline_mode<synchronous>, transform_indices = @transform_4, window_bounds = array<i64: 32, 128>}, {pipeline_mode = #tpu.pipeline_mode<synchronous>, transform_indices = @transform_5, window_bounds = array<i64: 64, 128>}, {pipeline_mode = #tpu.pipeline_mode<synchronous>, transform_indices = @transform_6, window_bounds = array<i64: 64, 32>}, {pipeline_mode = #tpu.pipeline_mode<synchronous>, transform_indices = @transform_7, window_bounds = array<i64: 32, 64>}, {pipeline_mode = #tpu.pipeline_mode<synchronous>, transform_indices = @transform_8, window_bounds = array<i64: 32, 32>}, {pipeline_mode = #tpu.pipeline_mode<synchronous>, transform_indices = @transform_9, window_bounds = array<i64: 32, 32>}, {pipeline_mode = #tpu.pipeline_mode<synchronous>, transform_indices = @transform_10, window_bounds = array<i64: 32, 32>}, {transform_indices = @transform_11, window_bounds = array<i64: 8, 2, 32>}]} {
    %c0 = arith.constant 0 : index
    %c0_0 = arith.constant 0 : index
    %c0_1 = arith.constant 0 : index
    %0 = vector.load %arg1[%c0, %c0_0, %c0_1] : memref<8x2x32xbf16, #tpu.memory_space<vmem>>, vector<8x2x32xbf16>
    %1 = vector.shape_cast %0 : vector<8x2x32xbf16> to vector<16x32xbf16>
    %c0_2 = arith.constant 0 : index
    %c0_3 = arith.constant 0 : index
    %2 = vector.load %arg5[%c0_2, %c0_3] : memref<32x128xbf16, #tpu.memory_space<vmem>>, vector<32x128xbf16>
    %cst = arith.constant dense<0.000000e+00> : vector<16x128xf32>
    %3 = tpu.matmul %1, %2, %cst {dimension_numbers = #tpu.dot_dimension_numbers<[1], [0], [0], [1], [0, 0, 1, 1], [], []>} : vector<16x32xbf16>, vector<32x128xbf16>, vector<16x128xf32> -> vector<16x128xf32>
    %c0_4 = arith.constant 0 : index
    %c0_5 = arith.constant 0 : index
    %c0_6 = arith.constant 0 : index
    %4 = vector.load %arg2[%c0_4, %c0_5, %c0_6] : memref<2x16x64xbf16, #tpu.memory_space<vmem>>, vector<2x16x64xbf16>
    %5 = vector.shape_cast %4 : vector<2x16x64xbf16> to vector<32x64xbf16>
    %c0_7 = arith.constant 0 : index
    %c0_8 = arith.constant 0 : index
    %6 = vector.load %arg7[%c0_7, %c0_8] : memref<64x32xbf16, #tpu.memory_space<vmem>>, vector<64x32xbf16>
    %cst_9 = arith.constant dense<0.000000e+00> : vector<32x32xf32>
    %7 = tpu.matmul %5, %6, %cst_9 {dimension_numbers = #tpu.dot_dimension_numbers<[1], [0], [0], [1], [0, 0, 1, 1], [], []>} : vector<32x64xbf16>, vector<64x32xbf16>, vector<32x32xf32> -> vector<32x32xf32>
    %c0_10 = arith.constant 0 : index
    %c0_11 = arith.constant 0 : index
    %c0_12 = arith.constant 0 : index
    %8 = vector.load %arg3[%c0_10, %c0_11, %c0_12] : memref<2x16x32xf32, #tpu.memory_space<vmem>>, vector<2x16x32xf32>
    %c0_13 = arith.constant 0 : index
    %c0_14 = arith.constant 0 : index
    %c0_15 = arith.constant 0 : index
    %9 = vector.load %arg4[%c0_13, %c0_14, %c0_15] : memref<2x16x32xf32, #tpu.memory_space<vmem>>, vector<2x16x32xf32>
    %cst_16 = arith.constant 0.000000e+00 : f32
    %10 = vector.broadcast %cst_16 : f32 to vector<2x32xf32>
    %cst_17 = arith.constant 0.000000e+00 : f32
    %11 = vector.broadcast %cst_17 : f32 to vector<2x32xf32>
    %cst_18 = arith.constant 0.000000e+00 : f32
    %12 = vector.broadcast %cst_18 : f32 to vector<2x32xf32>
    %cst_19 = arith.constant 0.000000e+00 : f32
    %13 = vector.broadcast %cst_19 : f32 to vector<32x32xf32>
    %c0_20 = arith.constant 0 : index
    %c0_21 = arith.constant 0 : index
    %14 = vector.load %arg6[%c0_20, %c0_21] : memref<64x128xbf16, #tpu.memory_space<vmem>>, vector<64x128xbf16>
    %c0_22 = arith.constant 0 : index
    %c0_23 = arith.constant 0 : index
    %15 = vector.load %arg8[%c0_22, %c0_23] : memref<32x64xbf16, #tpu.memory_space<vmem>>, vector<32x64xbf16>
    %c0_24 = arith.constant 0 : index
    %c0_25 = arith.constant 0 : index
    %16 = vector.load %arg9[%c0_24, %c0_25] : memref<32x32xbf16, #tpu.memory_space<vmem>>, vector<32x32xbf16>
    %c0_26 = arith.constant 0 : index
    %c0_27 = arith.constant 0 : index
    %17 = vector.load %arg10[%c0_26, %c0_27] : memref<32x32xbf16, #tpu.memory_space<vmem>>, vector<32x32xbf16>
    %c0_28 = arith.constant 0 : index
    %c0_29 = arith.constant 0 : index
    %18 = vector.load %arg11[%c0_28, %c0_29] : memref<32x32xbf16, #tpu.memory_space<vmem>>, vector<32x32xbf16>
    %19 = tpu.concatenate %11, %10 in 1 : vector<2x32xf32>, vector<2x32xf32> -> vector<2x64xf32>
    %20 = arith.truncf %19 : vector<2x64xf32> to vector<2x64xbf16>
    %21 = vector.extract_strided_slice %3 {offsets = [0, 0], sizes = [2, 128], strides = [1, 1]} : vector<16x128xf32> to vector<2x128xf32>
    %cst_30 = arith.constant dense<0.000000e+00> : vector<2x128xf32>
    %22 = tpu.matmul %20, %14, %cst_30 {dimension_numbers = #tpu.dot_dimension_numbers<[1], [0], [0], [1], [0, 0, 1, 1], [], []>} : vector<2x64xbf16>, vector<64x128xbf16>, vector<2x128xf32> -> vector<2x128xf32>
    %23 = arith.addf %21, %22 : vector<2x128xf32>
    %24 = vector.extract_strided_slice %23 {offsets = [0, 0], sizes = [2, 32], strides = [1, 1]} : vector<2x128xf32> to vector<2x32xf32>
    %25 = arith.negf %24 : vector<2x32xf32>
    %26 = math.exp %25 : vector<2x32xf32>
    %cst_31 = arith.constant 1.000000e+00 : f32
    %27 = vector.broadcast %cst_31 : f32 to vector<2x32xf32>
    %28 = arith.addf %27, %26 : vector<2x32xf32>
    %29 = arith.divf %27, %28 : vector<2x32xf32>
    %30 = vector.extract_strided_slice %23 {offsets = [0, 32], sizes = [2, 32], strides = [1, 1]} : vector<2x128xf32> to vector<2x32xf32>
    %31 = arith.negf %30 : vector<2x32xf32>
    %32 = math.exp %31 : vector<2x32xf32>
    %cst_32 = arith.constant 1.000000e+00 : f32
    %33 = vector.broadcast %cst_32 : f32 to vector<2x32xf32>
    %34 = arith.addf %33, %32 : vector<2x32xf32>
    %35 = arith.divf %33, %34 : vector<2x32xf32>
    %36 = vector.extract_strided_slice %23 {offsets = [0, 64], sizes = [2, 32], strides = [1, 1]} : vector<2x128xf32> to vector<2x32xf32>
    %37 = math.tanh %36 : vector<2x32xf32>
    %38 = vector.extract_strided_slice %23 {offsets = [0, 96], sizes = [2, 32], strides = [1, 1]} : vector<2x128xf32> to vector<2x32xf32>
    %39 = arith.negf %38 : vector<2x32xf32>
    %40 = math.exp %39 : vector<2x32xf32>
    %cst_33 = arith.constant 1.000000e+00 : f32
    %41 = vector.broadcast %cst_33 : f32 to vector<2x32xf32>
    %42 = arith.addf %41, %40 : vector<2x32xf32>
    %43 = arith.divf %41, %42 : vector<2x32xf32>
    %44 = arith.mulf %35, %12 : vector<2x32xf32>
    %45 = arith.mulf %29, %37 : vector<2x32xf32>
    %46 = arith.addf %44, %45 : vector<2x32xf32>
    %47 = math.tanh %46 : vector<2x32xf32>
    %48 = arith.mulf %43, %47 : vector<2x32xf32>
    %49 = arith.truncf %48 : vector<2x32xf32> to vector<2x32xbf16>
    %cst_34 = arith.constant dense<0.000000e+00> : vector<2x64xf32>
    %50 = tpu.matmul %49, %15, %cst_34 {dimension_numbers = #tpu.dot_dimension_numbers<[1], [0], [0], [1], [0, 0, 1, 1], [], []>} : vector<2x32xbf16>, vector<32x64xbf16>, vector<2x64xf32> -> vector<2x64xf32>
    %51 = vector.extract_strided_slice %50 {offsets = [0, 0], sizes = [2, 32], strides = [1, 1]} : vector<2x64xf32> to vector<2x32xf32>
    %52 = vector.extract_strided_slice %50 {offsets = [0, 32], sizes = [2, 32], strides = [1, 1]} : vector<2x64xf32> to vector<2x32xf32>
    %53 = arith.truncf %13 : vector<32x32xf32> to vector<32x32xbf16>
    %cst_35 = arith.constant dense<0.000000e+00> : vector<32x32xf32>
    %54 = tpu.matmul %53, %16, %cst_35 {dimension_numbers = #tpu.dot_dimension_numbers<[1], [0], [0], [1], [0, 0, 1, 1], [], []>} : vector<32x32xbf16>, vector<32x32xbf16>, vector<32x32xf32> -> vector<32x32xf32>
    %55 = arith.addf %7, %54 : vector<32x32xf32>
    %56 = vector.shape_cast %55 : vector<32x32xf32> to vector<2x16x32xf32>
    %57 = vector.shape_cast %51 : vector<2x32xf32> to vector<2x1x32xf32>
    %58 = vector.broadcast %57 : vector<2x1x32xf32> to vector<2x16x32xf32>
    %59 = arith.addf %56, %58 : vector<2x16x32xf32>
    %60 = math.tanh %59 : vector<2x16x32xf32>
    %61 = vector.shape_cast %60 : vector<2x16x32xf32> to vector<32x32xf32>
    %62 = arith.truncf %61 : vector<32x32xf32> to vector<32x32xbf16>
    %cst_36 = arith.constant dense<0.000000e+00> : vector<32x32xf32>
    %63 = tpu.matmul %62, %17, %cst_36 {dimension_numbers = #tpu.dot_dimension_numbers<[1], [0], [0], [1], [0, 0, 1, 1], [], []>} : vector<32x32xbf16>, vector<32x32xbf16>, vector<32x32xf32> -> vector<32x32xf32>
    %cst_37 = arith.constant dense<0xFF800000> : vector<32xf32>
    %64 = vector.multi_reduction <maximumf>, %63, %cst_37 [1] : vector<32x32xf32> to vector<32xf32>
    %65 = vector.shape_cast %64 : vector<32xf32> to vector<32x1xf32>
    %66 = vector.broadcast %65 : vector<32x1xf32> to vector<32x32xf32>
    %67 = arith.subf %63, %66 : vector<32x32xf32>
    %68 = math.exp %67 : vector<32x32xf32>
    %cst_38 = arith.constant dense<0.000000e+00> : vector<32xf32>
    %69 = vector.multi_reduction <add>, %68, %cst_38 [1] : vector<32x32xf32> to vector<32xf32>
    %70 = vector.shape_cast %69 : vector<32xf32> to vector<32x1xf32>
    %71 = tpu.reciprocal %70 {approx = true} : vector<32x1xf32> -> vector<32x1xf32>
    %72 = vector.broadcast %71 : vector<32x1xf32> to vector<32x32xf32>
    %73 = arith.mulf %68, %72 : vector<32x32xf32>
    %74 = arith.addf %13, %73 : vector<32x32xf32>
    %75 = vector.shape_cast %73 : vector<32x32xf32> to vector<2x16x32xf32>
    %76 = arith.mulf %75, %8 : vector<2x16x32xf32>
    %cst_39 = arith.constant dense<0.000000e+00> : vector<2x32xf32>
    %77 = vector.multi_reduction <add>, %76, %cst_39 [1] : vector<2x16x32xf32> to vector<2x32xf32>
    %78 = arith.mulf %75, %9 : vector<2x16x32xf32>
    %cst_40 = arith.constant dense<0.000000e+00> : vector<2x32xf32>
    %79 = vector.multi_reduction <add>, %78, %cst_40 [1] : vector<2x16x32xf32> to vector<2x32xf32>
    %80 = arith.truncf %77 : vector<2x32xf32> to vector<2x32xbf16>
    %cst_41 = arith.constant dense<0.000000e+00> : vector<2x32xf32>
    %81 = tpu.matmul %80, %18, %cst_41 {dimension_numbers = #tpu.dot_dimension_numbers<[1], [0], [0], [1], [0, 0, 1, 1], [], []>} : vector<2x32xbf16>, vector<32x32xbf16>, vector<2x32xf32> -> vector<2x32xf32>
    %82 = arith.addf %81, %52 : vector<2x32xf32>
    %c0_42 = arith.constant 0 : index
    %c0_43 = arith.constant 0 : index
    %c0_44 = arith.constant 0 : index
    %83 = vector.load %arg12[%c0_42, %c0_43, %c0_44] : memref<8x2x32xf32, #tpu.memory_space<vmem>>, vector<1x2x32xf32>
    %84 = vector.shape_cast %83 : vector<1x2x32xf32> to vector<2x32xf32>
    %85 = vector.shape_cast %82 : vector<2x32xf32> to vector<1x2x32xf32>
    tpu.vector_store %arg12[%c0_42, %c0_43, %c0_44], %85 {strides = array<i32>} : memref<8x2x32xf32, #tpu.memory_space<vmem>>, vector<1x2x32xf32>,
    %c0_45 = arith.constant 0 : index
    %c0_46 = arith.constant 0 : index
    %86 = vector.load %arg6[%c0_45, %c0_46] : memref<64x128xbf16, #tpu.memory_space<vmem>>, vector<64x128xbf16>
    %c0_47 = arith.constant 0 : index
    %c0_48 = arith.constant 0 : index
    %87 = vector.load %arg8[%c0_47, %c0_48] : memref<32x64xbf16, #tpu.memory_space<vmem>>, vector<32x64xbf16>
    %c0_49 = arith.constant 0 : index
    %c0_50 = arith.constant 0 : index
    %88 = vector.load %arg9[%c0_49, %c0_50] : memref<32x32xbf16, #tpu.memory_space<vmem>>, vector<32x32xbf16>
    %c0_51 = arith.constant 0 : index
    %c0_52 = arith.constant 0 : index
    %89 = vector.load %arg10[%c0_51, %c0_52] : memref<32x32xbf16, #tpu.memory_space<vmem>>, vector<32x32xbf16>
    %c0_53 = arith.constant 0 : index
    %c0_54 = arith.constant 0 : index
    %90 = vector.load %arg11[%c0_53, %c0_54] : memref<32x32xbf16, #tpu.memory_space<vmem>>, vector<32x32xbf16>
    %91 = tpu.concatenate %79, %48 in 1 : vector<2x32xf32>, vector<2x32xf32> -> vector<2x64xf32>
    %92 = arith.truncf %91 : vector<2x64xf32> to vector<2x64xbf16>
    %93 = vector.extract_strided_slice %3 {offsets = [2, 0], sizes = [2, 128], strides = [1, 1]} : vector<16x128xf32> to vector<2x128xf32>
    %cst_55 = arith.constant dense<0.000000e+00> : vector<2x128xf32>
    %94 = tpu.matmul %92, %86, %cst_55 {dimension_numbers = #tpu.dot_dimension_numbers<[1], [0], [0], [1], [0, 0, 1, 1], [], []>} : vector<2x64xbf16>, vector<64x128xbf16>, vector<2x128xf32> -> vector<2x128xf32>
    %95 = arith.addf %93, %94 : vector<2x128xf32>
    %96 = vector.extract_strided_slice %95 {offsets = [0, 0], sizes = [2, 32], strides = [1, 1]} : vector<2x128xf32> to vector<2x32xf32>
    %97 = arith.negf %96 : vector<2x32xf32>
    %98 = math.exp %97 : vector<2x32xf32>
    %cst_56 = arith.constant 1.000000e+00 : f32
    %99 = vector.broadcast %cst_56 : f32 to vector<2x32xf32>
    %100 = arith.addf %99, %98 : vector<2x32xf32>
    %101 = arith.divf %99, %100 : vector<2x32xf32>
    %102 = vector.extract_strided_slice %95 {offsets = [0, 32], sizes = [2, 32], strides = [1, 1]} : vector<2x128xf32> to vector<2x32xf32>
    %103 = arith.negf %102 : vector<2x32xf32>
    %104 = math.exp %103 : vector<2x32xf32>
    %cst_57 = arith.constant 1.000000e+00 : f32
    %105 = vector.broadcast %cst_57 : f32 to vector<2x32xf32>
    %106 = arith.addf %105, %104 : vector<2x32xf32>
    %107 = arith.divf %105, %106 : vector<2x32xf32>
    %108 = vector.extract_strided_slice %95 {offsets = [0, 64], sizes = [2, 32], strides = [1, 1]} : vector<2x128xf32> to vector<2x32xf32>
    %109 = math.tanh %108 : vector<2x32xf32>
    %110 = vector.extract_strided_slice %95 {offsets = [0, 96], sizes = [2, 32], strides = [1, 1]} : vector<2x128xf32> to vector<2x32xf32>
    %111 = arith.negf %110 : vector<2x32xf32>
    %112 = math.exp %111 : vector<2x32xf32>
    %cst_58 = arith.constant 1.000000e+00 : f32
    %113 = vector.broadcast %cst_58 : f32 to vector<2x32xf32>
    %114 = arith.addf %113, %112 : vector<2x32xf32>
    %115 = arith.divf %113, %114 : vector<2x32xf32>
    %116 = arith.mulf %107, %46 : vector<2x32xf32>
    %117 = arith.mulf %101, %109 : vector<2x32xf32>
    %118 = arith.addf %116, %117 : vector<2x32xf32>
    %119 = math.tanh %118 : vector<2x32xf32>
    %120 = arith.mulf %115, %119 : vector<2x32xf32>
    %121 = arith.truncf %120 : vector<2x32xf32> to vector<2x32xbf16>
    %cst_59 = arith.constant dense<0.000000e+00> : vector<2x64xf32>
    %122 = tpu.matmul %121, %87, %cst_59 {dimension_numbers = #tpu.dot_dimension_numbers<[1], [0], [0], [1], [0, 0, 1, 1], [], []>} : vector<2x32xbf16>, vector<32x64xbf16>, vector<2x64xf32> -> vector<2x64xf32>
    %123 = vector.extract_strided_slice %122 {offsets = [0, 0], sizes = [2, 32], strides = [1, 1]} : vector<2x64xf32> to vector<2x32xf32>
    %124 = vector.extract_strided_slice %122 {offsets = [0, 32], sizes = [2, 32], strides = [1, 1]} : vector<2x64xf32> to vector<2x32xf32>
    %125 = arith.truncf %74 : vector<32x32xf32> to vector<32x32xbf16>
    %cst_60 = arith.constant dense<0.000000e+00> : vector<32x32xf32>
    %126 = tpu.matmul %125, %88, %cst_60 {dimension_numbers = #tpu.dot_dimension_numbers<[1], [0], [0], [1], [0, 0, 1, 1], [], []>} : vector<32x32xbf16>, vector<32x32xbf16>, vector<32x32xf32> -> vector<32x32xf32>
    %127 = arith.addf %7, %126 : vector<32x32xf32>
    %128 = vector.shape_cast %127 : vector<32x32xf32> to vector<2x16x32xf32>
    %129 = vector.shape_cast %123 : vector<2x32xf32> to vector<2x1x32xf32>
    %130 = vector.broadcast %129 : vector<2x1x32xf32> to vector<2x16x32xf32>
    %131 = arith.addf %128, %130 : vector<2x16x32xf32>
    %132 = math.tanh %131 : vector<2x16x32xf32>
    %133 = vector.shape_cast %132 : vector<2x16x32xf32> to vector<32x32xf32>
    %134 = arith.truncf %133 : vector<32x32xf32> to vector<32x32xbf16>
    %cst_61 = arith.constant dense<0.000000e+00> : vector<32x32xf32>
    %135 = tpu.matmul %134, %89, %cst_61 {dimension_numbers = #tpu.dot_dimension_numbers<[1], [0], [0], [1], [0, 0, 1, 1], [], []>} : vector<32x32xbf16>, vector<32x32xbf16>, vector<32x32xf32> -> vector<32x32xf32>
    %cst_62 = arith.constant dense<0xFF800000> : vector<32xf32>
    %136 = vector.multi_reduction <maximumf>, %135, %cst_62 [1] : vector<32x32xf32> to vector<32xf32>
    %137 = vector.shape_cast %136 : vector<32xf32> to vector<32x1xf32>
    %138 = vector.broadcast %137 : vector<32x1xf32> to vector<32x32xf32>
    %139 = arith.subf %135, %138 : vector<32x32xf32>
    %140 = math.exp %139 : vector<32x32xf32>
    %cst_63 = arith.constant dense<0.000000e+00> : vector<32xf32>
    %141 = vector.multi_reduction <add>, %140, %cst_63 [1] : vector<32x32xf32> to vector<32xf32>
    %142 = vector.shape_cast %141 : vector<32xf32> to vector<32x1xf32>
    %143 = tpu.reciprocal %142 {approx = true} : vector<32x1xf32> -> vector<32x1xf32>
    %144 = vector.broadcast %143 : vector<32x1xf32> to vector<32x32xf32>
    %145 = arith.mulf %140, %144 : vector<32x32xf32>
    %146 = arith.addf %74, %145 : vector<32x32xf32>
    %147 = vector.shape_cast %145 : vector<32x32xf32> to vector<2x16x32xf32>
    %148 = arith.mulf %147, %8 : vector<2x16x32xf32>
    %cst_64 = arith.constant dense<0.000000e+00> : vector<2x32xf32>
    %149 = vector.multi_reduction <add>, %148, %cst_64 [1] : vector<2x16x32xf32> to vector<2x32xf32>
    %150 = arith.mulf %147, %9 : vector<2x16x32xf32>
    %cst_65 = arith.constant dense<0.000000e+00> : vector<2x32xf32>
    %151 = vector.multi_reduction <add>, %150, %cst_65 [1] : vector<2x16x32xf32> to vector<2x32xf32>
    %152 = arith.truncf %149 : vector<2x32xf32> to vector<2x32xbf16>
    %cst_66 = arith.constant dense<0.000000e+00> : vector<2x32xf32>
    %153 = tpu.matmul %152, %90, %cst_66 {dimension_numbers = #tpu.dot_dimension_numbers<[1], [0], [0], [1], [0, 0, 1, 1], [], []>} : vector<2x32xbf16>, vector<32x32xbf16>, vector<2x32xf32> -> vector<2x32xf32>
    %154 = arith.addf %153, %124 : vector<2x32xf32>
    %c1 = arith.constant 1 : index
    %c0_67 = arith.constant 0 : index
    %c0_68 = arith.constant 0 : index
    %155 = vector.load %arg12[%c1, %c0_67, %c0_68] : memref<8x2x32xf32, #tpu.memory_space<vmem>>, vector<1x2x32xf32>
    %156 = vector.shape_cast %155 : vector<1x2x32xf32> to vector<2x32xf32>
    %157 = vector.shape_cast %154 : vector<2x32xf32> to vector<1x2x32xf32>
    tpu.vector_store %arg12[%c1, %c0_67, %c0_68], %157 {strides = array<i32>} : memref<8x2x32xf32, #tpu.memory_space<vmem>>, vector<1x2x32xf32>,
    %c0_69 = arith.constant 0 : index
    %c0_70 = arith.constant 0 : index
    %158 = vector.load %arg6[%c0_69, %c0_70] : memref<64x128xbf16, #tpu.memory_space<vmem>>, vector<64x128xbf16>
    %c0_71 = arith.constant 0 : index
    %c0_72 = arith.constant 0 : index
    %159 = vector.load %arg8[%c0_71, %c0_72] : memref<32x64xbf16, #tpu.memory_space<vmem>>, vector<32x64xbf16>
    %c0_73 = arith.constant 0 : index
    %c0_74 = arith.constant 0 : index
    %160 = vector.load %arg9[%c0_73, %c0_74] : memref<32x32xbf16, #tpu.memory_space<vmem>>, vector<32x32xbf16>
    %c0_75 = arith.constant 0 : index
    %c0_76 = arith.constant 0 : index
    %161 = vector.load %arg10[%c0_75, %c0_76] : memref<32x32xbf16, #tpu.memory_space<vmem>>, vector<32x32xbf16>
    %c0_77 = arith.constant 0 : index
    %c0_78 = arith.constant 0 : index
    %162 = vector.load %arg11[%c0_77, %c0_78] : memref<32x32xbf16, #tpu.memory_space<vmem>>, vector<32x32xbf16>
    %163 = tpu.concatenate %151, %120 in 1 : vector<2x32xf32>, vector<2x32xf32> -> vector<2x64xf32>
    %164 = arith.truncf %163 : vector<2x64xf32> to vector<2x64xbf16>
    %165 = vector.extract_strided_slice %3 {offsets = [4, 0], sizes = [2, 128], strides = [1, 1]} : vector<16x128xf32> to vector<2x128xf32>
    %cst_79 = arith.constant dense<0.000000e+00> : vector<2x128xf32>
    %166 = tpu.matmul %164, %158, %cst_79 {dimension_numbers = #tpu.dot_dimension_numbers<[1], [0], [0], [1], [0, 0, 1, 1], [], []>} : vector<2x64xbf16>, vector<64x128xbf16>, vector<2x128xf32> -> vector<2x128xf32>
    %167 = arith.addf %165, %166 : vector<2x128xf32>
    %168 = vector.extract_strided_slice %167 {offsets = [0, 0], sizes = [2, 32], strides = [1, 1]} : vector<2x128xf32> to vector<2x32xf32>
    %169 = arith.negf %168 : vector<2x32xf32>
    %170 = math.exp %169 : vector<2x32xf32>
    %cst_80 = arith.constant 1.000000e+00 : f32
    %171 = vector.broadcast %cst_80 : f32 to vector<2x32xf32>
    %172 = arith.addf %171, %170 : vector<2x32xf32>
    %173 = arith.divf %171, %172 : vector<2x32xf32>
    %174 = vector.extract_strided_slice %167 {offsets = [0, 32], sizes = [2, 32], strides = [1, 1]} : vector<2x128xf32> to vector<2x32xf32>
    %175 = arith.negf %174 : vector<2x32xf32>
    %176 = math.exp %175 : vector<2x32xf32>
    %cst_81 = arith.constant 1.000000e+00 : f32
    %177 = vector.broadcast %cst_81 : f32 to vector<2x32xf32>
    %178 = arith.addf %177, %176 : vector<2x32xf32>
    %179 = arith.divf %177, %178 : vector<2x32xf32>
    %180 = vector.extract_strided_slice %167 {offsets = [0, 64], sizes = [2, 32], strides = [1, 1]} : vector<2x128xf32> to vector<2x32xf32>
    %181 = math.tanh %180 : vector<2x32xf32>
    %182 = vector.extract_strided_slice %167 {offsets = [0, 96], sizes = [2, 32], strides = [1, 1]} : vector<2x128xf32> to vector<2x32xf32>
    %183 = arith.negf %182 : vector<2x32xf32>
    %184 = math.exp %183 : vector<2x32xf32>
    %cst_82 = arith.constant 1.000000e+00 : f32
    %185 = vector.broadcast %cst_82 : f32 to vector<2x32xf32>
    %186 = arith.addf %185, %184 : vector<2x32xf32>
    %187 = arith.divf %185, %186 : vector<2x32xf32>
    %188 = arith.mulf %179, %118 : vector<2x32xf32>
    %189 = arith.mulf %173, %181 : vector<2x32xf32>
    %190 = arith.addf %188, %189 : vector<2x32xf32>
    %191 = math.tanh %190 : vector<2x32xf32>
    %192 = arith.mulf %187, %191 : vector<2x32xf32>
    %193 = arith.truncf %192 : vector<2x32xf32> to vector<2x32xbf16>
    %cst_83 = arith.constant dense<0.000000e+00> : vector<2x64xf32>
    %194 = tpu.matmul %193, %159, %cst_83 {dimension_numbers = #tpu.dot_dimension_numbers<[1], [0], [0], [1], [0, 0, 1, 1], [], []>} : vector<2x32xbf16>, vector<32x64xbf16>, vector<2x64xf32> -> vector<2x64xf32>
    %195 = vector.extract_strided_slice %194 {offsets = [0, 0], sizes = [2, 32], strides = [1, 1]} : vector<2x64xf32> to vector<2x32xf32>
    %196 = vector.extract_strided_slice %194 {offsets = [0, 32], sizes = [2, 32], strides = [1, 1]} : vector<2x64xf32> to vector<2x32xf32>
    %197 = arith.truncf %146 : vector<32x32xf32> to vector<32x32xbf16>
    %cst_84 = arith.constant dense<0.000000e+00> : vector<32x32xf32>
    %198 = tpu.matmul %197, %160, %cst_84 {dimension_numbers = #tpu.dot_dimension_numbers<[1], [0], [0], [1], [0, 0, 1, 1], [], []>} : vector<32x32xbf16>, vector<32x32xbf16>, vector<32x32xf32> -> vector<32x32xf32>
    %199 = arith.addf %7, %198 : vector<32x32xf32>
    %200 = vector.shape_cast %199 : vector<32x32xf32> to vector<2x16x32xf32>
    %201 = vector.shape_cast %195 : vector<2x32xf32> to vector<2x1x32xf32>
    %202 = vector.broadcast %201 : vector<2x1x32xf32> to vector<2x16x32xf32>
    %203 = arith.addf %200, %202 : vector<2x16x32xf32>
    %204 = math.tanh %203 : vector<2x16x32xf32>
    %205 = vector.shape_cast %204 : vector<2x16x32xf32> to vector<32x32xf32>
    %206 = arith.truncf %205 : vector<32x32xf32> to vector<32x32xbf16>
    %cst_85 = arith.constant dense<0.000000e+00> : vector<32x32xf32>
    %207 = tpu.matmul %206, %161, %cst_85 {dimension_numbers = #tpu.dot_dimension_numbers<[1], [0], [0], [1], [0, 0, 1, 1], [], []>} : vector<32x32xbf16>, vector<32x32xbf16>, vector<32x32xf32> -> vector<32x32xf32>
    %cst_86 = arith.constant dense<0xFF800000> : vector<32xf32>
    %208 = vector.multi_reduction <maximumf>, %207, %cst_86 [1] : vector<32x32xf32> to vector<32xf32>
    %209 = vector.shape_cast %208 : vector<32xf32> to vector<32x1xf32>
    %210 = vector.broadcast %209 : vector<32x1xf32> to vector<32x32xf32>
    %211 = arith.subf %207, %210 : vector<32x32xf32>
    %212 = math.exp %211 : vector<32x32xf32>
    %cst_87 = arith.constant dense<0.000000e+00> : vector<32xf32>
    %213 = vector.multi_reduction <add>, %212, %cst_87 [1] : vector<32x32xf32> to vector<32xf32>
    %214 = vector.shape_cast %213 : vector<32xf32> to vector<32x1xf32>
    %215 = tpu.reciprocal %214 {approx = true} : vector<32x1xf32> -> vector<32x1xf32>
    %216 = vector.broadcast %215 : vector<32x1xf32> to vector<32x32xf32>
    %217 = arith.mulf %212, %216 : vector<32x32xf32>
    %218 = arith.addf %146, %217 : vector<32x32xf32>
    %219 = vector.shape_cast %217 : vector<32x32xf32> to vector<2x16x32xf32>
    %220 = arith.mulf %219, %8 : vector<2x16x32xf32>
    %cst_88 = arith.constant dense<0.000000e+00> : vector<2x32xf32>
    %221 = vector.multi_reduction <add>, %220, %cst_88 [1] : vector<2x16x32xf32> to vector<2x32xf32>
    %222 = arith.mulf %219, %9 : vector<2x16x32xf32>
    %cst_89 = arith.constant dense<0.000000e+00> : vector<2x32xf32>
    %223 = vector.multi_reduction <add>, %222, %cst_89 [1] : vector<2x16x32xf32> to vector<2x32xf32>
    %224 = arith.truncf %221 : vector<2x32xf32> to vector<2x32xbf16>
    %cst_90 = arith.constant dense<0.000000e+00> : vector<2x32xf32>
    %225 = tpu.matmul %224, %162, %cst_90 {dimension_numbers = #tpu.dot_dimension_numbers<[1], [0], [0], [1], [0, 0, 1, 1], [], []>} : vector<2x32xbf16>, vector<32x32xbf16>, vector<2x32xf32> -> vector<2x32xf32>
    %226 = arith.addf %225, %196 : vector<2x32xf32>
    %c2 = arith.constant 2 : index
    %c0_91 = arith.constant 0 : index
    %c0_92 = arith.constant 0 : index
    %227 = vector.load %arg12[%c2, %c0_91, %c0_92] : memref<8x2x32xf32, #tpu.memory_space<vmem>>, vector<1x2x32xf32>
    %228 = vector.shape_cast %227 : vector<1x2x32xf32> to vector<2x32xf32>
    %229 = vector.shape_cast %226 : vector<2x32xf32> to vector<1x2x32xf32>
    tpu.vector_store %arg12[%c2, %c0_91, %c0_92], %229 {strides = array<i32>} : memref<8x2x32xf32, #tpu.memory_space<vmem>>, vector<1x2x32xf32>,
    %c0_93 = arith.constant 0 : index
    %c0_94 = arith.constant 0 : index
    %230 = vector.load %arg6[%c0_93, %c0_94] : memref<64x128xbf16, #tpu.memory_space<vmem>>, vector<64x128xbf16>
    %c0_95 = arith.constant 0 : index
    %c0_96 = arith.constant 0 : index
    %231 = vector.load %arg8[%c0_95, %c0_96] : memref<32x64xbf16, #tpu.memory_space<vmem>>, vector<32x64xbf16>
    %c0_97 = arith.constant 0 : index
    %c0_98 = arith.constant 0 : index
    %232 = vector.load %arg9[%c0_97, %c0_98] : memref<32x32xbf16, #tpu.memory_space<vmem>>, vector<32x32xbf16>
    %c0_99 = arith.constant 0 : index
    %c0_100 = arith.constant 0 : index
    %233 = vector.load %arg10[%c0_99, %c0_100] : memref<32x32xbf16, #tpu.memory_space<vmem>>, vector<32x32xbf16>
    %c0_101 = arith.constant 0 : index
    %c0_102 = arith.constant 0 : index
    %234 = vector.load %arg11[%c0_101, %c0_102] : memref<32x32xbf16, #tpu.memory_space<vmem>>, vector<32x32xbf16>
    %235 = tpu.concatenate %223, %192 in 1 : vector<2x32xf32>, vector<2x32xf32> -> vector<2x64xf32>
    %236 = arith.truncf %235 : vector<2x64xf32> to vector<2x64xbf16>
    %237 = vector.extract_strided_slice %3 {offsets = [6, 0], sizes = [2, 128], strides = [1, 1]} : vector<16x128xf32> to vector<2x128xf32>
    %cst_103 = arith.constant dense<0.000000e+00> : vector<2x128xf32>
    %238 = tpu.matmul %236, %230, %cst_103 {dimension_numbers = #tpu.dot_dimension_numbers<[1], [0], [0], [1], [0, 0, 1, 1], [], []>} : vector<2x64xbf16>, vector<64x128xbf16>, vector<2x128xf32> -> vector<2x128xf32>
    %239 = arith.addf %237, %238 : vector<2x128xf32>
    %240 = vector.extract_strided_slice %239 {offsets = [0, 0], sizes = [2, 32], strides = [1, 1]} : vector<2x128xf32> to vector<2x32xf32>
    %241 = arith.negf %240 : vector<2x32xf32>
    %242 = math.exp %241 : vector<2x32xf32>
    %cst_104 = arith.constant 1.000000e+00 : f32
    %243 = vector.broadcast %cst_104 : f32 to vector<2x32xf32>
    %244 = arith.addf %243, %242 : vector<2x32xf32>
    %245 = arith.divf %243, %244 : vector<2x32xf32>
    %246 = vector.extract_strided_slice %239 {offsets = [0, 32], sizes = [2, 32], strides = [1, 1]} : vector<2x128xf32> to vector<2x32xf32>
    %247 = arith.negf %246 : vector<2x32xf32>
    %248 = math.exp %247 : vector<2x32xf32>
    %cst_105 = arith.constant 1.000000e+00 : f32
    %249 = vector.broadcast %cst_105 : f32 to vector<2x32xf32>
    %250 = arith.addf %249, %248 : vector<2x32xf32>
    %251 = arith.divf %249, %250 : vector<2x32xf32>
    %252 = vector.extract_strided_slice %239 {offsets = [0, 64], sizes = [2, 32], strides = [1, 1]} : vector<2x128xf32> to vector<2x32xf32>
    %253 = math.tanh %252 : vector<2x32xf32>
    %254 = vector.extract_strided_slice %239 {offsets = [0, 96], sizes = [2, 32], strides = [1, 1]} : vector<2x128xf32> to vector<2x32xf32>
    %255 = arith.negf %254 : vector<2x32xf32>
    %256 = math.exp %255 : vector<2x32xf32>
    %cst_106 = arith.constant 1.000000e+00 : f32
    %257 = vector.broadcast %cst_106 : f32 to vector<2x32xf32>
    %258 = arith.addf %257, %256 : vector<2x32xf32>
    %259 = arith.divf %257, %258 : vector<2x32xf32>
    %260 = arith.mulf %251, %190 : vector<2x32xf32>
    %261 = arith.mulf %245, %253 : vector<2x32xf32>
    %262 = arith.addf %260, %261 : vector<2x32xf32>
    %263 = math.tanh %262 : vector<2x32xf32>
    %264 = arith.mulf %259, %263 : vector<2x32xf32>
    %265 = arith.truncf %264 : vector<2x32xf32> to vector<2x32xbf16>
    %cst_107 = arith.constant dense<0.000000e+00> : vector<2x64xf32>
    %266 = tpu.matmul %265, %231, %cst_107 {dimension_numbers = #tpu.dot_dimension_numbers<[1], [0], [0], [1], [0, 0, 1, 1], [], []>} : vector<2x32xbf16>, vector<32x64xbf16>, vector<2x64xf32> -> vector<2x64xf32>
    %267 = vector.extract_strided_slice %266 {offsets = [0, 0], sizes = [2, 32], strides = [1, 1]} : vector<2x64xf32> to vector<2x32xf32>
    %268 = vector.extract_strided_slice %266 {offsets = [0, 32], sizes = [2, 32], strides = [1, 1]} : vector<2x64xf32> to vector<2x32xf32>
    %269 = arith.truncf %218 : vector<32x32xf32> to vector<32x32xbf16>
    %cst_108 = arith.constant dense<0.000000e+00> : vector<32x32xf32>
    %270 = tpu.matmul %269, %232, %cst_108 {dimension_numbers = #tpu.dot_dimension_numbers<[1], [0], [0], [1], [0, 0, 1, 1], [], []>} : vector<32x32xbf16>, vector<32x32xbf16>, vector<32x32xf32> -> vector<32x32xf32>
    %271 = arith.addf %7, %270 : vector<32x32xf32>
    %272 = vector.shape_cast %271 : vector<32x32xf32> to vector<2x16x32xf32>
    %273 = vector.shape_cast %267 : vector<2x32xf32> to vector<2x1x32xf32>
    %274 = vector.broadcast %273 : vector<2x1x32xf32> to vector<2x16x32xf32>
    %275 = arith.addf %272, %274 : vector<2x16x32xf32>
    %276 = math.tanh %275 : vector<2x16x32xf32>
    %277 = vector.shape_cast %276 : vector<2x16x32xf32> to vector<32x32xf32>
    %278 = arith.truncf %277 : vector<32x32xf32> to vector<32x32xbf16>
    %cst_109 = arith.constant dense<0.000000e+00> : vector<32x32xf32>
    %279 = tpu.matmul %278, %233, %cst_109 {dimension_numbers = #tpu.dot_dimension_numbers<[1], [0], [0], [1], [0, 0, 1, 1], [], []>} : vector<32x32xbf16>, vector<32x32xbf16>, vector<32x32xf32> -> vector<32x32xf32>
    %cst_110 = arith.constant dense<0xFF800000> : vector<32xf32>
    %280 = vector.multi_reduction <maximumf>, %279, %cst_110 [1] : vector<32x32xf32> to vector<32xf32>
    %281 = vector.shape_cast %280 : vector<32xf32> to vector<32x1xf32>
    %282 = vector.broadcast %281 : vector<32x1xf32> to vector<32x32xf32>
    %283 = arith.subf %279, %282 : vector<32x32xf32>
    %284 = math.exp %283 : vector<32x32xf32>
    %cst_111 = arith.constant dense<0.000000e+00> : vector<32xf32>
    %285 = vector.multi_reduction <add>, %284, %cst_111 [1] : vector<32x32xf32> to vector<32xf32>
    %286 = vector.shape_cast %285 : vector<32xf32> to vector<32x1xf32>
    %287 = tpu.reciprocal %286 {approx = true} : vector<32x1xf32> -> vector<32x1xf32>
    %288 = vector.broadcast %287 : vector<32x1xf32> to vector<32x32xf32>
    %289 = arith.mulf %284, %288 : vector<32x32xf32>
    %290 = arith.addf %218, %289 : vector<32x32xf32>
    %291 = vector.shape_cast %289 : vector<32x32xf32> to vector<2x16x32xf32>
    %292 = arith.mulf %291, %8 : vector<2x16x32xf32>
    %cst_112 = arith.constant dense<0.000000e+00> : vector<2x32xf32>
    %293 = vector.multi_reduction <add>, %292, %cst_112 [1] : vector<2x16x32xf32> to vector<2x32xf32>
    %294 = arith.mulf %291, %9 : vector<2x16x32xf32>
    %cst_113 = arith.constant dense<0.000000e+00> : vector<2x32xf32>
    %295 = vector.multi_reduction <add>, %294, %cst_113 [1] : vector<2x16x32xf32> to vector<2x32xf32>
    %296 = arith.truncf %293 : vector<2x32xf32> to vector<2x32xbf16>
    %cst_114 = arith.constant dense<0.000000e+00> : vector<2x32xf32>
    %297 = tpu.matmul %296, %234, %cst_114 {dimension_numbers = #tpu.dot_dimension_numbers<[1], [0], [0], [1], [0, 0, 1, 1], [], []>} : vector<2x32xbf16>, vector<32x32xbf16>, vector<2x32xf32> -> vector<2x32xf32>
    %298 = arith.addf %297, %268 : vector<2x32xf32>
    %c3 = arith.constant 3 : index
    %c0_115 = arith.constant 0 : index
    %c0_116 = arith.constant 0 : index
    %299 = vector.load %arg12[%c3, %c0_115, %c0_116] : memref<8x2x32xf32, #tpu.memory_space<vmem>>, vector<1x2x32xf32>
    %300 = vector.shape_cast %299 : vector<1x2x32xf32> to vector<2x32xf32>
    %301 = vector.shape_cast %298 : vector<2x32xf32> to vector<1x2x32xf32>
    tpu.vector_store %arg12[%c3, %c0_115, %c0_116], %301 {strides = array<i32>} : memref<8x2x32xf32, #tpu.memory_space<vmem>>, vector<1x2x32xf32>,
    %c0_117 = arith.constant 0 : index
    %c0_118 = arith.constant 0 : index
    %302 = vector.load %arg6[%c0_117, %c0_118] : memref<64x128xbf16, #tpu.memory_space<vmem>>, vector<64x128xbf16>
    %c0_119 = arith.constant 0 : index
    %c0_120 = arith.constant 0 : index
    %303 = vector.load %arg8[%c0_119, %c0_120] : memref<32x64xbf16, #tpu.memory_space<vmem>>, vector<32x64xbf16>
    %c0_121 = arith.constant 0 : index
    %c0_122 = arith.constant 0 : index
    %304 = vector.load %arg9[%c0_121, %c0_122] : memref<32x32xbf16, #tpu.memory_space<vmem>>, vector<32x32xbf16>
    %c0_123 = arith.constant 0 : index
    %c0_124 = arith.constant 0 : index
    %305 = vector.load %arg10[%c0_123, %c0_124] : memref<32x32xbf16, #tpu.memory_space<vmem>>, vector<32x32xbf16>
    %c0_125 = arith.constant 0 : index
    %c0_126 = arith.constant 0 : index
    %306 = vector.load %arg11[%c0_125, %c0_126] : memref<32x32xbf16, #tpu.memory_space<vmem>>, vector<32x32xbf16>
    %307 = tpu.concatenate %295, %264 in 1 : vector<2x32xf32>, vector<2x32xf32> -> vector<2x64xf32>
    %308 = arith.truncf %307 : vector<2x64xf32> to vector<2x64xbf16>
    %309 = vector.extract_strided_slice %3 {offsets = [8, 0], sizes = [2, 128], strides = [1, 1]} : vector<16x128xf32> to vector<2x128xf32>
    %cst_127 = arith.constant dense<0.000000e+00> : vector<2x128xf32>
    %310 = tpu.matmul %308, %302, %cst_127 {dimension_numbers = #tpu.dot_dimension_numbers<[1], [0], [0], [1], [0, 0, 1, 1], [], []>} : vector<2x64xbf16>, vector<64x128xbf16>, vector<2x128xf32> -> vector<2x128xf32>
    %311 = arith.addf %309, %310 : vector<2x128xf32>
    %312 = vector.extract_strided_slice %311 {offsets = [0, 0], sizes = [2, 32], strides = [1, 1]} : vector<2x128xf32> to vector<2x32xf32>
    %313 = arith.negf %312 : vector<2x32xf32>
    %314 = math.exp %313 : vector<2x32xf32>
    %cst_128 = arith.constant 1.000000e+00 : f32
    %315 = vector.broadcast %cst_128 : f32 to vector<2x32xf32>
    %316 = arith.addf %315, %314 : vector<2x32xf32>
    %317 = arith.divf %315, %316 : vector<2x32xf32>
    %318 = vector.extract_strided_slice %311 {offsets = [0, 32], sizes = [2, 32], strides = [1, 1]} : vector<2x128xf32> to vector<2x32xf32>
    %319 = arith.negf %318 : vector<2x32xf32>
    %320 = math.exp %319 : vector<2x32xf32>
    %cst_129 = arith.constant 1.000000e+00 : f32
    %321 = vector.broadcast %cst_129 : f32 to vector<2x32xf32>
    %322 = arith.addf %321, %320 : vector<2x32xf32>
    %323 = arith.divf %321, %322 : vector<2x32xf32>
    %324 = vector.extract_strided_slice %311 {offsets = [0, 64], sizes = [2, 32], strides = [1, 1]} : vector<2x128xf32> to vector<2x32xf32>
    %325 = math.tanh %324 : vector<2x32xf32>
    %326 = vector.extract_strided_slice %311 {offsets = [0, 96], sizes = [2, 32], strides = [1, 1]} : vector<2x128xf32> to vector<2x32xf32>
    %327 = arith.negf %326 : vector<2x32xf32>
    %328 = math.exp %327 : vector<2x32xf32>
    %cst_130 = arith.constant 1.000000e+00 : f32
    %329 = vector.broadcast %cst_130 : f32 to vector<2x32xf32>
    %330 = arith.addf %329, %328 : vector<2x32xf32>
    %331 = arith.divf %329, %330 : vector<2x32xf32>
    %332 = arith.mulf %323, %262 : vector<2x32xf32>
    %333 = arith.mulf %317, %325 : vector<2x32xf32>
    %334 = arith.addf %332, %333 : vector<2x32xf32>
    %335 = math.tanh %334 : vector<2x32xf32>
    %336 = arith.mulf %331, %335 : vector<2x32xf32>
    %337 = arith.truncf %336 : vector<2x32xf32> to vector<2x32xbf16>
    %cst_131 = arith.constant dense<0.000000e+00> : vector<2x64xf32>
    %338 = tpu.matmul %337, %303, %cst_131 {dimension_numbers = #tpu.dot_dimension_numbers<[1], [0], [0], [1], [0, 0, 1, 1], [], []>} : vector<2x32xbf16>, vector<32x64xbf16>, vector<2x64xf32> -> vector<2x64xf32>
    %339 = vector.extract_strided_slice %338 {offsets = [0, 0], sizes = [2, 32], strides = [1, 1]} : vector<2x64xf32> to vector<2x32xf32>
    %340 = vector.extract_strided_slice %338 {offsets = [0, 32], sizes = [2, 32], strides = [1, 1]} : vector<2x64xf32> to vector<2x32xf32>
    %341 = arith.truncf %290 : vector<32x32xf32> to vector<32x32xbf16>
    %cst_132 = arith.constant dense<0.000000e+00> : vector<32x32xf32>
    %342 = tpu.matmul %341, %304, %cst_132 {dimension_numbers = #tpu.dot_dimension_numbers<[1], [0], [0], [1], [0, 0, 1, 1], [], []>} : vector<32x32xbf16>, vector<32x32xbf16>, vector<32x32xf32> -> vector<32x32xf32>
    %343 = arith.addf %7, %342 : vector<32x32xf32>
    %344 = vector.shape_cast %343 : vector<32x32xf32> to vector<2x16x32xf32>
    %345 = vector.shape_cast %339 : vector<2x32xf32> to vector<2x1x32xf32>
    %346 = vector.broadcast %345 : vector<2x1x32xf32> to vector<2x16x32xf32>
    %347 = arith.addf %344, %346 : vector<2x16x32xf32>
    %348 = math.tanh %347 : vector<2x16x32xf32>
    %349 = vector.shape_cast %348 : vector<2x16x32xf32> to vector<32x32xf32>
    %350 = arith.truncf %349 : vector<32x32xf32> to vector<32x32xbf16>
    %cst_133 = arith.constant dense<0.000000e+00> : vector<32x32xf32>
    %351 = tpu.matmul %350, %305, %cst_133 {dimension_numbers = #tpu.dot_dimension_numbers<[1], [0], [0], [1], [0, 0, 1, 1], [], []>} : vector<32x32xbf16>, vector<32x32xbf16>, vector<32x32xf32> -> vector<32x32xf32>
    %cst_134 = arith.constant dense<0xFF800000> : vector<32xf32>
    %352 = vector.multi_reduction <maximumf>, %351, %cst_134 [1] : vector<32x32xf32> to vector<32xf32>
    %353 = vector.shape_cast %352 : vector<32xf32> to vector<32x1xf32>
    %354 = vector.broadcast %353 : vector<32x1xf32> to vector<32x32xf32>
    %355 = arith.subf %351, %354 : vector<32x32xf32>
    %356 = math.exp %355 : vector<32x32xf32>
    %cst_135 = arith.constant dense<0.000000e+00> : vector<32xf32>
    %357 = vector.multi_reduction <add>, %356, %cst_135 [1] : vector<32x32xf32> to vector<32xf32>
    %358 = vector.shape_cast %357 : vector<32xf32> to vector<32x1xf32>
    %359 = tpu.reciprocal %358 {approx = true} : vector<32x1xf32> -> vector<32x1xf32>
    %360 = vector.broadcast %359 : vector<32x1xf32> to vector<32x32xf32>
    %361 = arith.mulf %356, %360 : vector<32x32xf32>
    %362 = arith.addf %290, %361 : vector<32x32xf32>
    %363 = vector.shape_cast %361 : vector<32x32xf32> to vector<2x16x32xf32>
    %364 = arith.mulf %363, %8 : vector<2x16x32xf32>
    %cst_136 = arith.constant dense<0.000000e+00> : vector<2x32xf32>
    %365 = vector.multi_reduction <add>, %364, %cst_136 [1] : vector<2x16x32xf32> to vector<2x32xf32>
    %366 = arith.mulf %363, %9 : vector<2x16x32xf32>
    %cst_137 = arith.constant dense<0.000000e+00> : vector<2x32xf32>
    %367 = vector.multi_reduction <add>, %366, %cst_137 [1] : vector<2x16x32xf32> to vector<2x32xf32>
    %368 = arith.truncf %365 : vector<2x32xf32> to vector<2x32xbf16>
    %cst_138 = arith.constant dense<0.000000e+00> : vector<2x32xf32>
    %369 = tpu.matmul %368, %306, %cst_138 {dimension_numbers = #tpu.dot_dimension_numbers<[1], [0], [0], [1], [0, 0, 1, 1], [], []>} : vector<2x32xbf16>, vector<32x32xbf16>, vector<2x32xf32> -> vector<2x32xf32>
    %370 = arith.addf %369, %340 : vector<2x32xf32>
    %c4 = arith.constant 4 : index
    %c0_139 = arith.constant 0 : index
    %c0_140 = arith.constant 0 : index
    %371 = vector.load %arg12[%c4, %c0_139, %c0_140] : memref<8x2x32xf32, #tpu.memory_space<vmem>>, vector<1x2x32xf32>
    %372 = vector.shape_cast %371 : vector<1x2x32xf32> to vector<2x32xf32>
    %373 = vector.shape_cast %370 : vector<2x32xf32> to vector<1x2x32xf32>
    tpu.vector_store %arg12[%c4, %c0_139, %c0_140], %373 {strides = array<i32>} : memref<8x2x32xf32, #tpu.memory_space<vmem>>, vector<1x2x32xf32>,
    %c0_141 = arith.constant 0 : index
    %c0_142 = arith.constant 0 : index
    %374 = vector.load %arg6[%c0_141, %c0_142] : memref<64x128xbf16, #tpu.memory_space<vmem>>, vector<64x128xbf16>
    %c0_143 = arith.constant 0 : index
    %c0_144 = arith.constant 0 : index
    %375 = vector.load %arg8[%c0_143, %c0_144] : memref<32x64xbf16, #tpu.memory_space<vmem>>, vector<32x64xbf16>
    %c0_145 = arith.constant 0 : index
    %c0_146 = arith.constant 0 : index
    %376 = vector.load %arg9[%c0_145, %c0_146] : memref<32x32xbf16, #tpu.memory_space<vmem>>, vector<32x32xbf16>
    %c0_147 = arith.constant 0 : index
    %c0_148 = arith.constant 0 : index
    %377 = vector.load %arg10[%c0_147, %c0_148] : memref<32x32xbf16, #tpu.memory_space<vmem>>, vector<32x32xbf16>
    %c0_149 = arith.constant 0 : index
    %c0_150 = arith.constant 0 : index
    %378 = vector.load %arg11[%c0_149, %c0_150] : memref<32x32xbf16, #tpu.memory_space<vmem>>, vector<32x32xbf16>
    %379 = tpu.concatenate %367, %336 in 1 : vector<2x32xf32>, vector<2x32xf32> -> vector<2x64xf32>
    %380 = arith.truncf %379 : vector<2x64xf32> to vector<2x64xbf16>
    %381 = vector.extract_strided_slice %3 {offsets = [10, 0], sizes = [2, 128], strides = [1, 1]} : vector<16x128xf32> to vector<2x128xf32>
    %cst_151 = arith.constant dense<0.000000e+00> : vector<2x128xf32>
    %382 = tpu.matmul %380, %374, %cst_151 {dimension_numbers = #tpu.dot_dimension_numbers<[1], [0], [0], [1], [0, 0, 1, 1], [], []>} : vector<2x64xbf16>, vector<64x128xbf16>, vector<2x128xf32> -> vector<2x128xf32>
    %383 = arith.addf %381, %382 : vector<2x128xf32>
    %384 = vector.extract_strided_slice %383 {offsets = [0, 0], sizes = [2, 32], strides = [1, 1]} : vector<2x128xf32> to vector<2x32xf32>
    %385 = arith.negf %384 : vector<2x32xf32>
    %386 = math.exp %385 : vector<2x32xf32>
    %cst_152 = arith.constant 1.000000e+00 : f32
    %387 = vector.broadcast %cst_152 : f32 to vector<2x32xf32>
    %388 = arith.addf %387, %386 : vector<2x32xf32>
    %389 = arith.divf %387, %388 : vector<2x32xf32>
    %390 = vector.extract_strided_slice %383 {offsets = [0, 32], sizes = [2, 32], strides = [1, 1]} : vector<2x128xf32> to vector<2x32xf32>
    %391 = arith.negf %390 : vector<2x32xf32>
    %392 = math.exp %391 : vector<2x32xf32>
    %cst_153 = arith.constant 1.000000e+00 : f32
    %393 = vector.broadcast %cst_153 : f32 to vector<2x32xf32>
    %394 = arith.addf %393, %392 : vector<2x32xf32>
    %395 = arith.divf %393, %394 : vector<2x32xf32>
    %396 = vector.extract_strided_slice %383 {offsets = [0, 64], sizes = [2, 32], strides = [1, 1]} : vector<2x128xf32> to vector<2x32xf32>
    %397 = math.tanh %396 : vector<2x32xf32>
    %398 = vector.extract_strided_slice %383 {offsets = [0, 96], sizes = [2, 32], strides = [1, 1]} : vector<2x128xf32> to vector<2x32xf32>
    %399 = arith.negf %398 : vector<2x32xf32>
    %400 = math.exp %399 : vector<2x32xf32>
    %cst_154 = arith.constant 1.000000e+00 : f32
    %401 = vector.broadcast %cst_154 : f32 to vector<2x32xf32>
    %402 = arith.addf %401, %400 : vector<2x32xf32>
    %403 = arith.divf %401, %402 : vector<2x32xf32>
    %404 = arith.mulf %395, %334 : vector<2x32xf32>
    %405 = arith.mulf %389, %397 : vector<2x32xf32>
    %406 = arith.addf %404, %405 : vector<2x32xf32>
    %407 = math.tanh %406 : vector<2x32xf32>
    %408 = arith.mulf %403, %407 : vector<2x32xf32>
    %409 = arith.truncf %408 : vector<2x32xf32> to vector<2x32xbf16>
    %cst_155 = arith.constant dense<0.000000e+00> : vector<2x64xf32>
    %410 = tpu.matmul %409, %375, %cst_155 {dimension_numbers = #tpu.dot_dimension_numbers<[1], [0], [0], [1], [0, 0, 1, 1], [], []>} : vector<2x32xbf16>, vector<32x64xbf16>, vector<2x64xf32> -> vector<2x64xf32>
    %411 = vector.extract_strided_slice %410 {offsets = [0, 0], sizes = [2, 32], strides = [1, 1]} : vector<2x64xf32> to vector<2x32xf32>
    %412 = vector.extract_strided_slice %410 {offsets = [0, 32], sizes = [2, 32], strides = [1, 1]} : vector<2x64xf32> to vector<2x32xf32>
    %413 = arith.truncf %362 : vector<32x32xf32> to vector<32x32xbf16>
    %cst_156 = arith.constant dense<0.000000e+00> : vector<32x32xf32>
    %414 = tpu.matmul %413, %376, %cst_156 {dimension_numbers = #tpu.dot_dimension_numbers<[1], [0], [0], [1], [0, 0, 1, 1], [], []>} : vector<32x32xbf16>, vector<32x32xbf16>, vector<32x32xf32> -> vector<32x32xf32>
    %415 = arith.addf %7, %414 : vector<32x32xf32>
    %416 = vector.shape_cast %415 : vector<32x32xf32> to vector<2x16x32xf32>
    %417 = vector.shape_cast %411 : vector<2x32xf32> to vector<2x1x32xf32>
    %418 = vector.broadcast %417 : vector<2x1x32xf32> to vector<2x16x32xf32>
    %419 = arith.addf %416, %418 : vector<2x16x32xf32>
    %420 = math.tanh %419 : vector<2x16x32xf32>
    %421 = vector.shape_cast %420 : vector<2x16x32xf32> to vector<32x32xf32>
    %422 = arith.truncf %421 : vector<32x32xf32> to vector<32x32xbf16>
    %cst_157 = arith.constant dense<0.000000e+00> : vector<32x32xf32>
    %423 = tpu.matmul %422, %377, %cst_157 {dimension_numbers = #tpu.dot_dimension_numbers<[1], [0], [0], [1], [0, 0, 1, 1], [], []>} : vector<32x32xbf16>, vector<32x32xbf16>, vector<32x32xf32> -> vector<32x32xf32>
    %cst_158 = arith.constant dense<0xFF800000> : vector<32xf32>
    %424 = vector.multi_reduction <maximumf>, %423, %cst_158 [1] : vector<32x32xf32> to vector<32xf32>
    %425 = vector.shape_cast %424 : vector<32xf32> to vector<32x1xf32>
    %426 = vector.broadcast %425 : vector<32x1xf32> to vector<32x32xf32>
    %427 = arith.subf %423, %426 : vector<32x32xf32>
    %428 = math.exp %427 : vector<32x32xf32>
    %cst_159 = arith.constant dense<0.000000e+00> : vector<32xf32>
    %429 = vector.multi_reduction <add>, %428, %cst_159 [1] : vector<32x32xf32> to vector<32xf32>
    %430 = vector.shape_cast %429 : vector<32xf32> to vector<32x1xf32>
    %431 = tpu.reciprocal %430 {approx = true} : vector<32x1xf32> -> vector<32x1xf32>
    %432 = vector.broadcast %431 : vector<32x1xf32> to vector<32x32xf32>
    %433 = arith.mulf %428, %432 : vector<32x32xf32>
    %434 = arith.addf %362, %433 : vector<32x32xf32>
    %435 = vector.shape_cast %433 : vector<32x32xf32> to vector<2x16x32xf32>
    %436 = arith.mulf %435, %8 : vector<2x16x32xf32>
    %cst_160 = arith.constant dense<0.000000e+00> : vector<2x32xf32>
    %437 = vector.multi_reduction <add>, %436, %cst_160 [1] : vector<2x16x32xf32> to vector<2x32xf32>
    %438 = arith.mulf %435, %9 : vector<2x16x32xf32>
    %cst_161 = arith.constant dense<0.000000e+00> : vector<2x32xf32>
    %439 = vector.multi_reduction <add>, %438, %cst_161 [1] : vector<2x16x32xf32> to vector<2x32xf32>
    %440 = arith.truncf %437 : vector<2x32xf32> to vector<2x32xbf16>
    %cst_162 = arith.constant dense<0.000000e+00> : vector<2x32xf32>
    %441 = tpu.matmul %440, %378, %cst_162 {dimension_numbers = #tpu.dot_dimension_numbers<[1], [0], [0], [1], [0, 0, 1, 1], [], []>} : vector<2x32xbf16>, vector<32x32xbf16>, vector<2x32xf32> -> vector<2x32xf32>
    %442 = arith.addf %441, %412 : vector<2x32xf32>
    %c5 = arith.constant 5 : index
    %c0_163 = arith.constant 0 : index
    %c0_164 = arith.constant 0 : index
    %443 = vector.load %arg12[%c5, %c0_163, %c0_164] : memref<8x2x32xf32, #tpu.memory_space<vmem>>, vector<1x2x32xf32>
    %444 = vector.shape_cast %443 : vector<1x2x32xf32> to vector<2x32xf32>
    %445 = vector.shape_cast %442 : vector<2x32xf32> to vector<1x2x32xf32>
    tpu.vector_store %arg12[%c5, %c0_163, %c0_164], %445 {strides = array<i32>} : memref<8x2x32xf32, #tpu.memory_space<vmem>>, vector<1x2x32xf32>,
    %c0_165 = arith.constant 0 : index
    %c0_166 = arith.constant 0 : index
    %446 = vector.load %arg6[%c0_165, %c0_166] : memref<64x128xbf16, #tpu.memory_space<vmem>>, vector<64x128xbf16>
    %c0_167 = arith.constant 0 : index
    %c0_168 = arith.constant 0 : index
    %447 = vector.load %arg8[%c0_167, %c0_168] : memref<32x64xbf16, #tpu.memory_space<vmem>>, vector<32x64xbf16>
    %c0_169 = arith.constant 0 : index
    %c0_170 = arith.constant 0 : index
    %448 = vector.load %arg9[%c0_169, %c0_170] : memref<32x32xbf16, #tpu.memory_space<vmem>>, vector<32x32xbf16>
    %c0_171 = arith.constant 0 : index
    %c0_172 = arith.constant 0 : index
    %449 = vector.load %arg10[%c0_171, %c0_172] : memref<32x32xbf16, #tpu.memory_space<vmem>>, vector<32x32xbf16>
    %c0_173 = arith.constant 0 : index
    %c0_174 = arith.constant 0 : index
    %450 = vector.load %arg11[%c0_173, %c0_174] : memref<32x32xbf16, #tpu.memory_space<vmem>>, vector<32x32xbf16>
    %451 = tpu.concatenate %439, %408 in 1 : vector<2x32xf32>, vector<2x32xf32> -> vector<2x64xf32>
    %452 = arith.truncf %451 : vector<2x64xf32> to vector<2x64xbf16>
    %453 = vector.extract_strided_slice %3 {offsets = [12, 0], sizes = [2, 128], strides = [1, 1]} : vector<16x128xf32> to vector<2x128xf32>
    %cst_175 = arith.constant dense<0.000000e+00> : vector<2x128xf32>
    %454 = tpu.matmul %452, %446, %cst_175 {dimension_numbers = #tpu.dot_dimension_numbers<[1], [0], [0], [1], [0, 0, 1, 1], [], []>} : vector<2x64xbf16>, vector<64x128xbf16>, vector<2x128xf32> -> vector<2x128xf32>
    %455 = arith.addf %453, %454 : vector<2x128xf32>
    %456 = vector.extract_strided_slice %455 {offsets = [0, 0], sizes = [2, 32], strides = [1, 1]} : vector<2x128xf32> to vector<2x32xf32>
    %457 = arith.negf %456 : vector<2x32xf32>
    %458 = math.exp %457 : vector<2x32xf32>
    %cst_176 = arith.constant 1.000000e+00 : f32
    %459 = vector.broadcast %cst_176 : f32 to vector<2x32xf32>
    %460 = arith.addf %459, %458 : vector<2x32xf32>
    %461 = arith.divf %459, %460 : vector<2x32xf32>
    %462 = vector.extract_strided_slice %455 {offsets = [0, 32], sizes = [2, 32], strides = [1, 1]} : vector<2x128xf32> to vector<2x32xf32>
    %463 = arith.negf %462 : vector<2x32xf32>
    %464 = math.exp %463 : vector<2x32xf32>
    %cst_177 = arith.constant 1.000000e+00 : f32
    %465 = vector.broadcast %cst_177 : f32 to vector<2x32xf32>
    %466 = arith.addf %465, %464 : vector<2x32xf32>
    %467 = arith.divf %465, %466 : vector<2x32xf32>
    %468 = vector.extract_strided_slice %455 {offsets = [0, 64], sizes = [2, 32], strides = [1, 1]} : vector<2x128xf32> to vector<2x32xf32>
    %469 = math.tanh %468 : vector<2x32xf32>
    %470 = vector.extract_strided_slice %455 {offsets = [0, 96], sizes = [2, 32], strides = [1, 1]} : vector<2x128xf32> to vector<2x32xf32>
    %471 = arith.negf %470 : vector<2x32xf32>
    %472 = math.exp %471 : vector<2x32xf32>
    %cst_178 = arith.constant 1.000000e+00 : f32
    %473 = vector.broadcast %cst_178 : f32 to vector<2x32xf32>
    %474 = arith.addf %473, %472 : vector<2x32xf32>
    %475 = arith.divf %473, %474 : vector<2x32xf32>
    %476 = arith.mulf %467, %406 : vector<2x32xf32>
    %477 = arith.mulf %461, %469 : vector<2x32xf32>
    %478 = arith.addf %476, %477 : vector<2x32xf32>
    %479 = math.tanh %478 : vector<2x32xf32>
    %480 = arith.mulf %475, %479 : vector<2x32xf32>
    %481 = arith.truncf %480 : vector<2x32xf32> to vector<2x32xbf16>
    %cst_179 = arith.constant dense<0.000000e+00> : vector<2x64xf32>
    %482 = tpu.matmul %481, %447, %cst_179 {dimension_numbers = #tpu.dot_dimension_numbers<[1], [0], [0], [1], [0, 0, 1, 1], [], []>} : vector<2x32xbf16>, vector<32x64xbf16>, vector<2x64xf32> -> vector<2x64xf32>
    %483 = vector.extract_strided_slice %482 {offsets = [0, 0], sizes = [2, 32], strides = [1, 1]} : vector<2x64xf32> to vector<2x32xf32>
    %484 = vector.extract_strided_slice %482 {offsets = [0, 32], sizes = [2, 32], strides = [1, 1]} : vector<2x64xf32> to vector<2x32xf32>
    %485 = arith.truncf %434 : vector<32x32xf32> to vector<32x32xbf16>
    %cst_180 = arith.constant dense<0.000000e+00> : vector<32x32xf32>
    %486 = tpu.matmul %485, %448, %cst_180 {dimension_numbers = #tpu.dot_dimension_numbers<[1], [0], [0], [1], [0, 0, 1, 1], [], []>} : vector<32x32xbf16>, vector<32x32xbf16>, vector<32x32xf32> -> vector<32x32xf32>
    %487 = arith.addf %7, %486 : vector<32x32xf32>
    %488 = vector.shape_cast %487 : vector<32x32xf32> to vector<2x16x32xf32>
    %489 = vector.shape_cast %483 : vector<2x32xf32> to vector<2x1x32xf32>
    %490 = vector.broadcast %489 : vector<2x1x32xf32> to vector<2x16x32xf32>
    %491 = arith.addf %488, %490 : vector<2x16x32xf32>
    %492 = math.tanh %491 : vector<2x16x32xf32>
    %493 = vector.shape_cast %492 : vector<2x16x32xf32> to vector<32x32xf32>
    %494 = arith.truncf %493 : vector<32x32xf32> to vector<32x32xbf16>
    %cst_181 = arith.constant dense<0.000000e+00> : vector<32x32xf32>
    %495 = tpu.matmul %494, %449, %cst_181 {dimension_numbers = #tpu.dot_dimension_numbers<[1], [0], [0], [1], [0, 0, 1, 1], [], []>} : vector<32x32xbf16>, vector<32x32xbf16>, vector<32x32xf32> -> vector<32x32xf32>
    %cst_182 = arith.constant dense<0xFF800000> : vector<32xf32>
    %496 = vector.multi_reduction <maximumf>, %495, %cst_182 [1] : vector<32x32xf32> to vector<32xf32>
    %497 = vector.shape_cast %496 : vector<32xf32> to vector<32x1xf32>
    %498 = vector.broadcast %497 : vector<32x1xf32> to vector<32x32xf32>
    %499 = arith.subf %495, %498 : vector<32x32xf32>
    %500 = math.exp %499 : vector<32x32xf32>
    %cst_183 = arith.constant dense<0.000000e+00> : vector<32xf32>
    %501 = vector.multi_reduction <add>, %500, %cst_183 [1] : vector<32x32xf32> to vector<32xf32>
    %502 = vector.shape_cast %501 : vector<32xf32> to vector<32x1xf32>
    %503 = tpu.reciprocal %502 {approx = true} : vector<32x1xf32> -> vector<32x1xf32>
    %504 = vector.broadcast %503 : vector<32x1xf32> to vector<32x32xf32>
    %505 = arith.mulf %500, %504 : vector<32x32xf32>
    %506 = arith.addf %434, %505 : vector<32x32xf32>
    %507 = vector.shape_cast %505 : vector<32x32xf32> to vector<2x16x32xf32>
    %508 = arith.mulf %507, %8 : vector<2x16x32xf32>
    %cst_184 = arith.constant dense<0.000000e+00> : vector<2x32xf32>
    %509 = vector.multi_reduction <add>, %508, %cst_184 [1] : vector<2x16x32xf32> to vector<2x32xf32>
    %510 = arith.mulf %507, %9 : vector<2x16x32xf32>
    %cst_185 = arith.constant dense<0.000000e+00> : vector<2x32xf32>
    %511 = vector.multi_reduction <add>, %510, %cst_185 [1] : vector<2x16x32xf32> to vector<2x32xf32>
    %512 = arith.truncf %509 : vector<2x32xf32> to vector<2x32xbf16>
    %cst_186 = arith.constant dense<0.000000e+00> : vector<2x32xf32>
    %513 = tpu.matmul %512, %450, %cst_186 {dimension_numbers = #tpu.dot_dimension_numbers<[1], [0], [0], [1], [0, 0, 1, 1], [], []>} : vector<2x32xbf16>, vector<32x32xbf16>, vector<2x32xf32> -> vector<2x32xf32>
    %514 = arith.addf %513, %484 : vector<2x32xf32>
    %c6 = arith.constant 6 : index
    %c0_187 = arith.constant 0 : index
    %c0_188 = arith.constant 0 : index
    %515 = vector.load %arg12[%c6, %c0_187, %c0_188] : memref<8x2x32xf32, #tpu.memory_space<vmem>>, vector<1x2x32xf32>
    %516 = vector.shape_cast %515 : vector<1x2x32xf32> to vector<2x32xf32>
    %517 = vector.shape_cast %514 : vector<2x32xf32> to vector<1x2x32xf32>
    tpu.vector_store %arg12[%c6, %c0_187, %c0_188], %517 {strides = array<i32>} : memref<8x2x32xf32, #tpu.memory_space<vmem>>, vector<1x2x32xf32>,
    %c0_189 = arith.constant 0 : index
    %c0_190 = arith.constant 0 : index
    %518 = vector.load %arg6[%c0_189, %c0_190] : memref<64x128xbf16, #tpu.memory_space<vmem>>, vector<64x128xbf16>
    %c0_191 = arith.constant 0 : index
    %c0_192 = arith.constant 0 : index
    %519 = vector.load %arg8[%c0_191, %c0_192] : memref<32x64xbf16, #tpu.memory_space<vmem>>, vector<32x64xbf16>
    %c0_193 = arith.constant 0 : index
    %c0_194 = arith.constant 0 : index
    %520 = vector.load %arg9[%c0_193, %c0_194] : memref<32x32xbf16, #tpu.memory_space<vmem>>, vector<32x32xbf16>
    %c0_195 = arith.constant 0 : index
    %c0_196 = arith.constant 0 : index
    %521 = vector.load %arg10[%c0_195, %c0_196] : memref<32x32xbf16, #tpu.memory_space<vmem>>, vector<32x32xbf16>
    %c0_197 = arith.constant 0 : index
    %c0_198 = arith.constant 0 : index
    %522 = vector.load %arg11[%c0_197, %c0_198] : memref<32x32xbf16, #tpu.memory_space<vmem>>, vector<32x32xbf16>
    %523 = tpu.concatenate %511, %480 in 1 : vector<2x32xf32>, vector<2x32xf32> -> vector<2x64xf32>
    %524 = arith.truncf %523 : vector<2x64xf32> to vector<2x64xbf16>
    %525 = vector.extract_strided_slice %3 {offsets = [14, 0], sizes = [2, 128], strides = [1, 1]} : vector<16x128xf32> to vector<2x128xf32>
    %cst_199 = arith.constant dense<0.000000e+00> : vector<2x128xf32>
    %526 = tpu.matmul %524, %518, %cst_199 {dimension_numbers = #tpu.dot_dimension_numbers<[1], [0], [0], [1], [0, 0, 1, 1], [], []>} : vector<2x64xbf16>, vector<64x128xbf16>, vector<2x128xf32> -> vector<2x128xf32>
    %527 = arith.addf %525, %526 : vector<2x128xf32>
    %528 = vector.extract_strided_slice %527 {offsets = [0, 0], sizes = [2, 32], strides = [1, 1]} : vector<2x128xf32> to vector<2x32xf32>
    %529 = arith.negf %528 : vector<2x32xf32>
    %530 = math.exp %529 : vector<2x32xf32>
    %cst_200 = arith.constant 1.000000e+00 : f32
    %531 = vector.broadcast %cst_200 : f32 to vector<2x32xf32>
    %532 = arith.addf %531, %530 : vector<2x32xf32>
    %533 = arith.divf %531, %532 : vector<2x32xf32>
    %534 = vector.extract_strided_slice %527 {offsets = [0, 32], sizes = [2, 32], strides = [1, 1]} : vector<2x128xf32> to vector<2x32xf32>
    %535 = arith.negf %534 : vector<2x32xf32>
    %536 = math.exp %535 : vector<2x32xf32>
    %cst_201 = arith.constant 1.000000e+00 : f32
    %537 = vector.broadcast %cst_201 : f32 to vector<2x32xf32>
    %538 = arith.addf %537, %536 : vector<2x32xf32>
    %539 = arith.divf %537, %538 : vector<2x32xf32>
    %540 = vector.extract_strided_slice %527 {offsets = [0, 64], sizes = [2, 32], strides = [1, 1]} : vector<2x128xf32> to vector<2x32xf32>
    %541 = math.tanh %540 : vector<2x32xf32>
    %542 = vector.extract_strided_slice %527 {offsets = [0, 96], sizes = [2, 32], strides = [1, 1]} : vector<2x128xf32> to vector<2x32xf32>
    %543 = arith.negf %542 : vector<2x32xf32>
    %544 = math.exp %543 : vector<2x32xf32>
    %cst_202 = arith.constant 1.000000e+00 : f32
    %545 = vector.broadcast %cst_202 : f32 to vector<2x32xf32>
    %546 = arith.addf %545, %544 : vector<2x32xf32>
    %547 = arith.divf %545, %546 : vector<2x32xf32>
    %548 = arith.mulf %539, %478 : vector<2x32xf32>
    %549 = arith.mulf %533, %541 : vector<2x32xf32>
    %550 = arith.addf %548, %549 : vector<2x32xf32>
    %551 = math.tanh %550 : vector<2x32xf32>
    %552 = arith.mulf %547, %551 : vector<2x32xf32>
    %553 = arith.truncf %552 : vector<2x32xf32> to vector<2x32xbf16>
    %cst_203 = arith.constant dense<0.000000e+00> : vector<2x64xf32>
    %554 = tpu.matmul %553, %519, %cst_203 {dimension_numbers = #tpu.dot_dimension_numbers<[1], [0], [0], [1], [0, 0, 1, 1], [], []>} : vector<2x32xbf16>, vector<32x64xbf16>, vector<2x64xf32> -> vector<2x64xf32>
    %555 = vector.extract_strided_slice %554 {offsets = [0, 0], sizes = [2, 32], strides = [1, 1]} : vector<2x64xf32> to vector<2x32xf32>
    %556 = vector.extract_strided_slice %554 {offsets = [0, 32], sizes = [2, 32], strides = [1, 1]} : vector<2x64xf32> to vector<2x32xf32>
    %557 = arith.truncf %506 : vector<32x32xf32> to vector<32x32xbf16>
    %cst_204 = arith.constant dense<0.000000e+00> : vector<32x32xf32>
    %558 = tpu.matmul %557, %520, %cst_204 {dimension_numbers = #tpu.dot_dimension_numbers<[1], [0], [0], [1], [0, 0, 1, 1], [], []>} : vector<32x32xbf16>, vector<32x32xbf16>, vector<32x32xf32> -> vector<32x32xf32>
    %559 = arith.addf %7, %558 : vector<32x32xf32>
    %560 = vector.shape_cast %559 : vector<32x32xf32> to vector<2x16x32xf32>
    %561 = vector.shape_cast %555 : vector<2x32xf32> to vector<2x1x32xf32>
    %562 = vector.broadcast %561 : vector<2x1x32xf32> to vector<2x16x32xf32>
    %563 = arith.addf %560, %562 : vector<2x16x32xf32>
    %564 = math.tanh %563 : vector<2x16x32xf32>
    %565 = vector.shape_cast %564 : vector<2x16x32xf32> to vector<32x32xf32>
    %566 = arith.truncf %565 : vector<32x32xf32> to vector<32x32xbf16>
    %cst_205 = arith.constant dense<0.000000e+00> : vector<32x32xf32>
    %567 = tpu.matmul %566, %521, %cst_205 {dimension_numbers = #tpu.dot_dimension_numbers<[1], [0], [0], [1], [0, 0, 1, 1], [], []>} : vector<32x32xbf16>, vector<32x32xbf16>, vector<32x32xf32> -> vector<32x32xf32>
    %cst_206 = arith.constant dense<0xFF800000> : vector<32xf32>
    %568 = vector.multi_reduction <maximumf>, %567, %cst_206 [1] : vector<32x32xf32> to vector<32xf32>
    %569 = vector.shape_cast %568 : vector<32xf32> to vector<32x1xf32>
    %570 = vector.broadcast %569 : vector<32x1xf32> to vector<32x32xf32>
    %571 = arith.subf %567, %570 : vector<32x32xf32>
    %572 = math.exp %571 : vector<32x32xf32>
    %cst_207 = arith.constant dense<0.000000e+00> : vector<32xf32>
    %573 = vector.multi_reduction <add>, %572, %cst_207 [1] : vector<32x32xf32> to vector<32xf32>
    %574 = vector.shape_cast %573 : vector<32xf32> to vector<32x1xf32>
    %575 = tpu.reciprocal %574 {approx = true} : vector<32x1xf32> -> vector<32x1xf32>
    %576 = vector.broadcast %575 : vector<32x1xf32> to vector<32x32xf32>
    %577 = arith.mulf %572, %576 : vector<32x32xf32>
    %578 = vector.shape_cast %577 : vector<32x32xf32> to vector<2x16x32xf32>
    %579 = arith.mulf %578, %8 : vector<2x16x32xf32>
    %cst_208 = arith.constant dense<0.000000e+00> : vector<2x32xf32>
    %580 = vector.multi_reduction <add>, %579, %cst_208 [1] : vector<2x16x32xf32> to vector<2x32xf32>
    %581 = arith.truncf %580 : vector<2x32xf32> to vector<2x32xbf16>
    %cst_209 = arith.constant dense<0.000000e+00> : vector<2x32xf32>
    %582 = tpu.matmul %581, %522, %cst_209 {dimension_numbers = #tpu.dot_dimension_numbers<[1], [0], [0], [1], [0, 0, 1, 1], [], []>} : vector<2x32xbf16>, vector<32x32xbf16>, vector<2x32xf32> -> vector<2x32xf32>
    %583 = arith.addf %582, %556 : vector<2x32xf32>
    %c7 = arith.constant 7 : index
    %c0_210 = arith.constant 0 : index
    %c0_211 = arith.constant 0 : index
    %584 = vector.load %arg12[%c7, %c0_210, %c0_211] : memref<8x2x32xf32, #tpu.memory_space<vmem>>, vector<1x2x32xf32>
    %585 = vector.shape_cast %584 : vector<1x2x32xf32> to vector<2x32xf32>
    %586 = vector.shape_cast %583 : vector<2x32xf32> to vector<1x2x32xf32>
    tpu.vector_store %arg12[%c7, %c0_210, %c0_211], %586 {strides = array<i32>} : memref<8x2x32xf32, #tpu.memory_space<vmem>>, vector<1x2x32xf32>,
    return
  }
  func.func @transform_0(%arg0: i32) -> (i32, i32, i32) {
    %c0_i32 = arith.constant 0 : i32
    %c0_i32_0 = arith.constant 0 : i32
    %c0_i32_1 = arith.constant 0 : i32
    return %c0_i32, %arg0, %c0_i32_0 : i32, i32, i32
  }
  func.func @transform_1(%arg0: i32) -> (i32, i32, i32) {
    %c0_i32 = arith.constant 0 : i32
    %c0_i32_0 = arith.constant 0 : i32
    %c0_i32_1 = arith.constant 0 : i32
    return %arg0, %c0_i32, %c0_i32_0 : i32, i32, i32
  }
  func.func @transform_2(%arg0: i32) -> (i32, i32, i32) {
    %c0_i32 = arith.constant 0 : i32
    %c0_i32_0 = arith.constant 0 : i32
    %c0_i32_1 = arith.constant 0 : i32
    return %arg0, %c0_i32, %c0_i32_0 : i32, i32, i32
  }
  func.func @transform_3(%arg0: i32) -> (i32, i32, i32) {
    %c0_i32 = arith.constant 0 : i32
    %c0_i32_0 = arith.constant 0 : i32
    %c0_i32_1 = arith.constant 0 : i32
    return %arg0, %c0_i32, %c0_i32_0 : i32, i32, i32
  }
  func.func @transform_4(%arg0: i32) -> (i32, i32) {
    %c0_i32 = arith.constant 0 : i32
    %c0_i32_0 = arith.constant 0 : i32
    %c0_i32_1 = arith.constant 0 : i32
    return %c0_i32, %c0_i32_0 : i32, i32
  }
  func.func @transform_5(%arg0: i32) -> (i32, i32) {
    %c0_i32 = arith.constant 0 : i32
    %c0_i32_0 = arith.constant 0 : i32
    %c0_i32_1 = arith.constant 0 : i32
    return %c0_i32, %c0_i32_0 : i32, i32
  }
  func.func @transform_6(%arg0: i32) -> (i32, i32) {
    %c0_i32 = arith.constant 0 : i32
    %c0_i32_0 = arith.constant 0 : i32
    %c0_i32_1 = arith.constant 0 : i32
    return %c0_i32, %c0_i32_0 : i32, i32
  }
  func.func @transform_7(%arg0: i32) -> (i32, i32) {
    %c0_i32 = arith.constant 0 : i32
    %c0_i32_0 = arith.constant 0 : i32
    %c0_i32_1 = arith.constant 0 : i32
    return %c0_i32, %c0_i32_0 : i32, i32
  }
  func.func @transform_8(%arg0: i32) -> (i32, i32) {
    %c0_i32 = arith.constant 0 : i32
    %c0_i32_0 = arith.constant 0 : i32
    %c0_i32_1 = arith.constant 0 : i32
    return %c0_i32, %c0_i32_0 : i32, i32
  }
  func.func @transform_9(%arg0: i32) -> (i32, i32) {
    %c0_i32 = arith.constant 0 : i32
    %c0_i32_0 = arith.constant 0 : i32
    %c0_i32_1 = arith.constant 0 : i32
    return %c0_i32, %c0_i32_0 : i32, i32
  }
  func.func @transform_10(%arg0: i32) -> (i32, i32) {
    %c0_i32 = arith.constant 0 : i32
    %c0_i32_0 = arith.constant 0 : i32
    %c0_i32_1 = arith.constant 0 : i32
    return %c0_i32, %c0_i32_0 : i32, i32
  }
  func.func @transform_11(%arg0: i32) -> (i32, i32, i32) {
    %c0_i32 = arith.constant 0 : i32
    %c0_i32_0 = arith.constant 0 : i32
    %c0_i32_1 = arith.constant 0 : i32
    return %c0_i32, %arg0, %c0_i32_0 : i32, i32, i32
  }
}

</mosaic_0001>

<bundles_post_ra>
// kernel: tpu_custom_call.1
= control target key start
LH: loop header
LB: loop body
LE: loop exit
PB: predicated region body
PF: predicated region fallthrough
CT: control target
= control target key end

     0   :  { %16 = vsyncpa [#allocation3], 0  ;;  %s7203_s0 = inlined_call_operand.hbm [shape: bf16[8,2,32], index: 0, kind: input, shape index: {}]   ;;  %s7204_s1 = inlined_call_operand.hbm [shape: bf16[2,16,64], index: 1, kind: input, shape index: {}]   ;;  %s7205_s2 = inlined_call_operand.vmem [shape: f32[2,16,32], index: 2, kind: input, shape index: {}]   ;;  %s7206_s3 = inlined_call_operand.hbm [shape: f32[2,16,32], index: 3, kind: input, shape index: {}]   ;;  %s7207_s4 = inlined_call_operand.hbm [shape: bf16[32,128], index: 4, kind: input, shape index: {}]   ;;  %s7208_s5 = inlined_call_operand.vmem [shape: bf16[64,128], index: 5, kind: input, shape index: {}]   ;;  %s7209_s6 = inlined_call_operand.vmem [shape: bf16[64,32], index: 6, kind: input, shape index: {}]   ;;  %s7210_s7 = inlined_call_operand.hbm [shape: bf16[32,64], index: 7, kind: input, shape index: {}]   ;;  %s7211_s8 = inlined_call_operand.hbm [shape: bf16[32,32], index: 8, kind: input, shape index: {}]   ;;  %s7212_s9 = inlined_call_operand.vmem [shape: bf16[32,32], index: 9, kind: input, shape index: {}]   ;;  %s7213_s10 = inlined_call_operand.hbm [shape: bf16[32,32], index: 10, kind: input, shape index: {}]   ;;  %s7214_s11 = inlined_call_operand.hbm [shape: f32[8,2,32], index: 11, kind: output, shape index: {}]  }
   0x1   :  { %17 = vsyncpa [#allocation6], 0 }
   0x2   :  { %18 = vsyncpa [#allocation9], 0 }
   0x3   :  { %19 = vsyncpa [#allocation12], 0 }
   0x4   :  { %20 = vsyncpa [#allocation4], 0  ;;  %s5911_s17 = smov [#allocation5]   ;;  %s5725_s21 = scalar_lea.hbm %s7204_s1, 256 }
   0x5   :  { %s38_s18 = sshll.u32 %s5911_s17, 4  ;;  %p5726_p0 = scmp.ne.s32.totalorder %s7204_s1, %s5725_s21  ;;  %s39_s18 = int_to_ptr.vmem [resolvable:$true] %s38_s18 }
   0x6   :  { %p5729_p1 = scmp.lt.u32.totalorder %s5725_s21, %s7204_s1 }
   0x8   :  { %p5731_p2 = pnand %p5729_p1, %p5726_p0 }
   0xa   :  { %5734 = shalt.err (!%p5731_p2)
}
   0xb   :  { %s5735_s26 = scalar_lea.vmem %s39_s18, 256  ;;  %p5740_p4 = scmp.lt.s32.totalorder %s39_s18, %s39_s18 }
   0xc   :  { %p5736_p3 = scmp.ne.s32.totalorder %s39_s18, %s5735_s26  ;;  %p5741_p5 = scmp.lt.s32.totalorder %s5735_s26, %s5735_s26 }
   0xe   :  { %p5742_p6 = por %p5741_p5, %p5740_p4 }
  0x10   :  { %p5743_p7 = pnand %p5742_p6, %p5736_p3 }
  0x12   :  { %5746 = shalt.err (!%p5743_p7)
}
  0x13   :  { %s5912_s27 = smov 64   ;;  %s5913_s28 = smov 4  }
  0x14   :  { %44 = dma.hbm_to_vmem [thread:$0]  %s7204_s1, 256, %s39_s18, [#allocation6], %s5912_s27, %s5912_s27, %s5913_s28  }
  0x15   :  { %s5914_s12 = smov [#allocation8]   ;;  %s5915_s14 = smov [#allocation11]  }
  0x16   :  { %s64_s13 = sshll.u32 %s5914_s12, 4  ;;  %s92_s15 = sshll.u32 %s5915_s14, 4  ;;  %s65_s13 = int_to_ptr.vmem [resolvable:$true] %s64_s13  ;;  %s93_s15 = int_to_ptr.vmem [resolvable:$true] %s92_s15 }
  0x17   :  { %s5747_s19 = scalar_lea.hbm %s7207_s4, 256 }
  0x18   :  { %p5748_p8 = scmp.ne.s32.totalorder %s7207_s4, %s5747_s19  ;;  %p5751_p9 = scmp.lt.u32.totalorder %s5747_s19, %s7207_s4 }
  0x1a   :  { %p5753_p10 = pnand %p5751_p9, %p5748_p8 }
  0x1c   :  { %5756 = shalt.err (!%p5753_p10)
}
  0x1d   :  { %s5757_s1 = scalar_lea.vmem %s65_s13, 256  ;;  %p5762_p12 = scmp.lt.s32.totalorder %s65_s13, %s65_s13 }
  0x1e   :  { %p5758_p11 = scmp.ne.s32.totalorder %s65_s13, %s5757_s1  ;;  %p5763_p13 = scmp.lt.s32.totalorder %s5757_s1, %s5757_s1 }
  0x20   :  { %p5764_p0 = por %p5763_p13, %p5762_p12 }
  0x22   :  { %p5765_p1 = pnand %p5764_p0, %p5758_p11 }
  0x24   :  { %5768 = shalt.err (!%p5765_p1)
}
  0x25   :  { %70 = dma.hbm_to_vmem [thread:$0]  %s7207_s4, 256, %s65_s13, [#allocation9], %s5912_s27, %s5912_s27, %s5913_s28  }
  0x26   :  { %s5769_s29 = scalar_lea.hbm %s7211_s8, 256 }
  0x27   :  { %p5770_p2 = scmp.ne.s32.totalorder %s7211_s8, %s5769_s29  ;;  %p5773_p3 = scmp.lt.u32.totalorder %s5769_s29, %s7211_s8 }
  0x29   :  { %p5775_p4 = pnand %p5773_p3, %p5770_p2 }
  0x2b   :  { %5778 = shalt.err (!%p5775_p4)
}
  0x2c   :  { %s5779_s17 = scalar_lea.vmem %s93_s15, 256  ;;  %p5784_p6 = scmp.lt.s32.totalorder %s93_s15, %s93_s15 }
  0x2d   :  { %p5780_p5 = scmp.ne.s32.totalorder %s93_s15, %s5779_s17  ;;  %p5785_p7 = scmp.lt.s32.totalorder %s5779_s17, %s5779_s17 }
  0x2f   :  { %p5786_p8 = por %p5785_p7, %p5784_p6 }
  0x31   :  { %p5787_p9 = pnand %p5786_p8, %p5780_p5 }
  0x33   :  { %5790 = shalt.err (!%p5787_p9)
}
  0x34   :  { %98 = dma.hbm_to_vmem [thread:$0]  %s7211_s8, 256, %s93_s15, [#allocation12], %s5912_s27, %s5912_s27, %s5913_s28  }
  0x35   :  { %s5916_s19 = smov [#allocation2]   ;;  %s5791_s23 = scalar_lea.hbm %s7203_s0, 128 }
  0x36   :  { %s26_s20 = sshll.u32 %s5916_s19, 4  ;;  %p5792_p10 = scmp.ne.s32.totalorder %s7203_s0, %s5791_s23  ;;  %s27_s20 = int_to_ptr.vmem [resolvable:$true] %s26_s20 }
  0x37   :  { %p5795_p11 = scmp.lt.u32.totalorder %s5791_s23, %s7203_s0 }
  0x39   :  { %p5797_p12 = pnand %p5795_p11, %p5792_p10 }
  0x3b   :  { %5800 = shalt.err (!%p5797_p12)
}
  0x3c   :  { %s5801_s26 = scalar_lea.vmem %s27_s20, 128  ;;  %p5806_p0 = scmp.lt.s32.totalorder %s27_s20, %s27_s20 }
  0x3d   :  { %p5802_p13 = scmp.ne.s32.totalorder %s27_s20, %s5801_s26  ;;  %p5807_p1 = scmp.lt.s32.totalorder %s5801_s26, %s5801_s26 }
  0x3f   :  { %p5808_p2 = por %p5807_p1, %p5806_p0 }
  0x41   :  { %p5809_p3 = pnand %p5808_p2, %p5802_p13 }
  0x43   :  { %5812 = shalt.err (!%p5809_p3)
}
  0x44   :  { %s5917_s8 = smov 16   ;;  %s5918_s15 = smov 1  }
  0x45   :  { %32 = dma.hbm_to_vmem [thread:$0]  %s7203_s0, 128, %s27_s20, [#allocation3], %s5917_s8, %s5917_s8, %s5918_s15  }
  0x46   :  { %s5919_s12 = smov [#allocation7]   ;;  %s5813_s4 = scalar_lea.hbm %s7206_s3, 512 }
  0x47   :  { %s52_s14 = sshll.u32 %s5919_s12, 4  ;;  %p5814_p4 = scmp.ne.s32.totalorder %s7206_s3, %s5813_s4  ;;  %s53_s14 = int_to_ptr.vmem [resolvable:$true] %s52_s14 }
  0x48   :  { %p5817_p5 = scmp.lt.u32.totalorder %s5813_s4, %s7206_s3 }
  0x4a   :  { %p5819_p6 = pnand %p5817_p5, %p5814_p4 }
  0x4c   :  { %5822 = shalt.err (!%p5819_p6)
}
  0x4d   :  { %s5823_s23 = scalar_lea.vmem %s53_s14, 512  ;;  %p5828_p8 = scmp.lt.s32.totalorder %s53_s14, %s53_s14 }
  0x4e   :  { %p5824_p7 = scmp.ne.s32.totalorder %s53_s14, %s5823_s23  ;;  %p5829_p9 = scmp.lt.s32.totalorder %s5823_s23, %s5823_s23 }
  0x50   :  { %p5830_p10 = por %p5829_p9, %p5828_p8 }
  0x52   :  { %p5831_p11 = pnand %p5830_p10, %p5824_p7 }
  0x54   :  { %5834 = shalt.err (!%p5831_p11)
}
  0x55   :  { %s5920_s0 = smov 128   ;;  %s5921_s20 = smov 8  }
  0x56   :  { %58 = dma.hbm_to_vmem [thread:$0]  %s7206_s3, 512, %s53_s14, [#allocation6], %s5920_s0, %s5920_s0, %s5921_s20  }
  0x57   :  { %s5922_s24 = smov [#allocation10]   ;;  %s5923_s26 = smov [#allocation13]  }
  0x58   :  { %s80_s25 = sshll.u32 %s5922_s24, 4  ;;  %s106_s8 = sshll.u32 %s5923_s26, 4  ;;  %s81_s25 = int_to_ptr.vmem [resolvable:$true] %s80_s25  ;;  %s107_s8 = int_to_ptr.vmem [resolvable:$true] %s106_s8 }
  0x59   :  { %s5835_s30 = scalar_lea.hbm %s7210_s7, 256 }
  0x5a   :  { %p5836_p12 = scmp.ne.s32.totalorder %s7210_s7, %s5835_s30  ;;  %p5839_p13 = scmp.lt.u32.totalorder %s5835_s30, %s7210_s7 }
  0x5c   :  { %p5841_p0 = pnand %p5839_p13, %p5836_p12 }
  0x5e   :  { %5844 = shalt.err (!%p5841_p0)
}
  0x5f   :  { %s5845_s3 = scalar_lea.vmem %s81_s25, 256  ;;  %p5850_p2 = scmp.lt.s32.totalorder %s81_s25, %s81_s25 }
  0x60   :  { %p5846_p1 = scmp.ne.s32.totalorder %s81_s25, %s5845_s3  ;;  %p5851_p3 = scmp.lt.s32.totalorder %s5845_s3, %s5845_s3 }
  0x62   :  { %p5852_p4 = por %p5851_p3, %p5850_p2 }
  0x64   :  { %p5853_p5 = pnand %p5852_p4, %p5846_p1 }
  0x66   :  { %5856 = shalt.err (!%p5853_p5)
}
  0x67   :  { %86 = dma.hbm_to_vmem [thread:$0]  %s7210_s7, 256, %s81_s25, [#allocation9], %s5912_s27, %s5912_s27, %s5913_s28  }
  0x68   :  { %s5857_s22 = scalar_lea.hbm %s7213_s10, 256 }
  0x69   :  { %p5858_p6 = scmp.ne.s32.totalorder %s7213_s10, %s5857_s22  ;;  %p5861_p7 = scmp.lt.u32.totalorder %s5857_s22, %s7213_s10 }
  0x6b   :  { %p5863_p8 = pnand %p5861_p7, %p5858_p6 }
  0x6d   :  { %5866 = shalt.err (!%p5863_p8)
}
  0x6e   :  { %s5867_s18 = scalar_lea.vmem %s107_s8, 256  ;;  %p5872_p10 = scmp.lt.s32.totalorder %s107_s8, %s107_s8 }
  0x6f   :  { %p5868_p9 = scmp.ne.s32.totalorder %s107_s8, %s5867_s18  ;;  %p5873_p11 = scmp.lt.s32.totalorder %s5867_s18, %s5867_s18 }
  0x71   :  { %p5874_p12 = por %p5873_p11, %p5872_p10 }
  0x73   :  { %p5875_p13 = pnand %p5874_p12, %p5868_p9 }
  0x75   :  { %5878 = shalt.err (!%p5875_p13)
}
  0x76   :  { %112 = dma.hbm_to_vmem [thread:$0]  %s7213_s10, 256, %s107_s8, [#allocation12], %s5912_s27, %s5912_s27, %s5913_s28  }
  0x77   :  { %5901 = dma.done.wait [#allocation3], 128  }
  0x78   :  { %5902 = vsyncadd [#allocation3], 4294967168 }
  0x79   :  { %5903 = dma.done.wait [#allocation6], 768  }
  0x7a   :  { %5904 = vsyncadd [#allocation6], 4294966528 }
  0x7b   :  { %5905 = dma.done.wait [#allocation9], 512  }
  0x7c   :  { %5906 = vsyncadd [#allocation9], 4294966784 }
  0x7d   :  { %5907 = dma.done.wait [#allocation12], 512  }
  0x7e   :  { %5908 = vsyncadd [#allocation12], 4294966784  ;;  %v162_v0 = vlaneseq  ;;  %v5924_v1 = vmov 0.0   ;;  %vm5925_vm0 = vmmov 0   ;;  %v5926_v2 = vmov 1966171168  }
  0x7f   :  { %4955 = vmatprep.subr.bf16.mxu0 %v5924_v1  ;;  %4959 = vmatprep.mubr.msk.bf16.mxu0 %vm5925_vm0, %v5924_v1  ;;  %v160_v3 = vunpack.c.l.s4 %v5926_v2  ;;  %v5349_v6 = vld [vmem:[#allocation8] sm:$0xff]   ;;  %v5350_v7 = vld [vmem:[#allocation8 + $0x8] sm:$0xff]   ;;  %vm216_vm1 = vcmask 261120   ;;  %v5352_v31 = vld [vmem:[%s7208_s5 + $0x8] sm:$0xff]   ;;  %v5927_v34 = vmov 0.0|0.0   ;;  %s5928_s12 = smov 32  }
  0x80   :  { %v6095_v5 = vshrl.u32 %v162_v0, 7  ;;  %4956 = vmatpush3.bf16.msra.mxu0 %v5349_v6  ;;  %v135_v9 = vld [vmem:[#allocation2] sm:$0x1]  ;;  %v136_v10 = vld [vmem:[#allocation2 + $0x1] sm:$0x1]  ;;  %v5353_v32 = vld [vmem:[%s7208_s5 + $0x10] sm:$0xff]  }
  0x81   :  { %v161_v4 = vunpack.c.0.s8 %v160_v3  ;;  %v137_v11 = vld [vmem:[#allocation2 + $0x2] sm:$0x1]  ;;  %4957 = vmatprep.subr.bf16.mxu0 %v5924_v1  ;;  %v138_v12 = vld [vmem:[#allocation2 + $0x3] sm:$0x1]  ;;  %v139_v13 = vld [vmem:[#allocation2 + $0x4] sm:$0x1]  ;;  %v155_v15 = vcombine.low %v135_v9, %v136_v10 }
  0x82   :  { %v140_v14 = vld [vmem:[#allocation2 + $0x5] sm:$0x1]  ;;  %v141_v16 = vld [vmem:[#allocation2 + $0x6] sm:$0x1]  ;;  %v142_v17 = vld [vmem:[#allocation2 + $0x7] sm:$0x1]  ;;  %v156_v18 = vcombine.low %v137_v11, %v138_v12 }
  0x83   :  { %v6098_v8 = vsub.s32 %v161_v4, %v6095_v5  ;;  %v157_v19 = vcombine.low %v139_v13, %v140_v14  ;;  %v158_v20 = vcombine.low %v141_v16, %v142_v17  ;;  %v5351_v28 = vld [vmem:[%s7208_s5] sm:$0xff]   ;;  %v5354_v33 = vld [vmem:[%s7208_s5 + $0x18] sm:$0xff]   ;;  %v5356_v55 = vld [vmem:[%s7209_s6 + $0x8] sm:$0xff]   ;;  %v5929_v58 = vmov 0   ;;  %s5931_s10 = smov [#allocation14]  }
  0x84   :  { %4958 = vmatpush3.bf16.msra.mxu0 %v5350_v7  ;;  %v5355_v54 = vld [vmem:[%s7209_s6] sm:$0xff]   ;;  %v5358_v56 = vld [vmem:[#allocation11] sm:$0xff]   ;;  %v5361_v59 = vld [vmem:[#allocation5] sm:$0xff]   ;;  %vm307_vm2 = vcmask 523264   ;;  %vm823_vm3 = vcmask 1041409   ;;  %vm884_vm4 = vcmask 254976  }
  0x85   :  { %v165_v21 = vrot.slane %v155_v15, %v6098_v8  ;;  %v172_v22 = vrot.slane %v156_v18, %v6098_v8  ;;  %v179_v23 = vrot.slane %v157_v19, %v6098_v8  ;;  %4975 = vmatprep.subr.bf16.mxu0 %v5924_v1  ;;  %v186_v24 = vrot.slane %v158_v20, %v6098_v8  ;;  %v5360_v57 = vld [vmem:[#allocation11 + $0x8] sm:$0xff]   ;;  %v5357_v60 = vld [vmem:[%s7209_s6 + $0x10] sm:$0xff]   ;;  %v5359_v62 = vld [vmem:[%s7209_s6 + $0x18] sm:$0xff]   ;;  %s4611_s28 = sshll.u32 %s5931_s10, 4  ;;  %s4612_s28 = int_to_ptr.vmem [resolvable:$true] %s4611_s28 }
  0x86   :  { %4963 = vmatprep.subr.bf16.mxu1 %v5355_v54  ;;  %4971 = vmatprep.mubr.msk.bf16.mxu1 %vm307_vm2, %v5361_v59  ;;  %v5362_v63 = vld [vmem:[#allocation5 + $0x8] sm:$0xff]   ;;  %v5363_v0 = vld [vmem:[#allocation10] sm:$0xff]   ;;  %s5879_s25 = scalar_lea.vmem %s4612_s28, 256  ;;  %p5884_p1 = scmp.lt.s32.totalorder %s4612_s28, %s4612_s28 }
  0x87   :  { %v187_v25 = vcombine.low %v165_v21, %v172_v22  ;;  %v188_v26 = vcombine.low %v179_v23, %v186_v24  ;;  %4964 = vmatpush3.bf16.msra.mxu1 %v5355_v54  ;;  %v5364_v2 = vld [vmem:[#allocation10 + $0x8] sm:$0xff]   ;;  %v5365_v21 = vld [vmem:[%s7212_s9] sm:$0xff]   ;;  %v5366_v22 = vld [vmem:[%s7212_s9 + $0x8] sm:$0xff]   ;;  %p5880_p0 = scmp.ne.s32.totalorder %s4612_s28, %s5879_s25  ;;  %p5885_p2 = scmp.lt.s32.totalorder %s5879_s25, %s5879_s25 }
  0x88   :  { %4965 = vmatprep.subr.bf16.mxu1 %v5356_v55 }
  0x89   :  { %v195_v27 = vrot.slane %v187_v25, %v6098_v8  ;;  %v202_v29 = vrot.slane %v188_v26, %v6098_v8  ;;  %v6188_v25 = vsub.s32 0, %v6095_v5  ;;  %p5886_p3 = por %p5885_p2, %p5884_p1 }
  0x8b   :  { %v203_v30 = vcombine.low %v195_v27, %v202_v29  ;;  %4966 = vmatpush3.bf16.msra.mxu1 %v5356_v55  ;;  %p5887_p4 = pnand %p5886_p3, %p5880_p0 }
  0x8c   :  { %4967 = vmatprep.subr.bf16.mxu1 %v5357_v60 }
  0x8d   :  { %4960 = vmatmul.mubr.msk.bf16.vlgmr.msra.gmra.mrb[0].mxu0 %vm216_vm1, %v203_v30 }
  0x8e   :  { %4976 = vmatpush3.bf16.msra.mxu0 %v5351_v28  ;;  %4983 = vmatprep.mubr.msk.bf16.mxu0 %vm5925_vm0, %v5924_v1 }
  0x8f   :  { %4977 = vmatprep.subr.bf16.mxu0 %v5924_v1  ;;  %4968 = vmatpush3.bf16.msra.mxu1 %v5357_v60 }
  0x90   :  { %4969 = vmatprep.subr.bf16.mxu1 %v5359_v62 }
  0x92   :  { %4978 = vmatpush3.bf16.msra.mxu0 %v5352_v31 }
  0x93   :  { %4979 = vmatprep.subr.bf16.mxu0 %v5924_v1  ;;  %4970 = vmatpush3.bf16.msra.mxu1 %v5359_v62 }
  0x94   :  { %4987 = vmatprep.subr.bf16.mxu1 %v5924_v1 }
  0x96   :  { %4980 = vmatpush3.bf16.msra.mxu0 %v5353_v32  ;;  %4972 = vmatmul.mubr.msk.bf16.vlgmr.msra.gmra.mrb[0].mxu1 %vm307_vm2, %v5362_v63 }
  0x97   :  { %4981 = vmatprep.subr.bf16.mxu0 %v5924_v1  ;;  %4988 = vmatpush3.bf16.msra.mxu1 %v5363_v0 }
  0x98   :  { %4991 = vmatprep.mubr.msk.bf16.mxu1 %vm5925_vm0, %v5924_v1  ;;  %4989 = vmatprep.subr.bf16.mxu1 %v5924_v1 }
  0x9a   :  { %4982 = vmatpush3.bf16.msra.mxu0 %v5354_v33 }
  0x9b   :  { %4995 = vmatprep.subr.bf16.mxu0 %v5358_v56  ;;  %4990 = vmatpush3.bf16.msra.mxu1 %v5364_v2 }
  0x9c   :  { %5003 = vmatprep.subr.bf16.mxu1 %v5365_v21 }
  0x9d   :  { %4984 = vmatmul.mubr.bf16.vlgmr.msra.gmra.mrb[4].mxu0 %v5927_v34 }
  0x9e   :  { %4999 = vmatprep.mubr.bf16.mxu0 %v5929_v58  ;;  %4996 = vmatpush3.bf16.msra.mxu0 %v5358_v56 }
  0x9f   :  { %4997 = vmatprep.subr.bf16.mxu0 %v5360_v57 }
  0xa2   :  { %4998 = vmatpush3.bf16.msra.mxu0 %v5360_v57 }
  0xa3   :  { %5011 = vmatprep.subr.bf16.mxu0 %v5924_v1 }
  0xa5   :  { %5000 = vmatmul.mubr.bf16.vlgmr.msra.gmra.mrb[8].mxu0 %v5929_v58 }
  0xa6   :  { %5015 = vmatprep.mubr.msk.bf16.mxu0 %vm5925_vm0, %v5924_v1 }
 0x160   :  { %v6126_v35 = vpop.f32.mrb[0].mxu0 }
 0x161   :  { %v4961_v36 = vpop.f32.mrb[1].mxu0 }
 0x162   :  { %v6128_v37 = vpop.f32.mrb[2].mxu0 }
 0x163   :  { %v4962_v38 = vpop.f32.mrb[3].mxu0 }
 0x169   :  { %v6163_v12 = vpop.f32.mrb[0].mxu1 }
 0x16a   :  { %v6166_v14 = vpop.f32.mrb[1].mxu1 }
 0x16b   :  { %v6169_v16 = vpop.f32.mrb[2].mxu1 }
 0x16c   :  { %v6172_v18 = vpop.f32.mrb[3].mxu1 }
 0x170   :  { %v457_v39 = vpop.f32.mrb[4].mxu0 }
 0x171   :  { %v463_v40 = vadd.f32 %v457_v39, %v6126_v35  ;;  %v4985_v41 = vpop.f32.mrb[5].mxu0 }
 0x172   :  { %v460_v42 = vpop.f32.mrb[6].mxu0 }
 0x173   :  { %v4986_v43 = vpop.f32.mrb[7].mxu0  ;;  %5453 = vtanh.f32 %v463_v40  ;;  %v4641_v45 = vmul.f32 -1.442695, %v463_v40 }
 0x175   :  { %5455 = vpow2.f32 %v4641_v45 }
 0x178   :  { %v5001_v7 = vpop.f32.mrb[8].mxu0 }
 0x179   :  { %v596_v9 = vpop.f32.mrb[9].mxu0  ;;  %v613_v13 = vadd.f32 %v5001_v7, %v6163_v12 }
 0x17a   :  { %v5002_v10 = vpop.f32.mrb[10].mxu0  ;;  %v611_v15 = vadd.f32 %v596_v9, %v6166_v14 }
 0x17b   :  { %v599_v11 = vpop.f32.mrb[11].mxu0  ;;  %v614_v17 = vadd.f32 %v5002_v10, %v6169_v16 }
 0x17c   :  { %v612_v19 = vadd.f32 %v599_v11, %v6172_v18 }
 0x17d   :  { %v5454_v44 = vpop.eup %5453 }
 0x17e   :  { %473 = vrot.lane.b32.xlu0 %v5454_v44, %s5912_s27 }
 0x17f   :  { %v5456_v46 = vpop.eup %5455 }
 0x180   :  { %v467_v47 = vadd.f32 1.0, %v5456_v46 }
 0x182   :  { %5457 = vrcp.f32 %v467_v47 }
 0x18c   :  { %v5458_v48 = vpop.eup %5457 }
 0x18d   :  { %v471_v51 = vmul.f32 0.0, %v5458_v48 }
 0x1f0   :  { %v474_v49 = vpop.permute.xlu0 %473 }
 0x1f1   :  { %v476_v50 = vmul.f32 %v5458_v48, %v474_v49 }
 0x1f3   :  { %478 = vrot.lane.b32.xlu0 %v476_v50, %s5928_s12 }
 0x265   :  { %v479_v52 = vpop.permute.xlu0 %478 }
 0x266   :  { %v6133_v53 = vadd.f32 %v479_v52, %v471_v51 }
 0x268   :  { %5459 = vtanh.f32 %v6133_v53 }
 0x272   :  { %v5460_v61 = vpop.eup %5459 }
 0x273   :  { %484 = vrot.lane.b32.xlu1 %v5460_v61, %s5912_s27 }
 0x2e5   :  { %v485_v3 = vpop.permute.xlu1 %484 }
 0x2e6   :  { %v6158_v4 = vmul.f32 %v5458_v48, %v485_v3 }
 0x2e8   :  { %v488_v6 = vpack.c.bf16 %v6158_v4, %v6158_v4 }
 0x2ea   :  { %490 = vrot.lane.b32.xlu1 %v488_v6, %s5928_s12 }
 0x35c   :  { %v491_v20 = vpop.permute.xlu1 %490 }
 0x35d   :  { %4992 = vmatmul.mubr.msk.bf16.vlgmr.msra.gmra.mrb[4].mxu1 %vm216_vm1, %v491_v20  ;;  %v5369_v20 = vld [vmem:[%s7208_s5 + $0x10] sm:$0xff]  }
 0x35e   :  { %5004 = vmatpush3.bf16.msra.mxu1 %v5365_v21  ;;  %v5371_v21 = vld [vmem:[%s7208_s5 + $0x18] sm:$0xff]  }
 0x35f   :  { %5005 = vmatprep.subr.bf16.mxu1 %v5366_v22 }
 0x362   :  { %5006 = vmatpush3.bf16.msra.mxu1 %v5366_v22  ;;  %v5372_v22 = vld [vmem:[#allocation13 + $0x8] sm:$0xff]  }
 0x363   :  { %5019 = vmatprep.subr.bf16.mxu1 %v5924_v1 }
 0x430   :  { %v6183_v23 = vpop.f32.mrb[4].mxu1 }
 0x431   :  { %v622_v24 = vrot.slane %v6183_v23, %v6098_v8  ;;  %v4993_v26 = vpop.f32.mrb[5].mxu1 }
 0x432   :  { %v544_v27 = vpop.f32.mrb[6].mxu1 }
 0x433   :  { %v623_v28 = vcombine.high %v622_v24, %v622_v24  ;;  %v630_v29 = vrot.slane %v622_v24, %v6098_v8  ;;  %v4994_v30 = vpop.f32.mrb[7].mxu1 }
 0x434   :  { %v6228_v30 = vld [vmem:[%s7205_s2] sm:$0xff] }
 0x435   :  { %v637_v31 = vrot.slane %v623_v28, %v6098_v8  ;;  %v641_v32 = vrot.slane %v630_v29, %v6188_v25 }
 0x437   :  { %v645_v33 = vrot.slane %v637_v31, %v6188_v25  ;;  %v648_v34 = vadd.f32 %v641_v32, %v611_v15  ;;  %v649_v36 = vadd.f32 %v641_v32, %v612_v19  ;;  %v5368_v19 = vld [vmem:[%s7208_s5 + $0x8] sm:$0xff]   ;;  %v6230_v31 = vld [vmem:[#allocation7] sm:$0xff] }
 0x439   :  { %v650_v38 = vadd.f32 %v645_v33, %v613_v13  ;;  %v651_v39 = vadd.f32 %v645_v33, %v614_v17  ;;  %5461 = vtanh.f32 %v648_v34  ;;  %v5367_v17 = vld [vmem:[%s7208_s5] sm:$0xff]   ;;  %v6237_v34 = vld [vmem:[%s7205_s2 + $0x8] sm:$0xff] }
 0x43a   :  { %5463 = vtanh.f32 %v649_v36  ;;  %v6239_v36 = vld [vmem:[#allocation7 + $0x8] sm:$0xff] }
 0x43b   :  { %5465 = vtanh.f32 %v650_v38 }
 0x43c   :  { %5467 = vtanh.f32 %v651_v39 }
 0x443   :  { %v5462_v5 = vpop.eup %5461 }
 0x444   :  { %v5464_v40 = vpop.eup %5463 }
 0x445   :  { %v5466_v41 = vpop.eup %5465  ;;  %v656_v42 = vpack.c.bf16 %v5464_v40, %v5462_v5 }
 0x446   :  { %v5468_v43 = vpop.eup %5467 }
 0x447   :  { %5007 = vmatprep.mubr.msk.bf16.mxu1 %vm216_vm1, %v656_v42  ;;  %v657_v44 = vpack.c.bf16 %v5468_v43, %v5466_v41 }
 0x449   :  { %5008 = vmatmul.mubr.msk.bf16.vlgmr.msra.gmra.mrb[8].mxu1 %vm216_vm1, %v657_v44  ;;  %v6256_v44 = vld [vmem:[%s7205_s2 + $0x10] sm:$0xff] }
 0x44a   :  { %5027 = vmatprep.mubr.msk.bf16.mxu1 %vm5925_vm0, %v5924_v1  ;;  %5020 = vmatpush3.bf16.msra.mxu1 %v5367_v17 }
 0x44b   :  { %5021 = vmatprep.subr.bf16.mxu1 %v5924_v1 }
 0x44e   :  { %5022 = vmatpush3.bf16.msra.mxu1 %v5368_v19 }
 0x44f   :  { %5023 = vmatprep.subr.bf16.mxu1 %v5924_v1 }
 0x452   :  { %5024 = vmatpush3.bf16.msra.mxu1 %v5369_v20 }
 0x453   :  { %5025 = vmatprep.subr.bf16.mxu1 %v5924_v1 }
 0x456   :  { %5026 = vmatpush3.bf16.msra.mxu1 %v5371_v21 }
 0x51c   :  { %v5009_v45 = vpop.f32.mrb[8].mxu1 }
 0x51d   :  { %v710_v46 = vpop.f32.mrb[9].mxu1  ;;  %v731_v51 = vsel %vm216_vm1, %v5009_v45, -inf }
 0x51e   :  { %v5010_v47 = vpop.f32.mrb[10].mxu1  ;;  %v725_v48 = vsel %vm216_vm1, %v710_v46, -inf }
 0x51f   :  { %726 = vmax.xlane.f32.xlu0 %v725_v48  ;;  %v713_v49 = vpop.f32.mrb[11].mxu1  ;;  %v734_v52 = vsel %vm216_vm1, %v5010_v47, -inf }
 0x520   :  { %v728_v50 = vsel %vm216_vm1, %v713_v49, -inf }
 0x521   :  { %729 = vmax.xlane.f32.xlu1 %v728_v50 }
 0x523   :  { %732 = vmax.xlane.f32.xlu0 %v731_v51  ;;  %v6267_v51 = vld [vmem:[%s7205_s2 + $0x18] sm:$0xff] }
 0x527   :  { %735 = vmax.xlane.f32.xlu0 %v734_v52  ;;  %v6269_v52 = vld [vmem:[#allocation7 + $0x18] sm:$0xff] }
 0x5ac   :  { %v727_v54 = vpop.xlane.xlu0 %726 }
 0x5ad   :  { %v737_v55 = vsub.f32 %v710_v46, %v727_v54 }
 0x5ae   :  { %v730_v56 = vpop.xlane.xlu1 %729 }
 0x5af   :  { %v741_v57 = vmul.f32 1.442695, %v737_v55  ;;  %v738_v58 = vsub.f32 %v713_v49, %v730_v56 }
 0x5b0   :  { %v733_v59 = vpop.xlane.xlu0 %732 }
 0x5b1   :  { %5469 = vpow2.f32 %v741_v57  ;;  %v743_v60 = vmul.f32 1.442695, %v738_v58  ;;  %v739_v61 = vsub.f32 %v5009_v45, %v733_v59  ;;  %v6258_v45 = vld [vmem:[#allocation7 + $0x10] sm:$0xff] }
 0x5b3   :  { %5471 = vpow2.f32 %v743_v60  ;;  %v745_v62 = vmul.f32 1.442695, %v739_v61 }
 0x5b4   :  { %v736_v63 = vpop.xlane.xlu0 %735 }
 0x5b5   :  { %5473 = vpow2.f32 %v745_v62  ;;  %v740_v0 = vsub.f32 %v5010_v47, %v736_v63 }
 0x5b7   :  { %v747_v2 = vmul.f32 1.442695, %v740_v0 }
 0x5b9   :  { %5475 = vpow2.f32 %v747_v2 }
 0x5bb   :  { %v5470_v3 = vpop.eup %5469 }
 0x5bc   :  { %v749_v6 = vsel %vm216_vm1, %v5470_v3, 0.0 }
 0x5bd   :  { %v5472_v7 = vpop.eup %5471  ;;  %750 = vadd.xlane.f32.xlu1 %v749_v6 }
 0x5be   :  { %v752_v9 = vsel %vm216_vm1, %v5472_v7, 0.0 }
 0x5bf   :  { %v5474_v10 = vpop.eup %5473  ;;  %753 = vadd.xlane.f32.xlu0 %v752_v9 }
 0x5c0   :  { %v755_v11 = vsel %vm216_vm1, %v5474_v10, 0.0 }
 0x5c1   :  { %756 = vadd.xlane.f32.xlu1 %v755_v11 }
 0x5c3   :  { %v5476_v13 = vpop.eup %5475 }
 0x5c4   :  { %v758_v15 = vsel %vm216_vm1, %v5476_v13, 0.0 }
 0x5c5   :  { %759 = vadd.xlane.f32.xlu0 %v758_v15 }
 0x5d2   :  { %915 = vrot.lane.b32.xlu1 %v6158_v4, %s5912_s27  ;;  %v5370_v4 = vld [vmem:[#allocation13] sm:$0xff]  }
 0x5d3   :  { %5012 = vmatpush3.bf16.msra.mxu0 %v5370_v4 }
 0x5d4   :  { %5013 = vmatprep.subr.bf16.mxu0 %v5924_v1 }
 0x5d7   :  { %5014 = vmatpush3.bf16.msra.mxu0 %v5372_v22 }
 0x5d8   :  { %5031 = vmatprep.subr.bf16.mxu0 %v5924_v1 }
 0x64a   :  { %v751_v24 = vpop.xlane.xlu1 %750 }
 0x64b   :  { %5477 = vrcp.f32 %v751_v24 }
 0x64c   :  { %v754_v26 = vpop.xlane.xlu0 %753 }
 0x64d   :  { %5479 = vrcp.f32 %v754_v26 }
 0x64e   :  { %v757_v27 = vpop.xlane.xlu1 %756 }
 0x64f   :  { %5481 = vrcp.f32 %v757_v27 }
 0x652   :  { %v760_v28 = vpop.xlane.xlu0 %759 }
 0x653   :  { %5483 = vrcp.f32 %v760_v28 }
 0x655   :  { %v5478_v29 = vpop.eup %5477 }
 0x656   :  { %v6232_v32 = vmul.f32 %v5478_v29, %v5470_v3 }
 0x657   :  { %v5480_v33 = vpop.eup %5479 }
 0x658   :  { %v773_v38 = vmul.f32 %v6232_v32, %v6228_v30  ;;  %v6243_v39 = vmul.f32 %v5480_v33, %v5472_v7  ;;  %v795_v5 = vmul.f32 %v6232_v32, %v6230_v31 }
 0x659   :  { %v5482_v40 = vpop.eup %5481 }
 0x65a   :  { %v774_v41 = vmul.f32 %v6243_v39, %v6237_v34  ;;  %v6249_v42 = vmul.f32 %v5482_v40, %v5474_v10  ;;  %v796_v43 = vmul.f32 %v6243_v39, %v6239_v36  ;;  %v777_v46 = vsel %vm216_vm1, %v773_v38, 0.0 }
 0x65b   :  { %v799_v48 = vsel %vm216_vm1, %v795_v5, 0.0 }
 0x65c   :  { %v778_v47 = vsel %vm216_vm1, %v774_v41, 0.0  ;;  %v800_v49 = vsel %vm216_vm1, %v796_v43, 0.0  ;;  %v775_v56 = vmul.f32 %v6249_v42, %v6256_v44  ;;  %v797_v58 = vmul.f32 %v6249_v42, %v6258_v45 }
 0x65d   :  { %v5484_v50 = vpop.eup %5483  ;;  %v801_v54 = vadd.f32 %v800_v49, %v799_v48  ;;  %v779_v55 = vadd.f32 %v778_v47, %v777_v46  ;;  %v916_v48 = vpop.permute.xlu1 %915 }
 0x65e   :  { %v6273_v57 = vmul.f32 %v5484_v50, %v5476_v13  ;;  %v786_v2 = vsel %vm216_vm1, %v775_v56, 0.0  ;;  %v808_v6 = vsel %vm216_vm1, %v797_v58, 0.0 }
 0x65f   :  { %v802_v59 = vrot.slane %v801_v54, 4  ;;  %v780_v60 = vrot.slane %v779_v55, 4 }
 0x660   :  { %v776_v61 = vmul.f32 %v6273_v57, %v6267_v51  ;;  %v798_v62 = vmul.f32 %v6273_v57, %v6269_v52 }
 0x661   :  { %v803_v63 = vadd.f32 %v802_v59, %v801_v54  ;;  %v781_v0 = vadd.f32 %v780_v60, %v779_v55 }
 0x662   :  { %v787_v3 = vsel %vm216_vm1, %v776_v61, 0.0  ;;  %v809_v7 = vsel %vm216_vm1, %v798_v62, 0.0 }
 0x663   :  { %v804_v9 = vrot.slane %v803_v63, 2  ;;  %v810_v10 = vadd.f32 %v809_v7, %v808_v6  ;;  %v782_v11 = vrot.slane %v781_v0, 2  ;;  %v788_v13 = vadd.f32 %v787_v3, %v786_v2 }
 0x665   :  { %v811_v15 = vrot.slane %v810_v10, 4  ;;  %v783_v17 = vadd.f32 %v782_v11, %v781_v0  ;;  %v789_v19 = vrot.slane %v788_v13, 4  ;;  %v805_v20 = vadd.f32 %v804_v9, %v803_v63 }
 0x667   :  { %v812_v4 = vadd.f32 %v811_v15, %v810_v10  ;;  %v784_v21 = vrot.slane %v783_v17, 1  ;;  %v790_v22 = vadd.f32 %v789_v19, %v788_v13  ;;  %v806_v27 = vrot.slane %v805_v20, 1 }
 0x669   :  { %v813_v24 = vrot.slane %v812_v4, 2  ;;  %v791_v26 = vrot.slane %v790_v22, 2  ;;  %v785_v29 = vadd.f32 %v784_v21, %v783_v17  ;;  %v807_v40 = vadd.f32 %v806_v27, %v805_v20  ;;  %v5374_v27 = vld [vmem:[#allocation10 + $0x8] sm:$0xff]  }
 0x66b   :  { %v814_v28 = vadd.f32 %v813_v24, %v812_v4  ;;  %v792_v33 = vadd.f32 %v791_v26, %v790_v22  ;;  %v817_v46 = vpack.c.bf16 %v785_v29, %v785_v29  ;;  %v999_v4 = vrot.slane %v6133_v53, 6  ;;  %v5373_v26 = vld [vmem:[#allocation10] sm:$0xff]  }
 0x66d   :  { %v815_v38 = vrot.slane %v814_v28, 1  ;;  %v793_v5 = vrot.slane %v792_v33, 1  ;;  %v821_v55 = vunpack.c.l.b16 %v817_v46  ;;  %v1079_v46 = vpack.c.bf16 %v6273_v57, %v6249_v42 }
 0x66f   :  { %v816_v41 = vadd.f32 %v815_v38, %v814_v28  ;;  %v794_v43 = vadd.f32 %v793_v5, %v792_v33  ;;  %v5375_v28 = vld [vmem:[#allocation11] sm:$0xff]  }
 0x671   :  { %v912_v47 = vsel %vm823_vm3, %v816_v41, %v807_v40  ;;  %v818_v49 = vpack.c.bf16 %v794_v43, %v794_v43  ;;  %v5376_v40 = vld [vmem:[#allocation11 + $0x8] sm:$0xff]   ;;  %v1078_v43 = vpack.c.bf16 %v6243_v39, %v6232_v32 }
 0x672   :  { %v918_v50 = vsel %vm216_vm1, %v912_v47, %v916_v48  ;;  %v5377_v47 = vld [vmem:[%s7212_s9] sm:$0xff]   ;;  %v5378_v48 = vld [vmem:[%s7212_s9 + $0x8] sm:$0xff]  }
 0x673   :  { %v919_v54 = vpack.c.bf16 %v918_v50, %v918_v50  ;;  %v822_v56 = vunpack.c.l.b16 %v818_v49  ;;  %5047 = vmatprep.subr.bf16.mxu1 %v5377_v47 }
 0x675   :  { %5028 = vmatmul.mubr.msk.bf16.vlgmr.msra.gmra.mrb[12].mxu1 %vm307_vm2, %v919_v54  ;;  %v824_v58 = vsel %vm823_vm3, %v822_v56, %v821_v55 }
 0x676   :  { %v825_v59 = vpack.c.b16 %v824_v58, %v824_v58  ;;  %5048 = vmatpush3.bf16.msra.mxu1 %v5377_v47 }
 0x677   :  { %5049 = vmatprep.subr.bf16.mxu1 %v5378_v48 }
 0x678   :  { %5016 = vmatmul.mubr.msk.bf16.vlgmr.msra.gmra.mrb[12].mxu0 %vm216_vm1, %v825_v59 }
 0x679   :  { %5035 = vmatprep.mubr.msk.bf16.mxu0 %vm5925_vm0, %v5924_v1  ;;  %5032 = vmatpush3.bf16.msra.mxu0 %v5373_v26 }
 0x67a   :  { %5033 = vmatprep.subr.bf16.mxu0 %v5924_v1  ;;  %5050 = vmatpush3.bf16.msra.mxu1 %v5378_v48 }
 0x67b   :  { %5063 = vmatprep.subr.bf16.mxu1 %v5924_v1 }
 0x67d   :  { %5034 = vmatpush3.bf16.msra.mxu0 %v5374_v27 }
 0x67e   :  { %5039 = vmatprep.subr.bf16.mxu0 %v5375_v28 }
 0x748   :  { %v981_v60 = vpop.f32.mrb[12].mxu1 }
 0x749   :  { %v988_v61 = vrot.slane %v981_v60, 6  ;;  %v5029_v62 = vpop.f32.mrb[13].mxu1 }
 0x74a   :  { %v984_v63 = vpop.f32.mrb[14].mxu1 }
 0x74b   :  { %v990_v0 = vadd.f32 %v988_v61, %v6126_v35  ;;  %v6293_v2 = vpop.f32.mrb[12].mxu0  ;;  %v5030_v3 = vpop.f32.mrb[15].mxu1 }
 0x74c   :  { %v5017_v6 = vpop.f32.mrb[13].mxu0 }
 0x74d   :  { %5485 = vtanh.f32 %v990_v0  ;;  %v881_v7 = vpop.f32.mrb[14].mxu0  ;;  %v4659_v11 = vmul.f32 -1.442695, %v990_v0 }
 0x74e   :  { %v5018_v9 = vpop.f32.mrb[15].mxu0 }
 0x74f   :  { %5487 = vpow2.f32 %v4659_v11 }
 0x757   :  { %v5486_v10 = vpop.eup %5485 }
 0x758   :  { %1003 = vrot.lane.b32.xlu0 %v5486_v10, %s5912_s27 }
 0x759   :  { %v5488_v13 = vpop.eup %5487 }
 0x75a   :  { %v994_v15 = vadd.f32 1.0, %v5488_v13 }
 0x75c   :  { %5489 = vrcp.f32 %v994_v15 }
 0x766   :  { %v5490_v17 = vpop.eup %5489 }
 0x767   :  { %v1001_v21 = vmul.f32 %v5490_v17, %v999_v4 }
 0x7ca   :  { %v1004_v19 = vpop.permute.xlu0 %1003 }
 0x7cb   :  { %v1006_v20 = vmul.f32 %v5490_v17, %v1004_v19 }
 0x7cd   :  { %1008 = vrot.lane.b32.xlu1 %v1006_v20, %s5928_s12 }
 0x83f   :  { %v1009_v22 = vpop.permute.xlu1 %1008 }
 0x840   :  { %v6298_v24 = vadd.f32 %v1009_v22, %v1001_v21 }
 0x842   :  { %5491 = vtanh.f32 %v6298_v24 }
 0x84c   :  { %v5492_v29 = vpop.eup %5491 }
 0x84d   :  { %1014 = vrot.lane.b32.xlu1 %v5492_v29, %s5912_s27 }
 0x8bf   :  { %v1015_v33 = vpop.permute.xlu1 %1014 }
 0x8c0   :  { %v6303_v38 = vmul.f32 %v5490_v17, %v1015_v33 }
 0x8c2   :  { %v1018_v53 = vpack.c.bf16 %v6303_v38, %v6303_v38 }
 0x8c4   :  { %v1020_v5 = vrot.slane %v1018_v53, 1 }
 0x8c6   :  { %1021 = vrot.lane.b32.xlu0 %v1020_v5, %s5928_s12 }
 0x938   :  { %v1022_v41 = vpop.permute.xlu0 %1021 }
 0x939   :  { %5036 = vmatmul.mubr.msk.bf16.vlgmr.msra.gmra.mrb[16].mxu0 %vm216_vm1, %v1022_v41 }
 0x93a   :  { %5040 = vmatpush3.bf16.msra.mxu0 %v5375_v28  ;;  %5043 = vmatprep.mubr.msk.bf16.mxu0 %vm216_vm1, %v1078_v43 }
 0x93b   :  { %5041 = vmatprep.subr.bf16.mxu0 %v5376_v40 }
 0x93e   :  { %5042 = vmatpush3.bf16.msra.mxu0 %v5376_v40 }
 0x93f   :  { %5055 = vmatprep.subr.bf16.mxu0 %v5924_v1 }
 0x941   :  { %5044 = vmatmul.mubr.msk.bf16.vlgmr.msra.gmra.mrb[20].mxu0 %vm216_vm1, %v1079_v46 }
 0x942   :  { %5059 = vmatprep.mubr.msk.bf16.mxu0 %vm5925_vm0, %v5924_v1 }
 0xa0c   :  { %v6325_v49 = vpop.f32.mrb[16].mxu0 }
 0xa0d   :  { %v1158_v50 = vrot.slane %v6325_v49, %v6098_v8  ;;  %v5037_v54 = vpop.f32.mrb[17].mxu0 }
 0xa0e   :  { %v1075_v55 = vpop.f32.mrb[18].mxu0 }
 0xa0f   :  { %v1159_v56 = vcombine.high %v1158_v50, %v1158_v50  ;;  %v5038_v58 = vpop.f32.mrb[19].mxu0  ;;  %v1166_v60 = vrot.slane %v1158_v50, %v6098_v8 }
 0xa11   :  { %v1173_v59 = vrot.slane %v1159_v56, %v6098_v8  ;;  %v1177_v6 = vrot.slane %v1166_v60, %v6188_v25 }
 0xa13   :  { %v1181_v63 = vrot.slane %v1173_v59, %v6188_v25 }
 0xa14   :  { %v5045_v61 = vpop.f32.mrb[20].mxu0 }
 0xa15   :  { %v1149_v62 = vadd.f32 %v5045_v61, %v6163_v12  ;;  %v1132_v0 = vpop.f32.mrb[21].mxu0 }
 0xa16   :  { %v1147_v3 = vadd.f32 %v1132_v0, %v6166_v14  ;;  %v5046_v7 = vpop.f32.mrb[22].mxu0 }
 0xa17   :  { %v1186_v9 = vadd.f32 %v1181_v63, %v1149_v62  ;;  %v1150_v10 = vadd.f32 %v5046_v7, %v6169_v16  ;;  %v1135_v11 = vpop.f32.mrb[23].mxu0 }
 0xa18   :  { %v1184_v13 = vadd.f32 %v1177_v6, %v1147_v3  ;;  %v1148_v15 = vadd.f32 %v1135_v11, %v6172_v18 }
 0xa19   :  { %5493 = vtanh.f32 %v1186_v9  ;;  %v1187_v17 = vadd.f32 %v1181_v63, %v1150_v10 }
 0xa1a   :  { %5495 = vtanh.f32 %v1184_v13  ;;  %v1185_v19 = vadd.f32 %v1177_v6, %v1148_v15  ;;  %v1450_v13 = vrot.slane %v6303_v38, 2  ;;  %v5379_v15 = vld [vmem:[%s7208_s5] sm:$0xff]   ;;  %v5381_v38 = vld [vmem:[%s7208_s5 + $0x10] sm:$0xff]  }
 0xa1b   :  { %5497 = vtanh.f32 %v1187_v17  ;;  %v5380_v17 = vld [vmem:[%s7208_s5 + $0x8] sm:$0xff]  }
 0xa1c   :  { %5499 = vtanh.f32 %v1185_v19  ;;  %v5382_v19 = vld [vmem:[#allocation13] sm:$0xff]  }
 0xa1d   :  { %5056 = vmatpush3.bf16.msra.mxu0 %v5382_v19 }
 0xa1e   :  { %5057 = vmatprep.subr.bf16.mxu0 %v5924_v1 }
 0xa23   :  { %v5494_v20 = vpop.eup %5493 }
 0xa24   :  { %v5496_v4 = vpop.eup %5495 }
 0xa25   :  { %v5498_v21 = vpop.eup %5497 }
 0xa26   :  { %v5500_v22 = vpop.eup %5499  ;;  %v1193_v26 = vpack.c.bf16 %v5498_v21, %v5494_v20  ;;  %v5383_v20 = vld [vmem:[%s7208_s5 + $0x18] sm:$0xff]  }
 0xa27   :  { %v1192_v27 = vpack.c.bf16 %v5500_v22, %v5496_v4  ;;  %v5384_v4 = vld [vmem:[#allocation13 + $0x8] sm:$0xff]  }
 0xa28   :  { %5058 = vmatpush3.bf16.msra.mxu0 %v5384_v4 }
 0xa29   :  { %5051 = vmatprep.mubr.msk.bf16.mxu1 %vm216_vm1, %v1192_v27  ;;  %5075 = vmatprep.subr.bf16.mxu0 %v5924_v1 }
 0xa2a   :  { %5052 = vmatmul.mubr.msk.bf16.vlgmr.msra.gmra.mrb[16].mxu1 %vm216_vm1, %v1193_v26 }
 0xa2b   :  { %5071 = vmatprep.mubr.msk.bf16.mxu1 %vm5925_vm0, %v5924_v1  ;;  %5064 = vmatpush3.bf16.msra.mxu1 %v5379_v15 }
 0xa2c   :  { %5065 = vmatprep.subr.bf16.mxu1 %v5924_v1 }
 0xa2f   :  { %5066 = vmatpush3.bf16.msra.mxu1 %v5380_v17 }
 0xa30   :  { %5067 = vmatprep.subr.bf16.mxu1 %v5924_v1 }
 0xa33   :  { %5068 = vmatpush3.bf16.msra.mxu1 %v5381_v38 }
 0xa34   :  { %5069 = vmatprep.subr.bf16.mxu1 %v5924_v1 }
 0xa37   :  { %5070 = vmatpush3.bf16.msra.mxu1 %v5383_v20 }
 0xafd   :  { %v5053_v28 = vpop.f32.mrb[16].mxu1 }
 0xafe   :  { %v1246_v29 = vpop.f32.mrb[17].mxu1  ;;  %v1267_v43 = vsel %vm216_vm1, %v5053_v28, -inf }
 0xaff   :  { %v5054_v33 = vpop.f32.mrb[18].mxu1  ;;  %v1261_v53 = vsel %vm216_vm1, %v1246_v29, -inf }
 0xb00   :  { %1262 = vmax.xlane.f32.xlu1 %v1261_v53  ;;  %v1249_v5 = vpop.f32.mrb[19].mxu1  ;;  %v1270_v41 = vsel %vm216_vm1, %v5054_v33, -inf }
 0xb01   :  { %v1264_v40 = vsel %vm216_vm1, %v1249_v5, -inf }
 0xb02   :  { %1265 = vmax.xlane.f32.xlu0 %v1264_v40 }
 0xb04   :  { %1271 = vmax.xlane.f32.xlu1 %v1270_v41 }
 0xb06   :  { %1268 = vmax.xlane.f32.xlu0 %v1267_v43 }
 0xb8d   :  { %v1263_v46 = vpop.xlane.xlu1 %1262 }
 0xb8e   :  { %v1273_v47 = vsub.f32 %v1246_v29, %v1263_v46 }
 0xb8f   :  { %v1266_v48 = vpop.xlane.xlu0 %1265 }
 0xb90   :  { %v1277_v50 = vmul.f32 1.442695, %v1273_v47  ;;  %v1274_v54 = vsub.f32 %v1249_v5, %v1266_v48 }
 0xb91   :  { %v1272_v55 = vpop.xlane.xlu1 %1271 }
 0xb92   :  { %5501 = vpow2.f32 %v1277_v50  ;;  %v1279_v56 = vmul.f32 1.442695, %v1274_v54  ;;  %v1276_v58 = vsub.f32 %v5054_v33, %v1272_v55 }
 0xb93   :  { %v1269_v59 = vpop.xlane.xlu0 %1268 }
 0xb94   :  { %5503 = vpow2.f32 %v1279_v56  ;;  %v1283_v60 = vmul.f32 1.442695, %v1276_v58  ;;  %v1275_v61 = vsub.f32 %v5053_v28, %v1269_v59 }
 0xb96   :  { %5505 = vpow2.f32 %v1283_v60  ;;  %v1281_v62 = vmul.f32 1.442695, %v1275_v61 }
 0xb98   :  { %5507 = vpow2.f32 %v1281_v62 }
 0xb9c   :  { %v5502_v63 = vpop.eup %5501 }
 0xb9d   :  { %v1285_v0 = vsel %vm216_vm1, %v5502_v63, 0.0 }
 0xb9e   :  { %v5504_v3 = vpop.eup %5503  ;;  %1286 = vadd.xlane.f32.xlu0 %v1285_v0 }
 0xb9f   :  { %v1288_v6 = vsel %vm216_vm1, %v5504_v3, 0.0 }
 0xba0   :  { %v5506_v7 = vpop.eup %5505  ;;  %1289 = vadd.xlane.f32.xlu1 %v1288_v6 }
 0xba1   :  { %v1294_v10 = vsel %vm216_vm1, %v5506_v7, 0.0 }
 0xba2   :  { %v5508_v9 = vpop.eup %5507 }
 0xba3   :  { %v1291_v11 = vsel %vm216_vm1, %v5508_v9, 0.0 }
 0xba4   :  { %1295 = vadd.xlane.f32.xlu1 %v1294_v10  ;;  %1292 = vadd.xlane.f32.xlu0 %v1291_v11 }
 0xbba   :  { %1451 = vrot.lane.b32.xlu0 %v1450_v13, %s5912_s27 }
 0xc2b   :  { %v1287_v21 = vpop.xlane.xlu0 %1286 }
 0xc2c   :  { %5509 = vrcp.f32 %v1287_v21 }
 0xc2d   :  { %v1290_v22 = vpop.xlane.xlu1 %1289 }
 0xc2e   :  { %5511 = vrcp.f32 %v1290_v22 }
 0xc31   :  { %v1296_v26 = vpop.xlane.xlu1 %1295  ;;  %v1293_v27 = vpop.xlane.xlu0 %1292 }
 0xc32   :  { %5513 = vrcp.f32 %v1296_v26 }
 0xc33   :  { %5515 = vrcp.f32 %v1293_v27 }
 0xc36   :  { %v5510_v28 = vpop.eup %5509 }
 0xc37   :  { %v6368_v29 = vmul.f32 %v5510_v28, %v5502_v63 }
 0xc38   :  { %v5512_v33 = vpop.eup %5511 }
 0xc39   :  { %v1309_v53 = vmul.f32 %v6368_v29, %v6228_v30  ;;  %v1331_v5 = vmul.f32 %v6368_v29, %v6230_v31  ;;  %v6374_v40 = vmul.f32 %v5512_v33, %v5504_v3 }
 0xc3b   :  { %v1310_v41 = vmul.f32 %v6374_v40, %v6237_v34  ;;  %v1332_v43 = vmul.f32 %v6374_v40, %v6239_v36  ;;  %v1313_v47 = vsel %vm216_vm1, %v1309_v53, 0.0  ;;  %v1335_v55 = vsel %vm216_vm1, %v1331_v5, 0.0 }
 0xc3c   :  { %v5514_v46 = vpop.eup %5513 }
 0xc3d   :  { %v5516_v48 = vpop.eup %5515  ;;  %v1314_v50 = vsel %vm216_vm1, %v1310_v41, 0.0  ;;  %v6382_v54 = vmul.f32 %v5514_v46, %v5506_v7  ;;  %v1336_v56 = vsel %vm216_vm1, %v1332_v43, 0.0 }
 0xc3e   :  { %v1315_v58 = vadd.f32 %v1314_v50, %v1313_v47  ;;  %v6386_v59 = vmul.f32 %v5516_v48, %v5508_v9  ;;  %v1337_v60 = vadd.f32 %v1336_v56, %v1335_v55 }
 0xc3f   :  { %v1312_v61 = vmul.f32 %v6382_v54, %v6267_v51  ;;  %v1334_v62 = vmul.f32 %v6382_v54, %v6269_v52 }
 0xc40   :  { %v1316_v63 = vrot.slane %v1315_v58, 4  ;;  %v1311_v0 = vmul.f32 %v6386_v59, %v6256_v44  ;;  %v1333_v3 = vmul.f32 %v6386_v59, %v6258_v45  ;;  %v1338_v6 = vrot.slane %v1337_v60, 4 }
 0xc41   :  { %v1323_v7 = vsel %vm216_vm1, %v1312_v61, 0.0  ;;  %v1345_v9 = vsel %vm216_vm1, %v1334_v62, 0.0  ;;  %v1452_v62 = vpop.permute.xlu0 %1451 }
 0xc42   :  { %v1317_v10 = vadd.f32 %v1316_v63, %v1315_v58  ;;  %v1322_v11 = vsel %vm216_vm1, %v1311_v0, 0.0  ;;  %v1339_v13 = vadd.f32 %v1338_v6, %v1337_v60  ;;  %v1344_v15 = vsel %vm216_vm1, %v1333_v3, 0.0 }
 0xc43   :  { %v1324_v17 = vadd.f32 %v1323_v7, %v1322_v11  ;;  %v1346_v38 = vadd.f32 %v1345_v9, %v1344_v15 }
 0xc44   :  { %v1340_v19 = vrot.slane %v1339_v13, 2  ;;  %v1318_v20 = vrot.slane %v1317_v10, 2 }
 0xc45   :  { %v1325_v4 = vrot.slane %v1324_v17, 4  ;;  %v1347_v21 = vrot.slane %v1346_v38, 4 }
 0xc46   :  { %v1319_v22 = vadd.f32 %v1318_v20, %v1317_v10  ;;  %v1341_v27 = vadd.f32 %v1340_v19, %v1339_v13 }
 0xc47   :  { %v1326_v26 = vadd.f32 %v1325_v4, %v1324_v17  ;;  %v1348_v28 = vadd.f32 %v1347_v21, %v1346_v38 }
 0xc48   :  { %v1320_v33 = vrot.slane %v1319_v22, 1  ;;  %v1342_v41 = vrot.slane %v1341_v27, 1 }
 0xc49   :  { %v1349_v53 = vrot.slane %v1348_v28, 2  ;;  %v1327_v5 = vrot.slane %v1326_v26, 2 }
 0xc4a   :  { %v1321_v46 = vadd.f32 %v1320_v33, %v1319_v22  ;;  %v1343_v55 = vadd.f32 %v1342_v41, %v1341_v27 }
 0xc4b   :  { %v1350_v43 = vadd.f32 %v1349_v53, %v1348_v28  ;;  %v1328_v47 = vadd.f32 %v1327_v5, %v1326_v26 }
 0xc4c   :  { %v1353_v60 = vpack.c.bf16 %v1321_v46, %v1321_v46 }
 0xc4d   :  { %v1351_v48 = vrot.slane %v1350_v43, 1  ;;  %v1329_v50 = vrot.slane %v1328_v47, 1 }
 0xc4e   :  { %v1357_v6 = vunpack.c.l.b16 %v1353_v60 }
 0xc4f   :  { %v1352_v56 = vadd.f32 %v1351_v48, %v1350_v43  ;;  %v1330_v58 = vadd.f32 %v1329_v50, %v1328_v47  ;;  %v1535_v43 = vrot.slane %v6298_v24, 6  ;;  %v5385_v50 = vld [vmem:[#allocation10] sm:$0xff]  }
 0xc51   :  { %v1447_v61 = vsel %vm823_vm3, %v1352_v56, %v1343_v55  ;;  %v1354_v63 = vpack.c.bf16 %v1330_v58, %v1330_v58  ;;  %v5386_v55 = vld [vmem:[#allocation10 + $0x8] sm:$0xff]   ;;  %v5387_v56 = vld [vmem:[#allocation11] sm:$0xff]  }
 0xc52   :  { %v1454_v0 = vsel %vm216_vm1, %v1447_v61, %v1452_v62 }
 0xc53   :  { %v1455_v3 = vpack.c.bf16 %v1454_v0, %v1454_v0  ;;  %v1358_v7 = vunpack.c.l.b16 %v1354_v63  ;;  %v6425_v63 = vadd.f32 %v6374_v40, %v6243_v39  ;;  %v6429_v0 = vadd.f32 %v6368_v29, %v6232_v32 }
 0xc54   :  { %v6441_v39 = vadd.f32 %v6382_v54, %v6273_v57  ;;  %v5390_v57 = vld [vmem:[%s7212_s9 + $0x8] sm:$0xff]  }
 0xc55   :  { %5072 = vmatmul.mubr.msk.bf16.vlgmr.msra.gmra.mrb[20].mxu1 %vm307_vm2, %v1455_v3  ;;  %v1359_v9 = vsel %vm823_vm3, %v1358_v7, %v1357_v6  ;;  %v5388_v3 = vld [vmem:[#allocation11 + $0x8] sm:$0xff]   ;;  %v1614_v7 = vpack.c.bf16 %v6425_v63, %v6429_v0 }
 0xc56   :  { %v1360_v10 = vpack.c.b16 %v1359_v9, %v1359_v9  ;;  %v6437_v9 = vadd.f32 %v6386_v59, %v6249_v42  ;;  %v5389_v42 = vld [vmem:[%s7212_s9] sm:$0xff]  }
 0xc57   :  { %5091 = vmatprep.subr.bf16.mxu1 %v5389_v42 }
 0xc58   :  { %5060 = vmatmul.mubr.msk.bf16.vlgmr.msra.gmra.mrb[24].mxu0 %vm216_vm1, %v1360_v10  ;;  %v1615_v32 = vpack.c.bf16 %v6441_v39, %v6437_v9  ;;  %5092 = vmatpush3.bf16.msra.mxu1 %v5389_v42 }
 0xc59   :  { %5079 = vmatprep.mubr.msk.bf16.mxu0 %vm5925_vm0, %v5924_v1  ;;  %5076 = vmatpush3.bf16.msra.mxu0 %v5385_v50 }
 0xc5a   :  { %5077 = vmatprep.subr.bf16.mxu0 %v5924_v1  ;;  %5093 = vmatprep.subr.bf16.mxu1 %v5390_v57 }
 0xc5c   :  { %5094 = vmatpush3.bf16.msra.mxu1 %v5390_v57 }
 0xc5d   :  { %5078 = vmatpush3.bf16.msra.mxu0 %v5386_v55  ;;  %5107 = vmatprep.subr.bf16.mxu1 %v5924_v1 }
 0xc5e   :  { %5083 = vmatprep.subr.bf16.mxu0 %v5387_v56 }
 0xd28   :  { %v1517_v11 = vpop.f32.mrb[20].mxu1 }
 0xd29   :  { %v1524_v13 = vrot.slane %v1517_v11, 4  ;;  %v5073_v15 = vpop.f32.mrb[21].mxu1 }
 0xd2a   :  { %v1520_v17 = vpop.f32.mrb[22].mxu1 }
 0xd2b   :  { %v1526_v38 = vadd.f32 %v1524_v13, %v6126_v35  ;;  %v6408_v19 = vpop.f32.mrb[24].mxu0  ;;  %v5074_v20 = vpop.f32.mrb[23].mxu1 }
 0xd2c   :  { %v5061_v4 = vpop.f32.mrb[25].mxu0 }
 0xd2d   :  { %5517 = vtanh.f32 %v1526_v38  ;;  %v1416_v21 = vpop.f32.mrb[26].mxu0  ;;  %v4679_v27 = vmul.f32 -1.442695, %v1526_v38 }
 0xd2e   :  { %v5062_v22 = vpop.f32.mrb[27].mxu0 }
 0xd2f   :  { %5519 = vpow2.f32 %v4679_v27 }
 0xd37   :  { %v5518_v26 = vpop.eup %5517 }
 0xd38   :  { %1539 = vrot.lane.b32.xlu1 %v5518_v26, %s5912_s27 }
 0xd39   :  { %v5520_v28 = vpop.eup %5519 }
 0xd3a   :  { %v1530_v33 = vadd.f32 1.0, %v5520_v28 }
 0xd3c   :  { %5521 = vrcp.f32 %v1530_v33 }
 0xd46   :  { %v5522_v53 = vpop.eup %5521 }
 0xd47   :  { %v1537_v46 = vmul.f32 %v5522_v53, %v1535_v43 }
 0xdaa   :  { %v1540_v5 = vpop.permute.xlu1 %1539 }
 0xdab   :  { %v1542_v41 = vmul.f32 %v5522_v53, %v1540_v5 }
 0xdad   :  { %1544 = vrot.lane.b32.xlu1 %v1542_v41, %s5928_s12 }
 0xe1f   :  { %v1545_v47 = vpop.permute.xlu1 %1544 }
 0xe20   :  { %v6413_v48 = vadd.f32 %v1545_v47, %v1537_v46 }
 0xe22   :  { %5523 = vtanh.f32 %v6413_v48 }
 0xe2c   :  { %v5524_v58 = vpop.eup %5523 }
 0xe2d   :  { %1550 = vrot.lane.b32.xlu0 %v5524_v58, %s5912_s27 }
 0xe9f   :  { %v1551_v60 = vpop.permute.xlu0 %1550 }
 0xea0   :  { %v6418_v61 = vmul.f32 %v5522_v53, %v1551_v60 }
 0xea2   :  { %v1554_v24 = vpack.c.bf16 %v6418_v61, %v6418_v61 }
 0xea4   :  { %v1556_v62 = vrot.slane %v1554_v24, 2 }
 0xea6   :  { %1557 = vrot.lane.b32.xlu1 %v1556_v62, %s5928_s12 }
 0xf18   :  { %v1558_v6 = vpop.permute.xlu1 %1557 }
 0xf19   :  { %5080 = vmatmul.mubr.msk.bf16.vlgmr.msra.gmra.mrb[28].mxu0 %vm216_vm1, %v1558_v6 }
 0xf1a   :  { %5084 = vmatpush3.bf16.msra.mxu0 %v5387_v56  ;;  %5087 = vmatprep.mubr.msk.bf16.mxu0 %vm216_vm1, %v1614_v7 }
 0xf1b   :  { %5085 = vmatprep.subr.bf16.mxu0 %v5388_v3 }
 0xf1e   :  { %5086 = vmatpush3.bf16.msra.mxu0 %v5388_v3 }
 0xf1f   :  { %5099 = vmatprep.subr.bf16.mxu0 %v5924_v1 }
 0xf21   :  { %5088 = vmatmul.mubr.msk.bf16.vlgmr.msra.gmra.mrb[32].mxu0 %vm216_vm1, %v1615_v32 }
 0xf22   :  { %5103 = vmatprep.mubr.msk.bf16.mxu0 %vm5925_vm0, %v5924_v1 }
 0xfec   :  { %v6456_v29 = vpop.f32.mrb[28].mxu0 }
 0xfed   :  { %v1694_v40 = vrot.slane %v6456_v29, %v6098_v8  ;;  %v5081_v54 = vpop.f32.mrb[29].mxu0 }
 0xfee   :  { %v1611_v59 = vpop.f32.mrb[30].mxu0 }
 0xfef   :  { %v1695_v10 = vcombine.high %v1694_v40, %v1694_v40  ;;  %v5082_v11 = vpop.f32.mrb[31].mxu0  ;;  %v1702_v15 = vrot.slane %v1694_v40, %v6098_v8 }
 0xff1   :  { %v1709_v13 = vrot.slane %v1695_v10, %v6098_v8  ;;  %v1713_v22 = vrot.slane %v1702_v15, %v6188_v25 }
 0xff3   :  { %v1717_v20 = vrot.slane %v1709_v13, %v6188_v25 }
 0xff4   :  { %v5089_v17 = vpop.f32.mrb[32].mxu0 }
 0xff5   :  { %v1685_v38 = vadd.f32 %v5089_v17, %v6163_v12  ;;  %v1668_v4 = vpop.f32.mrb[33].mxu0 }
 0xff6   :  { %v1683_v21 = vadd.f32 %v1668_v4, %v6166_v14  ;;  %v5090_v26 = vpop.f32.mrb[34].mxu0 }
 0xff7   :  { %v1722_v27 = vadd.f32 %v1717_v20, %v1685_v38  ;;  %v1686_v28 = vadd.f32 %v5090_v26, %v6169_v16  ;;  %v1671_v33 = vpop.f32.mrb[35].mxu0 }
 0xff8   :  { %v1720_v53 = vadd.f32 %v1713_v22, %v1683_v21  ;;  %v1684_v5 = vadd.f32 %v1671_v33, %v6172_v18 }
 0xff9   :  { %5525 = vtanh.f32 %v1722_v27  ;;  %v1723_v41 = vadd.f32 %v1717_v20, %v1686_v28 }
 0xffa   :  { %5527 = vtanh.f32 %v1720_v53  ;;  %v1721_v43 = vadd.f32 %v1713_v22, %v1684_v5 }
 0xffb   :  { %5529 = vtanh.f32 %v1723_v41  ;;  %v1986_v41 = vrot.slane %v6418_v61, 4  ;;  %v5393_v61 = vld [vmem:[%s7208_s5 + $0x10] sm:$0xff]  }
 0xffc   :  { %5531 = vtanh.f32 %v1721_v43  ;;  %v5391_v43 = vld [vmem:[%s7208_s5] sm:$0xff]  }
0x1003   :  { %v5526_v46 = vpop.eup %5525 }
0x1004   :  { %v5528_v47 = vpop.eup %5527 }
0x1005   :  { %v5530_v50 = vpop.eup %5529 }
0x1006   :  { %v5532_v55 = vpop.eup %5531  ;;  %v1729_v56 = vpack.c.bf16 %v5530_v50, %v5526_v46  ;;  %v5392_v46 = vld [vmem:[%s7208_s5 + $0x8] sm:$0xff]   ;;  %v5395_v50 = vld [vmem:[%s7208_s5 + $0x18] sm:$0xff]  }
0x1007   :  { %v1728_v58 = vpack.c.bf16 %v5532_v55, %v5528_v47  ;;  %v5394_v47 = vld [vmem:[#allocation13] sm:$0xff]   ;;  %v5396_v55 = vld [vmem:[#allocation13 + $0x8] sm:$0xff]  }
0x1008   :  { %5100 = vmatpush3.bf16.msra.mxu0 %v5394_v47 }
0x1009   :  { %5095 = vmatprep.mubr.msk.bf16.mxu1 %vm216_vm1, %v1728_v58  ;;  %5101 = vmatprep.subr.bf16.mxu0 %v5924_v1 }
0x100a   :  { %5096 = vmatmul.mubr.msk.bf16.vlgmr.msra.gmra.mrb[24].mxu1 %vm216_vm1, %v1729_v56 }
0x100b   :  { %5115 = vmatprep.mubr.msk.bf16.mxu1 %vm5925_vm0, %v5924_v1  ;;  %5108 = vmatpush3.bf16.msra.mxu1 %v5391_v43 }
0x100c   :  { %5109 = vmatprep.subr.bf16.mxu1 %v5924_v1  ;;  %5102 = vmatpush3.bf16.msra.mxu0 %v5396_v55 }
0x100d   :  { %5119 = vmatprep.subr.bf16.mxu0 %v5924_v1 }
0x100f   :  { %5110 = vmatpush3.bf16.msra.mxu1 %v5392_v46 }
0x1010   :  { %5111 = vmatprep.subr.bf16.mxu1 %v5924_v1 }
0x1013   :  { %5112 = vmatpush3.bf16.msra.mxu1 %v5393_v61 }
0x1014   :  { %5113 = vmatprep.subr.bf16.mxu1 %v5924_v1 }
0x1017   :  { %5114 = vmatpush3.bf16.msra.mxu1 %v5395_v50 }
0x10dd   :  { %v5097_v60 = vpop.f32.mrb[24].mxu1 }
0x10de   :  { %v1782_v24 = vpop.f32.mrb[25].mxu1  ;;  %v1803_v32 = vsel %vm216_vm1, %v5097_v60, -inf }
0x10df   :  { %v5098_v62 = vpop.f32.mrb[26].mxu1  ;;  %v1797_v3 = vsel %vm216_vm1, %v1782_v24, -inf }
0x10e0   :  { %1798 = vmax.xlane.f32.xlu0 %v1797_v3  ;;  %v1785_v6 = vpop.f32.mrb[27].mxu1  ;;  %v1806_v42 = vsel %vm216_vm1, %v5098_v62, -inf }
0x10e1   :  { %v1800_v7 = vsel %vm216_vm1, %v1785_v6, -inf }
0x10e2   :  { %1801 = vmax.xlane.f32.xlu1 %v1800_v7 }
0x10e4   :  { %1804 = vmax.xlane.f32.xlu0 %v1803_v32 }
0x10e8   :  { %1807 = vmax.xlane.f32.xlu0 %v1806_v42 }
0x116d   :  { %v1799_v57 = vpop.xlane.xlu0 %1798 }
0x116e   :  { %v1809_v40 = vsub.f32 %v1782_v24, %v1799_v57 }
0x116f   :  { %v1802_v54 = vpop.xlane.xlu1 %1801 }
0x1170   :  { %v1813_v59 = vmul.f32 1.442695, %v1809_v40  ;;  %v1810_v10 = vsub.f32 %v1785_v6, %v1802_v54 }
0x1171   :  { %v1805_v11 = vpop.xlane.xlu0 %1804 }
0x1172   :  { %5533 = vpow2.f32 %v1813_v59  ;;  %v1815_v13 = vmul.f32 1.442695, %v1810_v10  ;;  %v1811_v15 = vsub.f32 %v5097_v60, %v1805_v11 }
0x1174   :  { %5535 = vpow2.f32 %v1815_v13  ;;  %v1817_v17 = vmul.f32 1.442695, %v1811_v15 }
0x1175   :  { %v1808_v38 = vpop.xlane.xlu0 %1807 }
0x1176   :  { %5537 = vpow2.f32 %v1817_v17  ;;  %v1812_v20 = vsub.f32 %v5098_v62, %v1808_v38 }
0x1178   :  { %v1819_v4 = vmul.f32 1.442695, %v1812_v20 }
0x117a   :  { %5539 = vpow2.f32 %v1819_v4 }
0x117c   :  { %v5534_v21 = vpop.eup %5533 }
0x117d   :  { %v1821_v22 = vsel %vm216_vm1, %v5534_v21, 0.0 }
0x117e   :  { %v5536_v26 = vpop.eup %5535  ;;  %1822 = vadd.xlane.f32.xlu1 %v1821_v22 }
0x117f   :  { %v1824_v27 = vsel %vm216_vm1, %v5536_v26, 0.0 }
0x1180   :  { %v5538_v28 = vpop.eup %5537  ;;  %1825 = vadd.xlane.f32.xlu0 %v1824_v27 }
0x1181   :  { %v1827_v33 = vsel %vm216_vm1, %v5538_v28, 0.0 }
0x1182   :  { %1828 = vadd.xlane.f32.xlu1 %v1827_v33 }
0x1184   :  { %v5540_v53 = vpop.eup %5539 }
0x1185   :  { %v1830_v5 = vsel %vm216_vm1, %v5540_v53, 0.0 }
0x1186   :  { %1831 = vadd.xlane.f32.xlu0 %v1830_v5 }
0x1193   :  { %1987 = vrot.lane.b32.xlu1 %v1986_v41, %s5912_s27 }
0x120b   :  { %v1823_v56 = vpop.xlane.xlu1 %1822 }
0x120c   :  { %5541 = vrcp.f32 %v1823_v56 }
0x120d   :  { %v1826_v58 = vpop.xlane.xlu0 %1825 }
0x120e   :  { %5543 = vrcp.f32 %v1826_v58 }
0x120f   :  { %v1829_v60 = vpop.xlane.xlu1 %1828 }
0x1210   :  { %5545 = vrcp.f32 %v1829_v60 }
0x1213   :  { %v1832_v24 = vpop.xlane.xlu0 %1831 }
0x1214   :  { %5547 = vrcp.f32 %v1832_v24 }
0x1216   :  { %v5542_v62 = vpop.eup %5541 }
0x1217   :  { %v6499_v3 = vmul.f32 %v5542_v62, %v5534_v21 }
0x1218   :  { %v5544_v6 = vpop.eup %5543 }
0x1219   :  { %v1845_v7 = vmul.f32 %v6499_v3, %v6228_v30  ;;  %v1867_v32 = vmul.f32 %v6499_v3, %v6230_v31  ;;  %v6505_v42 = vmul.f32 %v5544_v6, %v5536_v26 }
0x121a   :  { %v5546_v57 = vpop.eup %5545 }
0x121b   :  { %v1846_v40 = vmul.f32 %v6505_v42, %v6237_v34  ;;  %v1868_v54 = vmul.f32 %v6505_v42, %v6239_v36  ;;  %v6511_v59 = vmul.f32 %v5546_v57, %v5538_v28  ;;  %v1849_v10 = vsel %vm216_vm1, %v1845_v7, 0.0 }
0x121c   :  { %v1871_v30 = vsel %vm216_vm1, %v1867_v32, 0.0 }
0x121d   :  { %v1850_v11 = vsel %vm216_vm1, %v1846_v40, 0.0  ;;  %v1872_v13 = vsel %vm216_vm1, %v1868_v54, 0.0  ;;  %v1847_v38 = vmul.f32 %v6511_v59, %v6256_v44  ;;  %v1869_v34 = vmul.f32 %v6511_v59, %v6258_v45 }
0x121e   :  { %v5548_v31 = vpop.eup %5547  ;;  %v1851_v15 = vadd.f32 %v1850_v11, %v1849_v10  ;;  %v1873_v17 = vadd.f32 %v1872_v13, %v1871_v30  ;;  %v1988_v30 = vpop.permute.xlu1 %1987 }
0x121f   :  { %v6521_v36 = vmul.f32 %v5548_v31, %v5540_v53  ;;  %v1858_v28 = vsel %vm216_vm1, %v1847_v38, 0.0  ;;  %v1880_v44 = vsel %vm216_vm1, %v1869_v34, 0.0 }
0x1220   :  { %v1852_v20 = vrot.slane %v1851_v15, 4  ;;  %v1874_v4 = vrot.slane %v1873_v17, 4 }
0x1221   :  { %v1848_v21 = vmul.f32 %v6521_v36, %v6267_v51  ;;  %v1870_v22 = vmul.f32 %v6521_v36, %v6269_v52 }
0x1222   :  { %v1853_v26 = vadd.f32 %v1852_v20, %v1851_v15  ;;  %v1875_v27 = vadd.f32 %v1874_v4, %v1873_v17 }
0x1223   :  { %v1859_v33 = vsel %vm216_vm1, %v1848_v21, 0.0  ;;  %v1881_v45 = vsel %vm216_vm1, %v1870_v22, 0.0 }
0x1224   :  { %v1860_v53 = vadd.f32 %v1859_v33, %v1858_v28  ;;  %v1876_v5 = vrot.slane %v1875_v27, 2  ;;  %v1882_v41 = vadd.f32 %v1881_v45, %v1880_v44  ;;  %v1854_v43 = vrot.slane %v1853_v26, 2 }
0x1226   :  { %v1861_v46 = vrot.slane %v1860_v53, 4  ;;  %v1883_v61 = vrot.slane %v1882_v41, 4  ;;  %v1855_v51 = vadd.f32 %v1854_v43, %v1853_v26  ;;  %v1877_v50 = vadd.f32 %v1876_v5, %v1875_v27 }
0x1228   :  { %v1862_v47 = vadd.f32 %v1861_v46, %v1860_v53  ;;  %v1884_v52 = vadd.f32 %v1883_v61, %v1882_v41  ;;  %v1856_v55 = vrot.slane %v1855_v51, 1  ;;  %v1878_v60 = vrot.slane %v1877_v50, 1 }
0x122a   :  { %v1885_v56 = vrot.slane %v1884_v52, 2  ;;  %v1863_v58 = vrot.slane %v1862_v47, 2  ;;  %v1857_v62 = vadd.f32 %v1856_v55, %v1855_v51  ;;  %v1879_v57 = vadd.f32 %v1878_v60, %v1877_v50  ;;  %v5399_v60 = vld [vmem:[#allocation11] sm:$0xff]  }
0x122c   :  { %v1886_v24 = vadd.f32 %v1885_v56, %v1884_v52  ;;  %v1864_v6 = vadd.f32 %v1863_v58, %v1862_v47  ;;  %v1889_v10 = vpack.c.bf16 %v1857_v62, %v1857_v62  ;;  %v5397_v56 = vld [vmem:[#allocation10] sm:$0xff]   ;;  %v5398_v58 = vld [vmem:[#allocation10 + $0x8] sm:$0xff]  }
0x122e   :  { %v1887_v7 = vrot.slane %v1886_v24, 1  ;;  %v1865_v32 = vrot.slane %v1864_v6, 1  ;;  %v1893_v17 = vunpack.c.l.b16 %v1889_v10 }
0x1230   :  { %v1888_v40 = vadd.f32 %v1887_v7, %v1886_v24  ;;  %v1866_v54 = vadd.f32 %v1865_v32, %v1864_v6  ;;  %v6556_v32 = vadd.f32 %v6505_v42, %v6425_v63  ;;  %v6572_v63 = vadd.f32 %v6511_v59, %v6437_v9  ;;  %v5402_v9 = vld [vmem:[%s7212_s9 + $0x8] sm:$0xff]  }
0x1232   :  { %v1983_v11 = vsel %vm823_vm3, %v1888_v40, %v1879_v57  ;;  %v1890_v13 = vpack.c.bf16 %v1866_v54, %v1866_v54  ;;  %v6560_v57 = vadd.f32 %v6499_v3, %v6429_v0  ;;  %v5400_v40 = vld [vmem:[#allocation11 + $0x8] sm:$0xff]  }
0x1233   :  { %v1990_v31 = vsel %vm216_vm1, %v1983_v11, %v1988_v30  ;;  %v6568_v11 = vadd.f32 %v6521_v36, %v6441_v39  ;;  %v5401_v39 = vld [vmem:[%s7212_s9] sm:$0xff]  }
0x1234   :  { %v1991_v15 = vpack.c.bf16 %v1990_v31, %v1990_v31  ;;  %v1894_v38 = vunpack.c.l.b16 %v1890_v13  ;;  %v2150_v10 = vpack.c.bf16 %v6556_v32, %v6560_v57  ;;  %5135 = vmatprep.subr.bf16.mxu1 %v5401_v39 }
0x1235   :  { %v2151_v0 = vpack.c.bf16 %v6568_v11, %v6572_v63 }
0x1236   :  { %5116 = vmatmul.mubr.msk.bf16.vlgmr.msra.gmra.mrb[28].mxu1 %vm307_vm2, %v1991_v15  ;;  %v1895_v34 = vsel %vm823_vm3, %v1894_v38, %v1893_v17 }
0x1237   :  { %v1896_v20 = vpack.c.b16 %v1895_v34, %v1895_v34  ;;  %5136 = vmatpush3.bf16.msra.mxu1 %v5401_v39 }
0x1238   :  { %5137 = vmatprep.subr.bf16.mxu1 %v5402_v9 }
0x1239   :  { %5104 = vmatmul.mubr.msk.bf16.vlgmr.msra.gmra.mrb[36].mxu0 %vm216_vm1, %v1896_v20 }
0x123a   :  { %5123 = vmatprep.mubr.msk.bf16.mxu0 %vm5925_vm0, %v5924_v1  ;;  %5120 = vmatpush3.bf16.msra.mxu0 %v5397_v56 }
0x123b   :  { %5121 = vmatprep.subr.bf16.mxu0 %v5924_v1  ;;  %5138 = vmatpush3.bf16.msra.mxu1 %v5402_v9 }
0x123c   :  { %5151 = vmatprep.subr.bf16.mxu1 %v5924_v1 }
0x123e   :  { %5122 = vmatpush3.bf16.msra.mxu0 %v5398_v58 }
0x123f   :  { %5127 = vmatprep.subr.bf16.mxu0 %v5399_v60 }
0x1309   :  { %v2053_v4 = vpop.f32.mrb[28].mxu1 }
0x130a   :  { %v2060_v21 = vrot.slane %v2053_v4, 2  ;;  %v5117_v22 = vpop.f32.mrb[29].mxu1 }
0x130b   :  { %v2056_v26 = vpop.f32.mrb[30].mxu1 }
0x130c   :  { %v2062_v27 = vadd.f32 %v2060_v21, %v6126_v35  ;;  %v6539_v28 = vpop.f32.mrb[36].mxu0  ;;  %v5118_v33 = vpop.f32.mrb[31].mxu1  ;;  %v2071_v35 = vrot.slane %v6413_v48, 6 }
0x130d   :  { %v5105_v44 = vpop.f32.mrb[37].mxu0 }
0x130e   :  { %5549 = vtanh.f32 %v2062_v27  ;;  %v1952_v45 = vpop.f32.mrb[38].mxu0  ;;  %v4699_v41 = vmul.f32 -1.442695, %v2062_v27 }
0x130f   :  { %v5106_v53 = vpop.f32.mrb[39].mxu0 }
0x1310   :  { %5551 = vpow2.f32 %v4699_v41 }
0x1318   :  { %v5550_v5 = vpop.eup %5549 }
0x1319   :  { %2075 = vrot.lane.b32.xlu0 %v5550_v5, %s5912_s27 }
0x131a   :  { %v5552_v43 = vpop.eup %5551 }
0x131b   :  { %v2066_v46 = vadd.f32 1.0, %v5552_v43 }
0x131d   :  { %5553 = vrcp.f32 %v2066_v46 }
0x1327   :  { %v5554_v61 = vpop.eup %5553 }
0x1328   :  { %v2073_v50 = vmul.f32 %v5554_v61, %v2071_v35 }
0x138b   :  { %v2076_v51 = vpop.permute.xlu0 %2075 }
0x138c   :  { %v2078_v47 = vmul.f32 %v5554_v61, %v2076_v51 }
0x138e   :  { %2080 = vrot.lane.b32.xlu1 %v2078_v47, %s5928_s12 }
0x1400   :  { %v2081_v52 = vpop.permute.xlu1 %2080 }
0x1401   :  { %v6544_v55 = vadd.f32 %v2081_v52, %v2073_v50 }
0x1403   :  { %5555 = vtanh.f32 %v6544_v55 }
0x140d   :  { %v5556_v24 = vpop.eup %5555 }
0x140e   :  { %2086 = vrot.lane.b32.xlu1 %v5556_v24, %s5912_s27 }
0x1480   :  { %v2087_v62 = vpop.permute.xlu1 %2086 }
0x1481   :  { %v6549_v6 = vmul.f32 %v5554_v61, %v2087_v62 }
0x1483   :  { %v2090_v48 = vpack.c.bf16 %v6549_v6, %v6549_v6 }
0x1485   :  { %v2092_v7 = vrot.slane %v2090_v48, 3 }
0x1487   :  { %2093 = vrot.lane.b32.xlu0 %v2092_v7, %s5928_s12 }
0x14f9   :  { %v2094_v54 = vpop.permute.xlu0 %2093 }
0x14fa   :  { %5124 = vmatmul.mubr.msk.bf16.vlgmr.msra.gmra.mrb[40].mxu0 %vm216_vm1, %v2094_v54 }
0x14fb   :  { %5128 = vmatpush3.bf16.msra.mxu0 %v5399_v60  ;;  %5131 = vmatprep.mubr.msk.bf16.mxu0 %vm216_vm1, %v2150_v10 }
0x14fc   :  { %5129 = vmatprep.subr.bf16.mxu0 %v5400_v40 }
0x14ff   :  { %5130 = vmatpush3.bf16.msra.mxu0 %v5400_v40 }
0x1500   :  { %5143 = vmatprep.subr.bf16.mxu0 %v5924_v1 }
0x1502   :  { %5132 = vmatmul.mubr.msk.bf16.vlgmr.msra.gmra.mrb[44].mxu0 %vm216_vm1, %v2151_v0 }
0x1503   :  { %5147 = vmatprep.mubr.msk.bf16.mxu0 %vm5925_vm0, %v5924_v1 }
0x15cd   :  { %v6587_v3 = vpop.f32.mrb[40].mxu0 }
0x15ce   :  { %v2230_v42 = vrot.slane %v6587_v3, %v6098_v8  ;;  %v5125_v59 = vpop.f32.mrb[41].mxu0 }
0x15cf   :  { %v2147_v36 = vpop.f32.mrb[42].mxu0 }
0x15d0   :  { %v2231_v30 = vcombine.high %v2230_v42, %v2230_v42  ;;  %v5126_v13 = vpop.f32.mrb[43].mxu0  ;;  %v2238_v15 = vrot.slane %v2230_v42, %v6098_v8 }
0x15d2   :  { %v2245_v31 = vrot.slane %v2231_v30, %v6098_v8  ;;  %v2249_v21 = vrot.slane %v2238_v15, %v6188_v25 }
0x15d4   :  { %v2253_v34 = vrot.slane %v2245_v31, %v6188_v25 }
0x15d5   :  { %v5133_v17 = vpop.f32.mrb[44].mxu0 }
0x15d6   :  { %v2221_v38 = vadd.f32 %v5133_v17, %v6163_v12  ;;  %v2204_v20 = vpop.f32.mrb[45].mxu0 }
0x15d7   :  { %v2219_v4 = vadd.f32 %v2204_v20, %v6166_v14  ;;  %v5134_v22 = vpop.f32.mrb[46].mxu0 }
0x15d8   :  { %v2258_v26 = vadd.f32 %v2253_v34, %v2221_v38  ;;  %v2222_v27 = vadd.f32 %v5134_v22, %v6169_v16  ;;  %v2207_v33 = vpop.f32.mrb[47].mxu0  ;;  %v5403_v22 = vld [vmem:[%s7208_s5] sm:$0xff]  }
0x15d9   :  { %v2256_v44 = vadd.f32 %v2249_v21, %v2219_v4  ;;  %v2220_v45 = vadd.f32 %v2207_v33, %v6172_v18  ;;  %v5407_v33 = vld [vmem:[%s7208_s5 + $0x18] sm:$0xff]  }
0x15da   :  { %5557 = vtanh.f32 %v2258_v26  ;;  %v2259_v53 = vadd.f32 %v2253_v34, %v2222_v27  ;;  %v5404_v26 = vld [vmem:[%s7208_s5 + $0x8] sm:$0xff]  }
0x15db   :  { %5559 = vtanh.f32 %v2256_v44  ;;  %v2257_v5 = vadd.f32 %v2249_v21, %v2220_v45  ;;  %v2522_v21 = vrot.slane %v6549_v6, 6  ;;  %v5405_v6 = vld [vmem:[%s7208_s5 + $0x10] sm:$0xff]   ;;  %v5406_v27 = vld [vmem:[#allocation13] sm:$0xff]  }
0x15dc   :  { %5561 = vtanh.f32 %v2259_v53  ;;  %5144 = vmatpush3.bf16.msra.mxu0 %v5406_v27  ;;  %v5408_v44 = vld [vmem:[#allocation13 + $0x8] sm:$0xff]  }
0x15dd   :  { %5563 = vtanh.f32 %v2257_v5  ;;  %5145 = vmatprep.subr.bf16.mxu0 %v5924_v1 }
0x15e0   :  { %5146 = vmatpush3.bf16.msra.mxu0 %v5408_v44 }
0x15e1   :  { %5163 = vmatprep.subr.bf16.mxu0 %v5924_v1 }
0x15e4   :  { %v5558_v41 = vpop.eup %5557 }
0x15e5   :  { %v5560_v43 = vpop.eup %5559 }
0x15e6   :  { %v5562_v46 = vpop.eup %5561 }
0x15e7   :  { %v5564_v61 = vpop.eup %5563  ;;  %v2265_v51 = vpack.c.bf16 %v5562_v46, %v5558_v41 }
0x15e8   :  { %v2264_v47 = vpack.c.bf16 %v5564_v61, %v5560_v43 }
0x15ea   :  { %5139 = vmatprep.mubr.msk.bf16.mxu1 %vm216_vm1, %v2264_v47 }
0x15eb   :  { %5140 = vmatmul.mubr.msk.bf16.vlgmr.msra.gmra.mrb[32].mxu1 %vm216_vm1, %v2265_v51  ;;  %v6635_v51 = vld [vmem:[%s7205_s2] sm:$0xff] }
0x15ec   :  { %5159 = vmatprep.mubr.msk.bf16.mxu1 %vm5925_vm0, %v5924_v1  ;;  %5152 = vmatpush3.bf16.msra.mxu1 %v5403_v22 }
0x15ed   :  { %5153 = vmatprep.subr.bf16.mxu1 %v5924_v1 }
0x15f0   :  { %5154 = vmatpush3.bf16.msra.mxu1 %v5404_v26 }
0x15f1   :  { %5155 = vmatprep.subr.bf16.mxu1 %v5924_v1 }
0x15f4   :  { %5156 = vmatpush3.bf16.msra.mxu1 %v5405_v6 }
0x15f5   :  { %5157 = vmatprep.subr.bf16.mxu1 %v5924_v1 }
0x15f8   :  { %5158 = vmatpush3.bf16.msra.mxu1 %v5407_v33 }
0x16be   :  { %v5141_v35 = vpop.f32.mrb[32].mxu1 }
0x16bf   :  { %v2318_v50 = vpop.f32.mrb[33].mxu1  ;;  %v2339_v62 = vsel %vm216_vm1, %v5141_v35, -inf }
0x16c0   :  { %v5142_v52 = vpop.f32.mrb[34].mxu1  ;;  %v2333_v56 = vsel %vm216_vm1, %v2318_v50, -inf }
0x16c1   :  { %2334 = vmax.xlane.f32.xlu1 %v2333_v56  ;;  %v2321_v58 = vpop.f32.mrb[35].mxu1  ;;  %v2342_v24 = vsel %vm216_vm1, %v5142_v52, -inf  ;;  %v6648_v56 = vld [vmem:[%s7205_s2 + $0x8] sm:$0xff] }
0x16c2   :  { %v2336_v60 = vsel %vm216_vm1, %v2321_v58, -inf }
0x16c3   :  { %2337 = vmax.xlane.f32.xlu0 %v2336_v60  ;;  %v6652_v60 = vld [vmem:[#allocation7 + $0x8] sm:$0xff] }
0x16c5   :  { %2343 = vmax.xlane.f32.xlu1 %v2342_v24 }
0x16c7   :  { %2340 = vmax.xlane.f32.xlu0 %v2339_v62 }
0x174e   :  { %v2335_v48 = vpop.xlane.xlu1 %2334 }
0x174f   :  { %v2345_v7 = vsub.f32 %v2318_v50, %v2335_v48 }
0x1750   :  { %v2338_v40 = vpop.xlane.xlu0 %2337 }
0x1751   :  { %v2349_v54 = vmul.f32 1.442695, %v2345_v7  ;;  %v2346_v10 = vsub.f32 %v2321_v58, %v2338_v40 }
0x1752   :  { %v2344_v0 = vpop.xlane.xlu1 %2343 }
0x1753   :  { %5565 = vpow2.f32 %v2349_v54  ;;  %v2351_v39 = vmul.f32 1.442695, %v2346_v10  ;;  %v2348_v9 = vsub.f32 %v5142_v52, %v2344_v0 }
0x1754   :  { %v2341_v42 = vpop.xlane.xlu0 %2340 }
0x1755   :  { %5567 = vpow2.f32 %v2351_v39  ;;  %v2355_v59 = vmul.f32 1.442695, %v2348_v9  ;;  %v2347_v36 = vsub.f32 %v5141_v35, %v2341_v42  ;;  %v6639_v35 = vld [vmem:[#allocation7] sm:$0xff] }
0x1757   :  { %5569 = vpow2.f32 %v2355_v59  ;;  %v2353_v30 = vmul.f32 1.442695, %v2347_v36  ;;  %v6667_v59 = vld [vmem:[%s7205_s2 + $0x18] sm:$0xff] }
0x1759   :  { %5571 = vpow2.f32 %v2353_v30  ;;  %v6671_v30 = vld [vmem:[#allocation7 + $0x18] sm:$0xff] }
0x175d   :  { %v5566_v13 = vpop.eup %5565 }
0x175e   :  { %v2357_v31 = vsel %vm216_vm1, %v5566_v13, 0.0 }
0x175f   :  { %v5568_v15 = vpop.eup %5567  ;;  %2358 = vadd.xlane.f32.xlu0 %v2357_v31 }
0x1760   :  { %v2360_v17 = vsel %vm216_vm1, %v5568_v15, 0.0 }
0x1761   :  { %v5570_v38 = vpop.eup %5569  ;;  %2361 = vadd.xlane.f32.xlu1 %v2360_v17 }
0x1762   :  { %v2366_v20 = vsel %vm216_vm1, %v5570_v38, 0.0 }
0x1763   :  { %v5572_v34 = vpop.eup %5571 }
0x1764   :  { %v2363_v4 = vsel %vm216_vm1, %v5572_v34, 0.0 }
0x1765   :  { %2367 = vadd.xlane.f32.xlu1 %v2366_v20  ;;  %2364 = vadd.xlane.f32.xlu0 %v2363_v4 }
0x177b   :  { %2523 = vrot.lane.b32.xlu0 %v2522_v21, %s5912_s27 }
0x17ec   :  { %v2359_v45 = vpop.xlane.xlu0 %2358 }
0x17ed   :  { %5573 = vrcp.f32 %v2359_v45 }
0x17ee   :  { %v2362_v53 = vpop.xlane.xlu1 %2361 }
0x17ef   :  { %5575 = vrcp.f32 %v2362_v53 }
0x17f2   :  { %v2368_v5 = vpop.xlane.xlu1 %2367  ;;  %v2365_v41 = vpop.xlane.xlu0 %2364 }
0x17f3   :  { %5577 = vrcp.f32 %v2368_v5 }
0x17f4   :  { %5579 = vrcp.f32 %v2365_v41 }
0x17f7   :  { %v5574_v43 = vpop.eup %5573 }
0x17f8   :  { %v6630_v46 = vmul.f32 %v5574_v43, %v5566_v13 }
0x17f9   :  { %v5576_v61 = vpop.eup %5575 }
0x17fa   :  { %v2381_v47 = vmul.f32 %v6635_v51, %v6630_v46  ;;  %v2403_v50 = vmul.f32 %v6639_v35, %v6630_v46  ;;  %v6643_v52 = vmul.f32 %v5576_v61, %v5568_v15  ;;  %v6678_v15 = vld [vmem:[%s7205_s2 + $0x10] sm:$0xff] }
0x17fc   :  { %v2382_v58 = vmul.f32 %v6648_v56, %v6643_v52  ;;  %v2404_v24 = vmul.f32 %v6652_v60, %v6643_v52  ;;  %v2385_v48 = vsel %vm216_vm1, %v2381_v47, 0.0  ;;  %v2407_v10 = vsel %vm216_vm1, %v2403_v50, 0.0 }
0x17fd   :  { %v5578_v62 = vpop.eup %5577 }
0x17fe   :  { %v5580_v7 = vpop.eup %5579  ;;  %v2386_v40 = vsel %vm216_vm1, %v2382_v58, 0.0  ;;  %v6658_v54 = vmul.f32 %v5578_v62, %v5570_v38  ;;  %v2408_v0 = vsel %vm216_vm1, %v2404_v24, 0.0  ;;  %v6682_v38 = vld [vmem:[#allocation7 + $0x10] sm:$0xff] }
0x17ff   :  { %v2387_v39 = vadd.f32 %v2386_v40, %v2385_v48  ;;  %v6662_v9 = vmul.f32 %v5580_v7, %v5572_v34  ;;  %v2409_v42 = vadd.f32 %v2408_v0, %v2407_v10 }
0x1800   :  { %v2384_v36 = vmul.f32 %v6667_v59, %v6658_v54  ;;  %v2406_v13 = vmul.f32 %v6671_v30, %v6658_v54 }
0x1801   :  { %v2388_v31 = vrot.slane %v2387_v39, 4  ;;  %v2383_v17 = vmul.f32 %v6678_v15, %v6662_v9  ;;  %v2405_v34 = vmul.f32 %v6682_v38, %v6662_v9  ;;  %v2410_v20 = vrot.slane %v2409_v42, 4 }
0x1802   :  { %v2395_v4 = vsel %vm216_vm1, %v2384_v36, 0.0  ;;  %v2417_v21 = vsel %vm216_vm1, %v2406_v13, 0.0 }
0x1803   :  { %v2389_v22 = vadd.f32 %v2388_v31, %v2387_v39  ;;  %v2394_v26 = vsel %vm216_vm1, %v2383_v17, 0.0  ;;  %v2411_v6 = vadd.f32 %v2410_v20, %v2409_v42  ;;  %v2416_v27 = vsel %vm216_vm1, %v2405_v34, 0.0  ;;  %v2524_v34 = vpop.permute.xlu0 %2523 }
0x1804   :  { %v2396_v33 = vadd.f32 %v2395_v4, %v2394_v26  ;;  %v2418_v44 = vadd.f32 %v2417_v21, %v2416_v27 }
0x1805   :  { %v2412_v45 = vrot.slane %v2411_v6, 2  ;;  %v2390_v53 = vrot.slane %v2389_v22, 2 }
0x1806   :  { %v2397_v5 = vrot.slane %v2396_v33, 4  ;;  %v2419_v41 = vrot.slane %v2418_v44, 4 }
0x1807   :  { %v2391_v43 = vadd.f32 %v2390_v53, %v2389_v22  ;;  %v2413_v47 = vadd.f32 %v2412_v45, %v2411_v6 }
0x1808   :  { %v2398_v61 = vadd.f32 %v2397_v5, %v2396_v33  ;;  %v2420_v50 = vadd.f32 %v2419_v41, %v2418_v44 }
0x1809   :  { %v2392_v58 = vrot.slane %v2391_v43, 1  ;;  %v2414_v48 = vrot.slane %v2413_v47, 1 }
0x180a   :  { %v2421_v24 = vrot.slane %v2420_v50, 2  ;;  %v2399_v62 = vrot.slane %v2398_v61, 2 }
0x180b   :  { %v2393_v40 = vadd.f32 %v2392_v58, %v2391_v43  ;;  %v2415_v42 = vadd.f32 %v2414_v48, %v2413_v47 }
0x180c   :  { %v2422_v7 = vadd.f32 %v2421_v24, %v2420_v50  ;;  %v2400_v10 = vadd.f32 %v2399_v62, %v2398_v61 }
0x180d   :  { %v2425_v31 = vpack.c.bf16 %v2393_v40, %v2393_v40 }
0x180e   :  { %v2423_v0 = vrot.slane %v2422_v7, 1  ;;  %v2401_v39 = vrot.slane %v2400_v10, 1 }
0x180f   :  { %v2429_v22 = vunpack.c.l.b16 %v2425_v31  ;;  %v5411_v31 = vld [vmem:[#allocation11] sm:$0xff]  }
0x1810   :  { %v2424_v36 = vadd.f32 %v2423_v0, %v2422_v7  ;;  %v2402_v13 = vadd.f32 %v2401_v39, %v2400_v10  ;;  %v2604_v10 = vrot.slane %v6544_v55, 6 }
0x1812   :  { %v2519_v17 = vsel %vm823_vm3, %v2424_v36, %v2415_v42  ;;  %v2426_v20 = vpack.c.bf16 %v2402_v13, %v2402_v13  ;;  %v5409_v36 = vld [vmem:[#allocation10] sm:$0xff]   ;;  %v5410_v13 = vld [vmem:[#allocation10 + $0x8] sm:$0xff]  }
0x1813   :  { %v2526_v4 = vsel %vm216_vm1, %v2519_v17, %v2524_v34 }
0x1814   :  { %v2527_v21 = vpack.c.bf16 %v2526_v4, %v2526_v4  ;;  %v2430_v26 = vunpack.c.l.b16 %v2426_v20  ;;  %v6715_v4 = vadd.f32 %v6643_v52, %v6556_v32  ;;  %v6731_v32 = vadd.f32 %v6658_v54, %v6568_v11  ;;  %v5414_v11 = vld [vmem:[%s7212_s9 + $0x8] sm:$0xff]  }
0x1816   :  { %5160 = vmatmul.mubr.msk.bf16.vlgmr.msra.gmra.mrb[36].mxu1 %vm307_vm2, %v2527_v21  ;;  %v2431_v6 = vsel %vm823_vm3, %v2430_v26, %v2429_v22  ;;  %v6719_v21 = vadd.f32 %v6630_v46, %v6560_v57  ;;  %v5412_v22 = vld [vmem:[#allocation11 + $0x8] sm:$0xff]  }
0x1817   :  { %v2432_v27 = vpack.c.b16 %v2431_v6, %v2431_v6 }
0x1818   :  { %v2682_v6 = vpack.c.bf16 %v6715_v4, %v6719_v21 }
0x1819   :  { %5148 = vmatmul.mubr.msk.bf16.vlgmr.msra.gmra.mrb[48].mxu0 %vm216_vm1, %v2432_v27  ;;  %v6727_v27 = vadd.f32 %v6662_v9, %v6572_v63  ;;  %v5413_v63 = vld [vmem:[%s7212_s9] sm:$0xff]  }
0x181a   :  { %5167 = vmatprep.mubr.msk.bf16.mxu0 %vm5925_vm0, %v5924_v1  ;;  %5164 = vmatpush3.bf16.msra.mxu0 %v5409_v36 }
0x181b   :  { %5165 = vmatprep.subr.bf16.mxu0 %v5924_v1  ;;  %v2683_v57 = vpack.c.bf16 %v6731_v32, %v6727_v27  ;;  %5179 = vmatprep.subr.bf16.mxu1 %v5413_v63 }
0x181c   :  { %5180 = vmatpush3.bf16.msra.mxu1 %v5413_v63 }
0x181d   :  { %5181 = vmatprep.subr.bf16.mxu1 %v5414_v11 }
0x181e   :  { %5166 = vmatpush3.bf16.msra.mxu0 %v5410_v13 }
0x181f   :  { %5171 = vmatprep.subr.bf16.mxu0 %v5411_v31 }
0x1820   :  { %5182 = vmatpush3.bf16.msra.mxu1 %v5414_v11 }
0x1821   :  { %5195 = vmatprep.subr.bf16.mxu1 %v5924_v1 }
0x18e9   :  { %v2589_v33 = vpop.f32.mrb[36].mxu1 }
0x18ea   :  { %v2595_v44 = vadd.f32 %v2589_v33, %v6128_v37  ;;  %v5161_v45 = vpop.f32.mrb[37].mxu1 }
0x18eb   :  { %v2592_v53 = vpop.f32.mrb[38].mxu1 }
0x18ec   :  { %5581 = vtanh.f32 %v2595_v44  ;;  %v6698_v5 = vpop.f32.mrb[48].mxu0  ;;  %v5162_v41 = vpop.f32.mrb[39].mxu1  ;;  %v4719_v58 = vmul.f32 -1.442695, %v2595_v44 }
0x18ed   :  { %v5149_v43 = vpop.f32.mrb[49].mxu0 }
0x18ee   :  { %v2488_v61 = vpop.f32.mrb[50].mxu0  ;;  %5583 = vpow2.f32 %v4719_v58 }
0x18ef   :  { %v5150_v47 = vpop.f32.mrb[51].mxu0 }
0x18f6   :  { %v5582_v50 = vpop.eup %5581 }
0x18f7   :  { %2608 = vrot.lane.b32.xlu1 %v5582_v50, %s5912_s27 }
0x18f8   :  { %v5584_v24 = vpop.eup %5583 }
0x18f9   :  { %v2599_v62 = vadd.f32 1.0, %v5584_v24 }
0x18fb   :  { %5585 = vrcp.f32 %v2599_v62 }
0x1905   :  { %v5586_v48 = vpop.eup %5585 }
0x1906   :  { %v2606_v0 = vmul.f32 %v5586_v48, %v2604_v10 }
0x1969   :  { %v2609_v7 = vpop.permute.xlu1 %2608 }
0x196a   :  { %v2611_v40 = vmul.f32 %v5586_v48, %v2609_v7 }
0x196c   :  { %2613 = vrot.lane.b32.xlu1 %v2611_v40, %s5928_s12 }
0x19de   :  { %v2614_v39 = vpop.permute.xlu1 %2613 }
0x19df   :  { %v6703_v42 = vadd.f32 %v2614_v39, %v2606_v0 }
0x19e1   :  { %5587 = vtanh.f32 %v6703_v42 }
0x19eb   :  { %v5588_v17 = vpop.eup %5587 }
0x19ec   :  { %2619 = vrot.lane.b32.xlu0 %v5588_v17, %s5912_s27 }
0x1a5e   :  { %v2620_v34 = vpop.permute.xlu0 %2619 }
0x1a5f   :  { %v6708_v20 = vmul.f32 %v5586_v48, %v2620_v34 }
0x1a61   :  { %v2623_v55 = vpack.c.bf16 %v6708_v20, %v6708_v20 }
0x1a63   :  { %2625 = vrot.lane.b32.xlu1 %v2623_v55, %s5928_s12 }
0x1ad5   :  { %v2626_v26 = vpop.permute.xlu1 %2625 }
0x1ad6   :  { %5168 = vmatmul.mubr.msk.bf16.vlgmr.msra.gmra.mrb[52].mxu0 %vm216_vm1, %v2626_v26 }
0x1ad7   :  { %5172 = vmatpush3.bf16.msra.mxu0 %v5411_v31  ;;  %5175 = vmatprep.mubr.msk.bf16.mxu0 %vm216_vm1, %v2682_v6 }
0x1ad8   :  { %5173 = vmatprep.subr.bf16.mxu0 %v5412_v22 }
0x1adb   :  { %5174 = vmatpush3.bf16.msra.mxu0 %v5412_v22 }
0x1adc   :  { %5187 = vmatprep.subr.bf16.mxu0 %v5924_v1 }
0x1ade   :  { %5176 = vmatmul.mubr.msk.bf16.vlgmr.msra.gmra.mrb[56].mxu0 %vm216_vm1, %v2683_v57 }
0x1adf   :  { %5191 = vmatprep.mubr.msk.bf16.mxu0 %vm5925_vm0, %v5924_v1 }
0x1ba9   :  { %v6746_v46 = vpop.f32.mrb[52].mxu0 }
0x1baa   :  { %v2762_v52 = vrot.slane %v6746_v46, %v6098_v8  ;;  %v5169_v54 = vpop.f32.mrb[53].mxu0 }
0x1bab   :  { %v2679_v9 = vpop.f32.mrb[54].mxu0 }
0x1bac   :  { %v2763_v33 = vcombine.high %v2762_v52, %v2762_v52  ;;  %v5170_v44 = vpop.f32.mrb[55].mxu0  ;;  %v2770_v53 = vrot.slane %v2762_v52, %v6098_v8 }
0x1bae   :  { %v2777_v45 = vrot.slane %v2763_v33, %v6098_v8  ;;  %v2781_v58 = vrot.slane %v2770_v53, %v6188_v25 }
0x1bb0   :  { %v2785_v61 = vrot.slane %v2777_v45, %v6188_v25 }
0x1bb1   :  { %v5177_v41 = vpop.f32.mrb[56].mxu0 }
0x1bb2   :  { %v2753_v43 = vadd.f32 %v5177_v41, %v6163_v12  ;;  %v2736_v47 = vpop.f32.mrb[57].mxu0 }
0x1bb3   :  { %v2751_v50 = vadd.f32 %v2736_v47, %v6166_v14  ;;  %v5178_v24 = vpop.f32.mrb[58].mxu0 }
0x1bb4   :  { %v2790_v62 = vadd.f32 %v2785_v61, %v2753_v43  ;;  %v2754_v48 = vadd.f32 %v5178_v24, %v6169_v16  ;;  %v2739_v7 = vpop.f32.mrb[59].mxu0 }
0x1bb5   :  { %v2788_v40 = vadd.f32 %v2781_v58, %v2751_v50  ;;  %v2752_v10 = vadd.f32 %v2739_v7, %v6172_v18 }
0x1bb6   :  { %5589 = vtanh.f32 %v2790_v62  ;;  %v2791_v0 = vadd.f32 %v2785_v61, %v2754_v48 }
0x1bb7   :  { %5591 = vtanh.f32 %v2788_v40  ;;  %v2789_v39 = vadd.f32 %v2781_v58, %v2752_v10 }
0x1bb8   :  { %5593 = vtanh.f32 %v2791_v0 }
0x1bb9   :  { %5595 = vtanh.f32 %v2789_v39 }
0x1bc0   :  { %v5590_v36 = vpop.eup %5589 }
0x1bc1   :  { %v5592_v13 = vpop.eup %5591 }
0x1bc2   :  { %v5594_v31 = vpop.eup %5593 }
0x1bc3   :  { %v5596_v17 = vpop.eup %5595  ;;  %v2797_v34 = vpack.c.bf16 %v5594_v31, %v5590_v36  ;;  %v5416_v31 = vld [vmem:[%s7208_s5 + $0x8] sm:$0xff]  }
0x1bc4   :  { %v2796_v55 = vpack.c.bf16 %v5596_v17, %v5592_v13  ;;  %v5415_v13 = vld [vmem:[%s7208_s5] sm:$0xff]   ;;  %v5417_v17 = vld [vmem:[%s7208_s5 + $0x10] sm:$0xff]  }
0x1bc6   :  { %5183 = vmatprep.mubr.msk.bf16.mxu1 %vm216_vm1, %v2796_v55  ;;  %v5420_v55 = vld [vmem:[#allocation13 + $0x8] sm:$0xff]  }
0x1bc7   :  { %5184 = vmatmul.mubr.msk.bf16.vlgmr.msra.gmra.mrb[40].mxu1 %vm216_vm1, %v2797_v34  ;;  %v5419_v34 = vld [vmem:[%s7208_s5 + $0x18] sm:$0xff]  }
0x1bc8   :  { %5203 = vmatprep.mubr.msk.bf16.mxu1 %vm5925_vm0, %v5924_v1  ;;  %5196 = vmatpush3.bf16.msra.mxu1 %v5415_v13 }
0x1bc9   :  { %5197 = vmatprep.subr.bf16.mxu1 %v5924_v1 }
0x1bcc   :  { %5198 = vmatpush3.bf16.msra.mxu1 %v5416_v31 }
0x1bcd   :  { %5199 = vmatprep.subr.bf16.mxu1 %v5924_v1 }
0x1bd0   :  { %5200 = vmatpush3.bf16.msra.mxu1 %v5417_v17 }
0x1bd1   :  { %5201 = vmatprep.subr.bf16.mxu1 %v5924_v1 }
0x1bd4   :  { %5202 = vmatpush3.bf16.msra.mxu1 %v5419_v34 }
0x1c9a   :  { %v5185_v22 = vpop.f32.mrb[40].mxu1 }
0x1c9b   :  { %v2850_v26 = vpop.f32.mrb[41].mxu1  ;;  %v2871_v52 = vsel %vm216_vm1, %v5185_v22, -inf }
0x1c9c   :  { %v5186_v6 = vpop.f32.mrb[42].mxu1  ;;  %v2865_v57 = vsel %vm216_vm1, %v2850_v26, -inf }
0x1c9d   :  { %2866 = vmax.xlane.f32.xlu0 %v2865_v57  ;;  %v2853_v63 = vpop.f32.mrb[43].mxu1  ;;  %v2874_v54 = vsel %vm216_vm1, %v5186_v6, -inf }
0x1c9e   :  { %v2868_v11 = vsel %vm216_vm1, %v2853_v63, -inf }
0x1c9f   :  { %2869 = vmax.xlane.f32.xlu1 %v2868_v11 }
0x1ca1   :  { %2872 = vmax.xlane.f32.xlu0 %v2871_v52 }
0x1ca5   :  { %2875 = vmax.xlane.f32.xlu0 %v2874_v54 }
0x1d2a   :  { %v2867_v9 = vpop.xlane.xlu0 %2866 }
0x1d2b   :  { %v2877_v33 = vsub.f32 %v2850_v26, %v2867_v9 }
0x1d2c   :  { %v2870_v44 = vpop.xlane.xlu1 %2869 }
0x1d2d   :  { %v2881_v45 = vmul.f32 1.442695, %v2877_v33  ;;  %v2878_v53 = vsub.f32 %v2853_v63, %v2870_v44 }
0x1d2e   :  { %v2873_v41 = vpop.xlane.xlu0 %2872 }
0x1d2f   :  { %5597 = vpow2.f32 %v2881_v45  ;;  %v2883_v43 = vmul.f32 1.442695, %v2878_v53  ;;  %v2879_v61 = vsub.f32 %v5185_v22, %v2873_v41 }
0x1d31   :  { %5599 = vpow2.f32 %v2883_v43  ;;  %v2885_v47 = vmul.f32 1.442695, %v2879_v61 }
0x1d32   :  { %v2876_v50 = vpop.xlane.xlu0 %2875 }
0x1d33   :  { %5601 = vpow2.f32 %v2885_v47  ;;  %v2880_v58 = vsub.f32 %v5186_v6, %v2876_v50 }
0x1d35   :  { %v2887_v24 = vmul.f32 1.442695, %v2880_v58 }
0x1d37   :  { %5603 = vpow2.f32 %v2887_v24 }
0x1d39   :  { %v5598_v62 = vpop.eup %5597 }
0x1d3a   :  { %v2889_v48 = vsel %vm216_vm1, %v5598_v62, 0.0 }
0x1d3b   :  { %v5600_v7 = vpop.eup %5599  ;;  %2890 = vadd.xlane.f32.xlu1 %v2889_v48 }
0x1d3c   :  { %v2892_v40 = vsel %vm216_vm1, %v5600_v7, 0.0 }
0x1d3d   :  { %v5602_v10 = vpop.eup %5601  ;;  %2893 = vadd.xlane.f32.xlu0 %v2892_v40 }
0x1d3e   :  { %v2895_v0 = vsel %vm216_vm1, %v5602_v10, 0.0 }
0x1d3f   :  { %2896 = vadd.xlane.f32.xlu1 %v2895_v0 }
0x1d41   :  { %v5604_v39 = vpop.eup %5603 }
0x1d42   :  { %v2898_v36 = vsel %vm216_vm1, %v5604_v39, 0.0 }
0x1d43   :  { %2899 = vadd.xlane.f32.xlu0 %v2898_v36 }
0x1d50   :  { %3054 = vrot.lane.b32.xlu1 %v6708_v20, %s5912_s27  ;;  %v5418_v20 = vld [vmem:[#allocation13] sm:$0xff]  }
0x1d51   :  { %5188 = vmatpush3.bf16.msra.mxu0 %v5418_v20 }
0x1d52   :  { %5189 = vmatprep.subr.bf16.mxu0 %v5924_v1 }
0x1d55   :  { %5190 = vmatpush3.bf16.msra.mxu0 %v5420_v55 }
0x1d56   :  { %5207 = vmatprep.subr.bf16.mxu0 %v5924_v1 }
0x1dc8   :  { %v2891_v22 = vpop.xlane.xlu1 %2890 }
0x1dc9   :  { %5605 = vrcp.f32 %v2891_v22 }
0x1dca   :  { %v2894_v26 = vpop.xlane.xlu0 %2893 }
0x1dcb   :  { %5607 = vrcp.f32 %v2894_v26 }
0x1dcc   :  { %v2897_v6 = vpop.xlane.xlu1 %2896 }
0x1dcd   :  { %5609 = vrcp.f32 %v2897_v6 }
0x1dd0   :  { %v2900_v57 = vpop.xlane.xlu0 %2899 }
0x1dd1   :  { %5611 = vrcp.f32 %v2900_v57 }
0x1dd3   :  { %v5606_v63 = vpop.eup %5605 }
0x1dd4   :  { %v6789_v11 = vmul.f32 %v5606_v63, %v5598_v62 }
0x1dd5   :  { %v5608_v52 = vpop.eup %5607 }
0x1dd6   :  { %v2913_v54 = vmul.f32 %v6635_v51, %v6789_v11  ;;  %v2935_v9 = vmul.f32 %v6639_v35, %v6789_v11  ;;  %v6795_v33 = vmul.f32 %v5608_v52, %v5600_v7 }
0x1dd7   :  { %v5610_v44 = vpop.eup %5609 }
0x1dd8   :  { %v2914_v45 = vmul.f32 %v6648_v56, %v6795_v33  ;;  %v2936_v53 = vmul.f32 %v6652_v60, %v6795_v33  ;;  %v6801_v41 = vmul.f32 %v5610_v44, %v5602_v10  ;;  %v2917_v43 = vsel %vm216_vm1, %v2913_v54, 0.0 }
0x1dd9   :  { %v2939_v47 = vsel %vm216_vm1, %v2935_v9, 0.0 }
0x1dda   :  { %v2918_v61 = vsel %vm216_vm1, %v2914_v45, 0.0  ;;  %v2940_v50 = vsel %vm216_vm1, %v2936_v53, 0.0  ;;  %v2915_v48 = vmul.f32 %v6678_v15, %v6801_v41  ;;  %v2937_v7 = vmul.f32 %v6682_v38, %v6801_v41 }
0x1ddb   :  { %v5612_v58 = vpop.eup %5611  ;;  %v2919_v24 = vadd.f32 %v2918_v61, %v2917_v43  ;;  %v2941_v62 = vadd.f32 %v2940_v50, %v2939_v47 }
0x1ddc   :  { %v6811_v40 = vmul.f32 %v5612_v58, %v5604_v39  ;;  %v2926_v20 = vsel %vm216_vm1, %v2915_v48, 0.0  ;;  %v2948_v55 = vsel %vm216_vm1, %v2937_v7, 0.0 }
0x1ddd   :  { %v2920_v10 = vrot.slane %v2919_v24, 4  ;;  %v2942_v0 = vrot.slane %v2941_v62, 4 }
0x1dde   :  { %v2916_v36 = vmul.f32 %v6667_v59, %v6811_v40  ;;  %v2938_v13 = vmul.f32 %v6671_v30, %v6811_v40 }
0x1ddf   :  { %v2921_v31 = vadd.f32 %v2920_v10, %v2919_v24  ;;  %v2943_v17 = vadd.f32 %v2942_v0, %v2941_v62 }
0x1de0   :  { %v2927_v34 = vsel %vm216_vm1, %v2916_v36, 0.0  ;;  %v2949_v22 = vsel %vm216_vm1, %v2938_v13, 0.0 }
0x1de1   :  { %v2928_v39 = vadd.f32 %v2927_v34, %v2926_v20  ;;  %v2944_v26 = vrot.slane %v2943_v17, 2  ;;  %v2950_v6 = vadd.f32 %v2949_v22, %v2948_v55  ;;  %v2922_v57 = vrot.slane %v2921_v31, 2  ;;  %v3055_v20 = vpop.permute.xlu1 %3054 }
0x1de3   :  { %v2929_v63 = vrot.slane %v2928_v39, 4  ;;  %v2951_v52 = vrot.slane %v2950_v6, 4  ;;  %v2923_v54 = vadd.f32 %v2922_v57, %v2921_v31  ;;  %v2945_v44 = vadd.f32 %v2944_v26, %v2943_v17 }
0x1de5   :  { %v2930_v9 = vadd.f32 %v2929_v63, %v2928_v39  ;;  %v2952_v45 = vadd.f32 %v2951_v52, %v2950_v6  ;;  %v2924_v53 = vrot.slane %v2923_v54, 1  ;;  %v2946_v47 = vrot.slane %v2945_v44, 1 }
0x1de7   :  { %v2953_v43 = vrot.slane %v2952_v45, 2  ;;  %v2931_v61 = vrot.slane %v2930_v9, 2  ;;  %v2925_v58 = vadd.f32 %v2924_v53, %v2923_v54  ;;  %v2947_v7 = vadd.f32 %v2946_v47, %v2945_v44 }
0x1de9   :  { %v2954_v50 = vadd.f32 %v2953_v43, %v2952_v45  ;;  %v2932_v24 = vadd.f32 %v2931_v61, %v2930_v9  ;;  %v2957_v36 = vpack.c.bf16 %v2925_v58, %v2925_v58 }
0x1deb   :  { %v2955_v62 = vrot.slane %v2954_v50, 1  ;;  %v2933_v48 = vrot.slane %v2932_v24, 1  ;;  %v2961_v55 = vunpack.c.l.b16 %v2957_v36 }
0x1ded   :  { %v2956_v10 = vadd.f32 %v2955_v62, %v2954_v50  ;;  %v2934_v0 = vadd.f32 %v2933_v48, %v2932_v24 }
0x1def   :  { %v3051_v13 = vsel %vm823_vm3, %v2956_v10, %v2947_v7  ;;  %v2958_v31 = vpack.c.bf16 %v2934_v0, %v2934_v0  ;;  %v3138_v7 = vrot.slane %v6703_v42, 6 }
0x1df0   :  { %v3057_v17 = vsel %vm216_vm1, %v3051_v13, %v3055_v20  ;;  %v5421_v13 = vld [vmem:[#allocation10] sm:$0xff]   ;;  %v5422_v20 = vld [vmem:[#allocation10 + $0x8] sm:$0xff]  }
0x1df1   :  { %v3058_v34 = vpack.c.bf16 %v3057_v17, %v3057_v17  ;;  %v2962_v22 = vunpack.c.l.b16 %v2958_v31  ;;  %v5423_v31 = vld [vmem:[#allocation11] sm:$0xff]  }
0x1df3   :  { %5204 = vmatmul.mubr.msk.bf16.vlgmr.msra.gmra.mrb[44].mxu1 %vm307_vm2, %v3058_v34  ;;  %v2963_v39 = vsel %vm823_vm3, %v2962_v22, %v2961_v55 }
0x1df4   :  { %v2964_v26 = vpack.c.b16 %v2963_v39, %v2963_v39  ;;  %v6846_v39 = vadd.f32 %v6795_v33, %v6715_v4  ;;  %v6862_v4 = vadd.f32 %v6801_v41, %v6727_v27  ;;  %v5426_v27 = vld [vmem:[%s7212_s9 + $0x8] sm:$0xff]  }
0x1df6   :  { %5192 = vmatmul.mubr.msk.bf16.vlgmr.msra.gmra.mrb[60].mxu0 %vm216_vm1, %v2964_v26  ;;  %v6850_v26 = vadd.f32 %v6789_v11, %v6719_v21 }
0x1df7   :  { %5211 = vmatprep.mubr.msk.bf16.mxu0 %vm5925_vm0, %v5924_v1  ;;  %5208 = vmatpush3.bf16.msra.mxu0 %v5421_v13 }
0x1df8   :  { %5209 = vmatprep.subr.bf16.mxu0 %v5924_v1 }
0x1dfb   :  { %5210 = vmatpush3.bf16.msra.mxu0 %v5422_v20 }
0x1dfc   :  { %5215 = vmatprep.subr.bf16.mxu0 %v5423_v31 }
0x1ec6   :  { %v3120_v6 = vpop.f32.mrb[44].mxu1 }
0x1ec7   :  { %v3127_v57 = vrot.slane %v3120_v6, 6  ;;  %v5205_v63 = vpop.f32.mrb[45].mxu1  ;;  %v5424_v6 = vld [vmem:[#allocation11 + $0x8] sm:$0xff]  }
0x1ec8   :  { %v3123_v52 = vpop.f32.mrb[46].mxu1  ;;  %v3217_v63 = vpack.c.bf16 %v6846_v39, %v6850_v26 }
0x1ec9   :  { %v3129_v54 = vadd.f32 %v3127_v57, %v6128_v37  ;;  %v6829_v9 = vpop.f32.mrb[60].mxu0  ;;  %v5206_v44 = vpop.f32.mrb[47].mxu1  ;;  %v6858_v52 = vadd.f32 %v6811_v40, %v6731_v32  ;;  %v5425_v32 = vld [vmem:[%s7212_s9] sm:$0xff]  }
0x1eca   :  { %v5193_v45 = vpop.f32.mrb[61].mxu0  ;;  %5223 = vmatprep.subr.bf16.mxu1 %v5425_v32 }
0x1ecb   :  { %5613 = vtanh.f32 %v3129_v54  ;;  %v3020_v53 = vpop.f32.mrb[62].mxu0  ;;  %v4739_v47 = vmul.f32 -1.442695, %v3129_v54  ;;  %v3218_v21 = vpack.c.bf16 %v6858_v52, %v6862_v4  ;;  %5224 = vmatpush3.bf16.msra.mxu1 %v5425_v32 }
0x1ecc   :  { %v5194_v43 = vpop.f32.mrb[63].mxu0  ;;  %5225 = vmatprep.subr.bf16.mxu1 %v5426_v27 }
0x1ecd   :  { %5615 = vpow2.f32 %v4739_v47 }
0x1ecf   :  { %5226 = vmatpush3.bf16.msra.mxu1 %v5426_v27 }
0x1ed0   :  { %5239 = vmatprep.subr.bf16.mxu1 %v5924_v1 }
0x1ed5   :  { %v5614_v61 = vpop.eup %5613 }
0x1ed6   :  { %3142 = vrot.lane.b32.xlu0 %v5614_v61, %s5912_s27 }
0x1ed7   :  { %v5616_v50 = vpop.eup %5615 }
0x1ed8   :  { %v3133_v58 = vadd.f32 1.0, %v5616_v50 }
0x1eda   :  { %5617 = vrcp.f32 %v3133_v58 }
0x1ee4   :  { %v5618_v24 = vpop.eup %5617 }
0x1ee5   :  { %v3140_v10 = vmul.f32 %v5618_v24, %v3138_v7 }
0x1f48   :  { %v3143_v62 = vpop.permute.xlu0 %3142 }
0x1f49   :  { %v3145_v48 = vmul.f32 %v5618_v24, %v3143_v62 }
0x1f4b   :  { %3147 = vrot.lane.b32.xlu1 %v3145_v48, %s5928_s12 }
0x1fbd   :  { %v3148_v0 = vpop.permute.xlu1 %3147 }
0x1fbe   :  { %v6834_v36 = vadd.f32 %v3148_v0, %v3140_v10 }
0x1fc0   :  { %5619 = vtanh.f32 %v6834_v36 }
0x1fca   :  { %v5620_v17 = vpop.eup %5619 }
0x1fcb   :  { %3153 = vrot.lane.b32.xlu1 %v5620_v17, %s5912_s27 }
0x203d   :  { %v3154_v34 = vpop.permute.xlu1 %3153 }
0x203e   :  { %v6839_v55 = vmul.f32 %v5618_v24, %v3154_v34 }
0x2040   :  { %v3157_v42 = vpack.c.bf16 %v6839_v55, %v6839_v55 }
0x2042   :  { %v3159_v22 = vrot.slane %v3157_v42, 1 }
0x2044   :  { %3160 = vrot.lane.b32.xlu0 %v3159_v22, %s5928_s12 }
0x20b6   :  { %v3161_v57 = vpop.permute.xlu0 %3160 }
0x20b7   :  { %5212 = vmatmul.mubr.msk.bf16.vlgmr.msra.gmra.mrb[64].mxu0 %vm216_vm1, %v3161_v57 }
0x20b8   :  { %5216 = vmatpush3.bf16.msra.mxu0 %v5423_v31  ;;  %5219 = vmatprep.mubr.msk.bf16.mxu0 %vm216_vm1, %v3217_v63 }
0x20b9   :  { %5217 = vmatprep.subr.bf16.mxu0 %v5424_v6 }
0x20bc   :  { %5218 = vmatpush3.bf16.msra.mxu0 %v5424_v6 }
0x20bd   :  { %5231 = vmatprep.subr.bf16.mxu0 %v5924_v1 }
0x20bf   :  { %5220 = vmatmul.mubr.msk.bf16.vlgmr.msra.gmra.mrb[68].mxu0 %vm216_vm1, %v3218_v21 }
0x20c0   :  { %5235 = vmatprep.mubr.msk.bf16.mxu0 %vm5925_vm0, %v5924_v1 }
0x218a   :  { %v6877_v11 = vpop.f32.mrb[64].mxu0 }
0x218b   :  { %v3297_v33 = vrot.slane %v6877_v11, %v6098_v8  ;;  %v5213_v41 = vpop.f32.mrb[65].mxu0 }
0x218c   :  { %v3214_v40 = vpop.f32.mrb[66].mxu0 }
0x218d   :  { %v3298_v54 = vcombine.high %v3297_v33, %v3297_v33  ;;  %v5214_v44 = vpop.f32.mrb[67].mxu0  ;;  %v3305_v53 = vrot.slane %v3297_v33, %v6098_v8 }
0x218f   :  { %v3312_v45 = vrot.slane %v3298_v54, %v6098_v8  ;;  %v3316_v24 = vrot.slane %v3305_v53, %v6188_v25 }
0x2191   :  { %v3320_v47 = vrot.slane %v3312_v45, %v6188_v25 }
0x2192   :  { %v5221_v43 = vpop.f32.mrb[68].mxu0 }
0x2193   :  { %v3288_v61 = vadd.f32 %v5221_v43, %v6163_v12  ;;  %v3271_v50 = vpop.f32.mrb[69].mxu0 }
0x2194   :  { %v3286_v58 = vadd.f32 %v3271_v50, %v6166_v14  ;;  %v5222_v62 = vpop.f32.mrb[70].mxu0 }
0x2195   :  { %v3325_v48 = vadd.f32 %v3320_v47, %v3288_v61  ;;  %v3289_v7 = vadd.f32 %v5222_v62, %v6169_v16  ;;  %v3274_v10 = vpop.f32.mrb[71].mxu0 }
0x2196   :  { %v3323_v0 = vadd.f32 %v3316_v24, %v3286_v58  ;;  %v3287_v13 = vadd.f32 %v3274_v10, %v6172_v18 }
0x2197   :  { %5621 = vtanh.f32 %v3325_v48  ;;  %v3326_v20 = vadd.f32 %v3320_v47, %v3289_v7 }
0x2198   :  { %5623 = vtanh.f32 %v3323_v0  ;;  %v3324_v31 = vadd.f32 %v3316_v24, %v3287_v13 }
0x2199   :  { %5625 = vtanh.f32 %v3326_v20 }
0x219a   :  { %5627 = vtanh.f32 %v3324_v31 }
0x21a1   :  { %v5622_v17 = vpop.eup %5621 }
0x21a2   :  { %v5624_v34 = vpop.eup %5623 }
0x21a3   :  { %v5626_v42 = vpop.eup %5625 }
0x21a4   :  { %v5628_v22 = vpop.eup %5627  ;;  %v3332_v6 = vpack.c.bf16 %v5626_v42, %v5622_v17 }
0x21a5   :  { %v3331_v57 = vpack.c.bf16 %v5628_v22, %v5624_v34  ;;  %v3589_v22 = vrot.slane %v6839_v55, 2  ;;  %v5429_v55 = vld [vmem:[%s7208_s5 + $0x10] sm:$0xff]  }
0x21a7   :  { %5227 = vmatprep.mubr.msk.bf16.mxu1 %vm216_vm1, %v3331_v57  ;;  %v5428_v57 = vld [vmem:[%s7208_s5 + $0x8] sm:$0xff]  }
0x21a8   :  { %5228 = vmatmul.mubr.msk.bf16.vlgmr.msra.gmra.mrb[48].mxu1 %vm216_vm1, %v3332_v6  ;;  %v5427_v6 = vld [vmem:[%s7208_s5] sm:$0xff]  }
0x21a9   :  { %5247 = vmatprep.mubr.msk.bf16.mxu1 %vm5925_vm0, %v5924_v1  ;;  %5240 = vmatpush3.bf16.msra.mxu1 %v5427_v6 }
0x21aa   :  { %5241 = vmatprep.subr.bf16.mxu1 %v5924_v1 }
0x21ad   :  { %5242 = vmatpush3.bf16.msra.mxu1 %v5428_v57 }
0x21ae   :  { %5243 = vmatprep.subr.bf16.mxu1 %v5924_v1 }
0x21b1   :  { %5244 = vmatpush3.bf16.msra.mxu1 %v5429_v55 }
0x21b2   :  { %5245 = vmatprep.subr.bf16.mxu1 %v5924_v1 }
0x227b   :  { %v5229_v63 = vpop.f32.mrb[48].mxu1 }
0x227c   :  { %v3385_v21 = vpop.f32.mrb[49].mxu1  ;;  %v3406_v54 = vsel %vm216_vm1, %v5229_v63, -inf }
0x227d   :  { %v5230_v32 = vpop.f32.mrb[50].mxu1  ;;  %v3400_v27 = vsel %vm216_vm1, %v3385_v21, -inf }
0x227e   :  { %3401 = vmax.xlane.f32.xlu1 %v3400_v27  ;;  %v3388_v33 = vpop.f32.mrb[51].mxu1  ;;  %v3409_v40 = vsel %vm216_vm1, %v5230_v32, -inf }
0x227f   :  { %v3403_v41 = vsel %vm216_vm1, %v3388_v33, -inf }
0x2280   :  { %3404 = vmax.xlane.f32.xlu0 %v3403_v41 }
0x2282   :  { %3410 = vmax.xlane.f32.xlu1 %v3409_v40 }
0x2284   :  { %3407 = vmax.xlane.f32.xlu0 %v3406_v54 }
0x230b   :  { %v3402_v44 = vpop.xlane.xlu1 %3401 }
0x230c   :  { %v3412_v45 = vsub.f32 %v3385_v21, %v3402_v44  ;;  %v5431_v21 = vld [vmem:[%s7208_s5 + $0x18] sm:$0xff]  }
0x230d   :  { %v3405_v53 = vpop.xlane.xlu0 %3404  ;;  %5246 = vmatpush3.bf16.msra.mxu1 %v5431_v21 }
0x230e   :  { %v3416_v43 = vmul.f32 1.442695, %v3412_v45  ;;  %v3413_v61 = vsub.f32 %v3388_v33, %v3405_v53 }
0x230f   :  { %v3411_v47 = vpop.xlane.xlu1 %3410 }
0x2310   :  { %5629 = vpow2.f32 %v3416_v43  ;;  %v3418_v50 = vmul.f32 1.442695, %v3413_v61  ;;  %v3415_v58 = vsub.f32 %v5230_v32, %v3411_v47  ;;  %v5432_v32 = vld [vmem:[#allocation13 + $0x8] sm:$0xff]  }
0x2311   :  { %v3408_v24 = vpop.xlane.xlu0 %3407 }
0x2312   :  { %5631 = vpow2.f32 %v3418_v50  ;;  %v3422_v62 = vmul.f32 1.442695, %v3415_v58  ;;  %v3414_v48 = vsub.f32 %v5229_v63, %v3408_v24  ;;  %v5430_v63 = vld [vmem:[#allocation13] sm:$0xff]  }
0x2313   :  { %5232 = vmatpush3.bf16.msra.mxu0 %v5430_v63 }
0x2314   :  { %5633 = vpow2.f32 %v3422_v62  ;;  %v3420_v7 = vmul.f32 1.442695, %v3414_v48  ;;  %5233 = vmatprep.subr.bf16.mxu0 %v5924_v1 }
0x2316   :  { %5635 = vpow2.f32 %v3420_v7 }
0x2317   :  { %5234 = vmatpush3.bf16.msra.mxu0 %v5432_v32 }
0x2318   :  { %5251 = vmatprep.subr.bf16.mxu0 %v5924_v1 }
0x231a   :  { %v5630_v10 = vpop.eup %5629 }
0x231b   :  { %v3424_v0 = vsel %vm216_vm1, %v5630_v10, 0.0 }
0x231c   :  { %v5632_v13 = vpop.eup %5631  ;;  %3425 = vadd.xlane.f32.xlu0 %v3424_v0 }
0x231d   :  { %v3427_v20 = vsel %vm216_vm1, %v5632_v13, 0.0 }
0x231e   :  { %v5634_v31 = vpop.eup %5633  ;;  %3428 = vadd.xlane.f32.xlu1 %v3427_v20 }
0x231f   :  { %v3433_v34 = vsel %vm216_vm1, %v5634_v31, 0.0 }
0x2320   :  { %v5636_v17 = vpop.eup %5635 }
0x2321   :  { %v3430_v42 = vsel %vm216_vm1, %v5636_v17, 0.0 }
0x2322   :  { %3434 = vadd.xlane.f32.xlu1 %v3433_v34  ;;  %3431 = vadd.xlane.f32.xlu0 %v3430_v42 }
0x2338   :  { %3590 = vrot.lane.b32.xlu0 %v3589_v22, %s5912_s27 }
0x23a9   :  { %v3426_v27 = vpop.xlane.xlu0 %3425 }
0x23aa   :  { %5637 = vrcp.f32 %v3426_v27 }
0x23ab   :  { %v3429_v33 = vpop.xlane.xlu1 %3428 }
0x23ac   :  { %5639 = vrcp.f32 %v3429_v33 }
0x23af   :  { %v3435_v41 = vpop.xlane.xlu1 %3434  ;;  %v3432_v40 = vpop.xlane.xlu0 %3431 }
0x23b0   :  { %5641 = vrcp.f32 %v3435_v41 }
0x23b1   :  { %5643 = vrcp.f32 %v3432_v40 }
0x23b4   :  { %v5638_v54 = vpop.eup %5637 }
0x23b5   :  { %v6920_v44 = vmul.f32 %v5638_v54, %v5630_v10 }
0x23b6   :  { %v5640_v45 = vpop.eup %5639 }
0x23b7   :  { %v3448_v53 = vmul.f32 %v6635_v51, %v6920_v44  ;;  %v3470_v43 = vmul.f32 %v6639_v35, %v6920_v44  ;;  %v6926_v61 = vmul.f32 %v5640_v45, %v5632_v13 }
0x23b9   :  { %v3449_v47 = vmul.f32 %v6648_v56, %v6926_v61  ;;  %v3471_v50 = vmul.f32 %v6652_v60, %v6926_v61  ;;  %v3452_v24 = vsel %vm216_vm1, %v3448_v53, 0.0  ;;  %v3474_v51 = vsel %vm216_vm1, %v3470_v43, 0.0 }
0x23ba   :  { %v5642_v58 = vpop.eup %5641 }
0x23bb   :  { %v5644_v62 = vpop.eup %5643  ;;  %v3453_v48 = vsel %vm216_vm1, %v3449_v47, 0.0  ;;  %v6934_v7 = vmul.f32 %v5642_v58, %v5634_v31  ;;  %v3475_v35 = vsel %vm216_vm1, %v3471_v50, 0.0 }
0x23bc   :  { %v3454_v10 = vadd.f32 %v3453_v48, %v3452_v24  ;;  %v6938_v0 = vmul.f32 %v5644_v62, %v5636_v17  ;;  %v3476_v13 = vadd.f32 %v3475_v35, %v3474_v51 }
0x23bd   :  { %v3451_v56 = vmul.f32 %v6667_v59, %v6934_v7  ;;  %v3473_v60 = vmul.f32 %v6671_v30, %v6934_v7 }
0x23be   :  { %v3455_v20 = vrot.slane %v3454_v10, 4  ;;  %v3450_v34 = vmul.f32 %v6678_v15, %v6938_v0  ;;  %v3472_v31 = vmul.f32 %v6682_v38, %v6938_v0  ;;  %v3477_v42 = vrot.slane %v3476_v13, 4 }
0x23bf   :  { %v3462_v22 = vsel %vm216_vm1, %v3451_v56, 0.0  ;;  %v3484_v17 = vsel %vm216_vm1, %v3473_v60, 0.0  ;;  %v3591_v56 = vpop.permute.xlu0 %3590 }
0x23c0   :  { %v3456_v6 = vadd.f32 %v3455_v20, %v3454_v10  ;;  %v3461_v57 = vsel %vm216_vm1, %v3450_v34, 0.0  ;;  %v3478_v55 = vadd.f32 %v3477_v42, %v3476_v13  ;;  %v3483_v59 = vsel %vm216_vm1, %v3472_v31, 0.0 }
0x23c1   :  { %v3463_v63 = vadd.f32 %v3462_v22, %v3461_v57  ;;  %v3485_v30 = vadd.f32 %v3484_v17, %v3483_v59 }
0x23c2   :  { %v3479_v21 = vrot.slane %v3478_v55, 2  ;;  %v3457_v32 = vrot.slane %v3456_v6, 2 }
0x23c3   :  { %v3464_v27 = vrot.slane %v3463_v63, 4  ;;  %v3486_v15 = vrot.slane %v3485_v30, 4 }
0x23c4   :  { %v3458_v33 = vadd.f32 %v3457_v32, %v3456_v6  ;;  %v3480_v38 = vadd.f32 %v3479_v21, %v3478_v55 }
0x23c5   :  { %v3465_v41 = vadd.f32 %v3464_v27, %v3463_v63  ;;  %v3487_v40 = vadd.f32 %v3486_v15, %v3485_v30 }
0x23c6   :  { %v3459_v54 = vrot.slane %v3458_v33, 1  ;;  %v3481_v43 = vrot.slane %v3480_v38, 1 }
0x23c7   :  { %v3488_v45 = vrot.slane %v3487_v40, 2  ;;  %v3466_v53 = vrot.slane %v3465_v41, 2 }
0x23c8   :  { %v3460_v50 = vadd.f32 %v3459_v54, %v3458_v33  ;;  %v3482_v48 = vadd.f32 %v3481_v43, %v3480_v38  ;;  %v3674_v43 = vrot.slane %v6834_v36, 6 }
0x23c9   :  { %v3489_v47 = vadd.f32 %v3488_v45, %v3487_v40  ;;  %v3467_v58 = vadd.f32 %v3466_v53, %v3465_v41 }
0x23ca   :  { %v3492_v10 = vpack.c.bf16 %v3460_v50, %v3460_v50 }
0x23cb   :  { %v3490_v24 = vrot.slane %v3489_v47, 1  ;;  %v3468_v62 = vrot.slane %v3467_v58, 1 }
0x23cc   :  { %v3496_v31 = vunpack.c.l.b16 %v3492_v10 }
0x23cd   :  { %v3491_v51 = vadd.f32 %v3490_v24, %v3489_v47  ;;  %v3469_v35 = vadd.f32 %v3468_v62, %v3467_v58  ;;  %v5433_v24 = vld [vmem:[#allocation10] sm:$0xff]   ;;  %v5434_v62 = vld [vmem:[#allocation10 + $0x8] sm:$0xff]  }
0x23cf   :  { %v3586_v13 = vsel %vm823_vm3, %v3491_v51, %v3482_v48  ;;  %v3493_v60 = vpack.c.bf16 %v3469_v35, %v3469_v35  ;;  %v5435_v48 = vld [vmem:[#allocation11] sm:$0xff]  }
0x23d0   :  { %v3593_v20 = vsel %vm216_vm1, %v3586_v13, %v3591_v56  ;;  %v6977_v56 = vadd.f32 %v6926_v61, %v6846_v39  ;;  %v6993_v39 = vadd.f32 %v6934_v7, %v6858_v52  ;;  %v5438_v52 = vld [vmem:[%s7212_s9 + $0x8] sm:$0xff]  }
0x23d1   :  { %v3594_v34 = vpack.c.bf16 %v3593_v20, %v3593_v20  ;;  %v3497_v42 = vunpack.c.l.b16 %v3493_v60  ;;  %v6981_v60 = vadd.f32 %v6920_v44, %v6850_v26  ;;  %v5436_v20 = vld [vmem:[#allocation11 + $0x8] sm:$0xff]  }
0x23d3   :  { %5248 = vmatmul.mubr.msk.bf16.vlgmr.msra.gmra.mrb[52].mxu1 %vm307_vm2, %v3594_v34  ;;  %v3498_v22 = vsel %vm823_vm3, %v3497_v42, %v3496_v31  ;;  %v3753_v31 = vpack.c.bf16 %v6977_v56, %v6981_v60  ;;  %v6989_v42 = vadd.f32 %v6938_v0, %v6862_v4  ;;  %v5437_v4 = vld [vmem:[%s7212_s9] sm:$0xff]  }
0x23d4   :  { %v3499_v17 = vpack.c.b16 %v3498_v22, %v3498_v22  ;;  %5267 = vmatprep.subr.bf16.mxu1 %v5437_v4 }
0x23d5   :  { %v3754_v26 = vpack.c.bf16 %v6993_v39, %v6989_v42  ;;  %5268 = vmatpush3.bf16.msra.mxu1 %v5437_v4 }
0x23d6   :  { %5236 = vmatmul.mubr.msk.bf16.vlgmr.msra.gmra.mrb[72].mxu0 %vm216_vm1, %v3499_v17  ;;  %5269 = vmatprep.subr.bf16.mxu1 %v5438_v52 }
0x23d7   :  { %5255 = vmatprep.mubr.msk.bf16.mxu0 %vm5925_vm0, %v5924_v1  ;;  %5252 = vmatpush3.bf16.msra.mxu0 %v5433_v24 }
0x23d8   :  { %5253 = vmatprep.subr.bf16.mxu0 %v5924_v1 }
0x23d9   :  { %5270 = vmatpush3.bf16.msra.mxu1 %v5438_v52 }
0x23da   :  { %5283 = vmatprep.subr.bf16.mxu1 %v5924_v1 }
0x23db   :  { %5254 = vmatpush3.bf16.msra.mxu0 %v5434_v62 }
0x23dc   :  { %5259 = vmatprep.subr.bf16.mxu0 %v5435_v48 }
0x24a6   :  { %v3656_v6 = vpop.f32.mrb[52].mxu1 }
0x24a7   :  { %v3663_v57 = vrot.slane %v3656_v6, 4  ;;  %v5249_v55 = vpop.f32.mrb[53].mxu1 }
0x24a8   :  { %v3659_v59 = vpop.f32.mrb[54].mxu1 }
0x24a9   :  { %v3665_v63 = vadd.f32 %v3663_v57, %v6128_v37  ;;  %v6960_v30 = vpop.f32.mrb[72].mxu0  ;;  %v5250_v21 = vpop.f32.mrb[55].mxu1 }
0x24aa   :  { %v5237_v32 = vpop.f32.mrb[73].mxu0 }
0x24ab   :  { %5645 = vtanh.f32 %v3665_v63  ;;  %v3555_v27 = vpop.f32.mrb[74].mxu0  ;;  %v4759_v41 = vmul.f32 -1.442695, %v3665_v63 }
0x24ac   :  { %v5238_v15 = vpop.f32.mrb[75].mxu0 }
0x24ad   :  { %5647 = vpow2.f32 %v4759_v41 }
0x24b5   :  { %v5646_v33 = vpop.eup %5645 }
0x24b6   :  { %3678 = vrot.lane.b32.xlu1 %v5646_v33, %s5912_s27 }
0x24b7   :  { %v5648_v38 = vpop.eup %5647 }
0x24b8   :  { %v3669_v40 = vadd.f32 1.0, %v5648_v38 }
0x24ba   :  { %5649 = vrcp.f32 %v3669_v40 }
0x24c4   :  { %v5650_v54 = vpop.eup %5649 }
0x24c5   :  { %v3676_v47 = vmul.f32 %v5650_v54, %v3674_v43 }
0x2528   :  { %v3679_v45 = vpop.permute.xlu1 %3678 }
0x2529   :  { %v3681_v53 = vmul.f32 %v5650_v54, %v3679_v45 }
0x252b   :  { %3683 = vrot.lane.b32.xlu1 %v3681_v53, %s5928_s12 }
0x259d   :  { %v3684_v50 = vpop.permute.xlu1 %3683 }
0x259e   :  { %v6965_v58 = vadd.f32 %v3684_v50, %v3676_v47 }
0x25a0   :  { %5651 = vtanh.f32 %v6965_v58 }
0x25aa   :  { %v5652_v51 = vpop.eup %5651 }
0x25ab   :  { %3689 = vrot.lane.b32.xlu0 %v5652_v51, %s5912_s27 }
0x261d   :  { %v3690_v35 = vpop.permute.xlu0 %3689 }
0x261e   :  { %v6970_v10 = vmul.f32 %v5650_v54, %v3690_v35 }
0x2620   :  { %v3693_v36 = vpack.c.bf16 %v6970_v10, %v6970_v10 }
0x2622   :  { %v3695_v13 = vrot.slane %v3693_v36, 2 }
0x2624   :  { %3696 = vrot.lane.b32.xlu1 %v3695_v13, %s5928_s12 }
0x2696   :  { %v3697_v34 = vpop.permute.xlu1 %3696 }
0x2697   :  { %5256 = vmatmul.mubr.msk.bf16.vlgmr.msra.gmra.mrb[76].mxu0 %vm216_vm1, %v3697_v34 }
0x2698   :  { %5260 = vmatpush3.bf16.msra.mxu0 %v5435_v48  ;;  %5263 = vmatprep.mubr.msk.bf16.mxu0 %vm216_vm1, %v3753_v31 }
0x2699   :  { %5261 = vmatprep.subr.bf16.mxu0 %v5436_v20 }
0x269c   :  { %5262 = vmatpush3.bf16.msra.mxu0 %v5436_v20 }
0x269d   :  { %5275 = vmatprep.subr.bf16.mxu0 %v5924_v1 }
0x269f   :  { %5264 = vmatmul.mubr.msk.bf16.vlgmr.msra.gmra.mrb[80].mxu0 %vm216_vm1, %v3754_v26 }
0x26a0   :  { %5279 = vmatprep.mubr.msk.bf16.mxu0 %vm5925_vm0, %v5924_v1 }
0x276a   :  { %v7008_v44 = vpop.f32.mrb[76].mxu0 }
0x276b   :  { %v3833_v61 = vrot.slane %v7008_v44, %v6098_v8  ;;  %v5257_v7 = vpop.f32.mrb[77].mxu0 }
0x276c   :  { %v3750_v0 = vpop.f32.mrb[78].mxu0 }
0x276d   :  { %v3834_v22 = vcombine.high %v3833_v61, %v3833_v61  ;;  %v5258_v17 = vpop.f32.mrb[79].mxu0  ;;  %v3841_v57 = vrot.slane %v3833_v61, %v6098_v8 }
0x276f   :  { %v3848_v6 = vrot.slane %v3834_v22, %v6098_v8  ;;  %v3852_v27 = vrot.slane %v3841_v57, %v6188_v25 }
0x2771   :  { %v3856_v63 = vrot.slane %v3848_v6, %v6188_v25 }
0x2772   :  { %v5265_v55 = vpop.f32.mrb[80].mxu0 }
0x2773   :  { %v3824_v59 = vadd.f32 %v5265_v55, %v6163_v12  ;;  %v3807_v21 = vpop.f32.mrb[81].mxu0 }
0x2774   :  { %v3822_v32 = vadd.f32 %v3807_v21, %v6166_v14  ;;  %v5266_v15 = vpop.f32.mrb[82].mxu0 }
0x2775   :  { %v3861_v33 = vadd.f32 %v3856_v63, %v3824_v59  ;;  %v3825_v41 = vadd.f32 %v5266_v15, %v6169_v16  ;;  %v3810_v38 = vpop.f32.mrb[83].mxu0 }
0x2776   :  { %v3859_v40 = vadd.f32 %v3852_v27, %v3822_v32  ;;  %v3823_v54 = vadd.f32 %v3810_v38, %v6172_v18 }
0x2777   :  { %5653 = vtanh.f32 %v3861_v33  ;;  %v3862_v45 = vadd.f32 %v3856_v63, %v3825_v41 }
0x2778   :  { %5655 = vtanh.f32 %v3859_v40  ;;  %v3860_v53 = vadd.f32 %v3852_v27, %v3823_v54  ;;  %v4125_v54 = vrot.slane %v6970_v10, 4  ;;  %v5441_v10 = vld [vmem:[%s7208_s5 + $0x10] sm:$0xff]  }
0x2779   :  { %5657 = vtanh.f32 %v3862_v45  ;;  %v5439_v45 = vld [vmem:[%s7208_s5] sm:$0xff]  }
0x277a   :  { %5659 = vtanh.f32 %v3860_v53  ;;  %v5440_v53 = vld [vmem:[%s7208_s5 + $0x8] sm:$0xff]  }
0x2781   :  { %v5654_v43 = vpop.eup %5653 }
0x2782   :  { %v5656_v47 = vpop.eup %5655 }
0x2783   :  { %v5658_v50 = vpop.eup %5657 }
0x2784   :  { %v5660_v24 = vpop.eup %5659  ;;  %v3868_v62 = vpack.c.bf16 %v5658_v50, %v5654_v43  ;;  %v5442_v43 = vld [vmem:[#allocation13] sm:$0xff]   ;;  %v5444_v50 = vld [vmem:[#allocation13 + $0x8] sm:$0xff]  }
0x2785   :  { %v3867_v48 = vpack.c.bf16 %v5660_v24, %v5656_v47  ;;  %v5443_v47 = vld [vmem:[%s7208_s5 + $0x18] sm:$0xff]   ;;  %5276 = vmatpush3.bf16.msra.mxu0 %v5442_v43 }
0x2786   :  { %5277 = vmatprep.subr.bf16.mxu0 %v5924_v1 }
0x2787   :  { %5271 = vmatprep.mubr.msk.bf16.mxu1 %vm216_vm1, %v3867_v48 }
0x2788   :  { %5272 = vmatmul.mubr.msk.bf16.vlgmr.msra.gmra.mrb[56].mxu1 %vm216_vm1, %v3868_v62 }
0x2789   :  { %5291 = vmatprep.mubr.msk.bf16.mxu1 %vm5925_vm0, %v5924_v1  ;;  %5284 = vmatpush3.bf16.msra.mxu1 %v5439_v45 }
0x278a   :  { %5285 = vmatprep.subr.bf16.mxu1 %v5924_v1  ;;  %5278 = vmatpush3.bf16.msra.mxu0 %v5444_v50 }
0x278b   :  { %5295 = vmatprep.subr.bf16.mxu0 %v5924_v1 }
0x278d   :  { %5286 = vmatpush3.bf16.msra.mxu1 %v5440_v53 }
0x278e   :  { %5287 = vmatprep.subr.bf16.mxu1 %v5924_v1 }
0x2791   :  { %5288 = vmatpush3.bf16.msra.mxu1 %v5441_v10  ;;  %v7084_v10 = vld [vmem:[%s7205_s2 + $0x18] sm:$0xff] }
0x2792   :  { %5289 = vmatprep.subr.bf16.mxu1 %v5924_v1 }
0x2795   :  { %5290 = vmatpush3.bf16.msra.mxu1 %v5443_v47  ;;  %v5724_v47 = vld [vmem:[#allocation7 + $0x18] sm:$0xff] }
0x285b   :  { %v5273_v51 = vpop.f32.mrb[56].mxu1 }
0x285c   :  { %v3921_v35 = vpop.f32.mrb[57].mxu1  ;;  %v3942_v31 = vsel %vm216_vm1, %v5273_v51, -inf }
0x285d   :  { %v5274_v36 = vpop.f32.mrb[58].mxu1  ;;  %v3936_v13 = vsel %vm216_vm1, %v3921_v35, -inf }
0x285e   :  { %3937 = vmax.xlane.f32.xlu0 %v3936_v13  ;;  %v3924_v20 = vpop.f32.mrb[59].mxu1  ;;  %v3945_v26 = vsel %vm216_vm1, %v5274_v36, -inf }
0x285f   :  { %v3939_v34 = vsel %vm216_vm1, %v3924_v20, -inf }
0x2860   :  { %3940 = vmax.xlane.f32.xlu1 %v3939_v34 }
0x2862   :  { %3943 = vmax.xlane.f32.xlu0 %v3942_v31  ;;  %v5718_v31 = vld [vmem:[#allocation7] sm:$0xff] }
0x2866   :  { %3946 = vmax.xlane.f32.xlu0 %v3945_v26 }
0x28eb   :  { %v3938_v4 = vpop.xlane.xlu0 %3937 }
0x28ec   :  { %v3948_v52 = vsub.f32 %v3921_v35, %v3938_v4 }
0x28ed   :  { %v3941_v61 = vpop.xlane.xlu1 %3940 }
0x28ee   :  { %v3952_v7 = vmul.f32 1.442695, %v3948_v52  ;;  %v3949_v0 = vsub.f32 %v3924_v20, %v3941_v61  ;;  %v7054_v20 = vld [vmem:[%s7205_s2] sm:$0xff]  ;;  %v7060_v61 = vld [vmem:[%s7205_s2 + $0x8] sm:$0xff] }
0x28ef   :  { %v3944_v22 = vpop.xlane.xlu0 %3943 }
0x28f0   :  { %5661 = vpow2.f32 %v3952_v7  ;;  %v3954_v17 = vmul.f32 1.442695, %v3949_v0  ;;  %v3950_v6 = vsub.f32 %v5273_v51, %v3944_v22  ;;  %v5720_v0 = vld [vmem:[#allocation7 + $0x8] sm:$0xff] }
0x28f2   :  { %5663 = vpow2.f32 %v3954_v17  ;;  %v3956_v57 = vmul.f32 1.442695, %v3950_v6 }
0x28f3   :  { %v3947_v55 = vpop.xlane.xlu0 %3946 }
0x28f4   :  { %5665 = vpow2.f32 %v3956_v57  ;;  %v3951_v59 = vsub.f32 %v5274_v36, %v3947_v55 }
0x28f6   :  { %v3958_v63 = vmul.f32 1.442695, %v3951_v59 }
0x28f8   :  { %5667 = vpow2.f32 %v3958_v63 }
0x28fa   :  { %v5662_v21 = vpop.eup %5661 }
0x28fb   :  { %v3960_v32 = vsel %vm216_vm1, %v5662_v21, 0.0 }
0x28fc   :  { %v5664_v27 = vpop.eup %5663  ;;  %3961 = vadd.xlane.f32.xlu1 %v3960_v32 }
0x28fd   :  { %v3963_v15 = vsel %vm216_vm1, %v5664_v27, 0.0 }
0x28fe   :  { %v5666_v33 = vpop.eup %5665  ;;  %3964 = vadd.xlane.f32.xlu0 %v3963_v15  ;;  %v7076_v15 = vld [vmem:[%s7205_s2 + $0x10] sm:$0xff] }
0x28ff   :  { %v3966_v41 = vsel %vm216_vm1, %v5666_v33, 0.0 }
0x2900   :  { %3967 = vadd.xlane.f32.xlu1 %v3966_v41  ;;  %v5722_v41 = vld [vmem:[#allocation7 + $0x10] sm:$0xff] }
0x2902   :  { %v5668_v38 = vpop.eup %5667 }
0x2903   :  { %v3969_v40 = vsel %vm216_vm1, %v5668_v38, 0.0 }
0x2904   :  { %3970 = vadd.xlane.f32.xlu0 %v3969_v40 }
0x2911   :  { %4126 = vrot.lane.b32.xlu1 %v4125_v54, %s5912_s27 }
0x2989   :  { %v3962_v24 = vpop.xlane.xlu1 %3961 }
0x298a   :  { %5669 = vrcp.f32 %v3962_v24 }
0x298b   :  { %v3965_v62 = vpop.xlane.xlu0 %3964 }
0x298c   :  { %5671 = vrcp.f32 %v3965_v62 }
0x298d   :  { %v3968_v48 = vpop.xlane.xlu1 %3967 }
0x298e   :  { %5673 = vrcp.f32 %v3968_v48 }
0x2991   :  { %v3971_v51 = vpop.xlane.xlu0 %3970 }
0x2992   :  { %5675 = vrcp.f32 %v3971_v51 }
0x2994   :  { %v5670_v35 = vpop.eup %5669 }
0x2995   :  { %v3976_v36 = vmul.f32 %v5670_v35, %v5662_v21 }
0x2996   :  { %v5672_v13 = vpop.eup %5671 }
0x2997   :  { %v3984_v34 = vmul.f32 %v7054_v20, %v3976_v36  ;;  %v4006_v26 = vmul.f32 %v5718_v31, %v3976_v36  ;;  %v3977_v4 = vmul.f32 %v5672_v13, %v5664_v27  ;;  %v7064_v6 = vadd.f32 %v3976_v36, %v6981_v60 }
0x2998   :  { %v5674_v52 = vpop.eup %5673 }
0x2999   :  { %v3985_v7 = vmul.f32 %v7060_v61, %v3977_v4  ;;  %v4007_v22 = vmul.f32 %v5720_v0, %v3977_v4  ;;  %v3978_v17 = vmul.f32 %v5674_v52, %v5666_v33  ;;  %v7067_v57 = vadd.f32 %v3977_v4, %v6977_v56 }
0x299a   :  { %v3988_v55 = vsel %vm216_vm1, %v3984_v34, 0.0  ;;  %v4010_v63 = vsel %vm216_vm1, %v4006_v26, 0.0 }
0x299b   :  { %v3989_v59 = vsel %vm216_vm1, %v3985_v7, 0.0  ;;  %v4011_v21 = vsel %vm216_vm1, %v4007_v22, 0.0  ;;  %v3986_v60 = vmul.f32 %v7076_v15, %v3978_v17  ;;  %v4289_v56 = vpack.c.bf16 %v7067_v57, %v7064_v6  ;;  %v5450_v6 = vld [vmem:[%s7212_s9 + $0x8] sm:$0xff]  }
0x299c   :  { %v5676_v32 = vpop.eup %5675  ;;  %v3990_v27 = vadd.f32 %v3989_v59, %v3988_v55  ;;  %v4012_v33 = vadd.f32 %v4011_v21, %v4010_v63  ;;  %v4008_v40 = vmul.f32 %v5722_v41, %v3978_v17  ;;  %v7088_v24 = vadd.f32 %v3978_v17, %v6989_v42 }
0x299d   :  { %v3979_v54 = vmul.f32 %v5676_v32, %v5668_v38  ;;  %v3997_v38 = vsel %vm216_vm1, %v3986_v60, 0.0 }
0x299e   :  { %v3991_v45 = vrot.slane %v3990_v27, 4  ;;  %v4013_v53 = vrot.slane %v4012_v33, 4  ;;  %v4019_v36 = vsel %vm216_vm1, %v4008_v40, 0.0 }
0x299f   :  { %v3987_v43 = vmul.f32 %v7084_v10, %v3979_v54  ;;  %v4009_v50 = vmul.f32 %v5724_v47, %v3979_v54  ;;  %v7091_v62 = vadd.f32 %v3979_v54, %v6993_v39  ;;  %v4127_v47 = vpop.permute.xlu1 %4126 }
0x29a0   :  { %v3992_v48 = vadd.f32 %v3991_v45, %v3990_v27  ;;  %v4014_v51 = vadd.f32 %v4013_v53, %v4012_v33 }
0x29a1   :  { %v3998_v35 = vsel %vm216_vm1, %v3987_v43, 0.0  ;;  %v4020_v13 = vsel %vm216_vm1, %v4009_v50, 0.0  ;;  %v4290_v34 = vpack.c.bf16 %v7091_v62, %v7088_v24 }
0x29a2   :  { %v3999_v31 = vadd.f32 %v3998_v35, %v3997_v38  ;;  %v4015_v26 = vrot.slane %v4014_v51, 2  ;;  %v4021_v42 = vadd.f32 %v4020_v13, %v4019_v36  ;;  %v3993_v4 = vrot.slane %v3992_v48, 2 }
0x29a4   :  { %v4000_v52 = vrot.slane %v3999_v31, 4  ;;  %v4022_v39 = vrot.slane %v4021_v42, 4  ;;  %v3994_v7 = vadd.f32 %v3993_v4, %v3992_v48  ;;  %v4016_v22 = vadd.f32 %v4015_v26, %v4014_v51 }
0x29a6   :  { %v4001_v0 = vadd.f32 %v4000_v52, %v3999_v31  ;;  %v4023_v17 = vadd.f32 %v4022_v39, %v4021_v42  ;;  %v3995_v55 = vrot.slane %v3994_v7, 1  ;;  %v4017_v21 = vrot.slane %v4016_v22, 1 }
0x29a8   :  { %v4024_v59 = vrot.slane %v4023_v17, 2  ;;  %v4002_v63 = vrot.slane %v4001_v0, 2  ;;  %v3996_v27 = vadd.f32 %v3995_v55, %v3994_v7  ;;  %v4018_v40 = vadd.f32 %v4017_v21, %v4016_v22 }
0x29aa   :  { %v4025_v32 = vadd.f32 %v4024_v59, %v4023_v17  ;;  %v4003_v60 = vadd.f32 %v4002_v63, %v4001_v0  ;;  %v4028_v53 = vpack.c.bf16 %v3996_v27, %v3996_v27 }
0x29ac   :  { %v4026_v33 = vrot.slane %v4025_v32, 1  ;;  %v4004_v41 = vrot.slane %v4003_v60, 1  ;;  %v4032_v51 = vunpack.c.l.b16 %v4028_v53  ;;  %v5447_v53 = vld [vmem:[#allocation11] sm:$0xff]  }
0x29ae   :  { %v4027_v54 = vadd.f32 %v4026_v33, %v4025_v32  ;;  %v4005_v45 = vadd.f32 %v4004_v41, %v4003_v60 }
0x29b0   :  { %v4122_v43 = vsel %vm823_vm3, %v4027_v54, %v4018_v40  ;;  %v4029_v50 = vpack.c.bf16 %v4005_v45, %v4005_v45  ;;  %v5445_v54 = vld [vmem:[#allocation10] sm:$0xff]   ;;  %v5446_v45 = vld [vmem:[#allocation10 + $0x8] sm:$0xff]  }
0x29b1   :  { %v4129_v48 = vsel %vm216_vm1, %v4122_v43, %v4127_v47 }
0x29b2   :  { %v4130_v38 = vpack.c.bf16 %v4129_v48, %v4129_v48  ;;  %v4033_v35 = vunpack.c.l.b16 %v4029_v50 }
0x29b4   :  { %5292 = vmatmul.mubr.msk.bf16.vlgmr.msra.gmra.mrb[60].mxu1 %vm307_vm2, %v4130_v38  ;;  %v4034_v36 = vsel %vm823_vm3, %v4033_v35, %v4032_v51  ;;  %v5449_v35 = vld [vmem:[%s7212_s9] sm:$0xff]   ;;  %s5930_s9 = smov 96  }
0x29b5   :  { %v4035_v13 = vpack.c.b16 %v4034_v36, %v4034_v36  ;;  %5311 = vmatprep.subr.bf16.mxu1 %v5449_v35 }
0x29b6   :  { %5312 = vmatpush3.bf16.msra.mxu1 %v5449_v35 }
0x29b7   :  { %5280 = vmatmul.mubr.msk.bf16.vlgmr.msra.gmra.mrb[84].mxu0 %vm216_vm1, %v4035_v13  ;;  %5313 = vmatprep.subr.bf16.mxu1 %v5450_v6 }
0x29b8   :  { %5299 = vmatprep.mubr.msk.bf16.mxu0 %vm5925_vm0, %v5924_v1  ;;  %5296 = vmatpush3.bf16.msra.mxu0 %v5445_v54 }
0x29b9   :  { %5297 = vmatprep.subr.bf16.mxu0 %v5924_v1 }
0x29ba   :  { %5314 = vmatpush3.bf16.msra.mxu1 %v5450_v6 }
0x29bc   :  { %5298 = vmatpush3.bf16.msra.mxu0 %v5446_v45 }
0x29bd   :  { %5303 = vmatprep.subr.bf16.mxu0 %v5447_v53 }
0x2a87   :  { %v4192_v31 = vpop.f32.mrb[60].mxu1 }
0x2a88   :  { %v4199_v26 = vrot.slane %v4192_v31, 2  ;;  %v5293_v42 = vpop.f32.mrb[61].mxu1 }
0x2a89   :  { %v4195_v4 = vpop.f32.mrb[62].mxu1 }
0x2a8a   :  { %v4201_v52 = vadd.f32 %v4199_v26, %v6128_v37  ;;  %v7107_v39 = vpop.f32.mrb[84].mxu0  ;;  %v5294_v7 = vpop.f32.mrb[63].mxu1  ;;  %v4210_v37 = vrot.slane %v6965_v58, 6  ;;  %v5448_v58 = vld [vmem:[#allocation11 + $0x8] sm:$0xff]  }
0x2a8b   :  { %v5281_v0 = vpop.f32.mrb[85].mxu0 }
0x2a8c   :  { %5677 = vtanh.f32 %v4201_v52  ;;  %v4091_v22 = vpop.f32.mrb[86].mxu0  ;;  %v4779_v59 = vmul.f32 -1.442695, %v4201_v52 }
0x2a8d   :  { %v5282_v17 = vpop.f32.mrb[87].mxu0 }
0x2a8e   :  { %5679 = vpow2.f32 %v4779_v59 }
0x2a96   :  { %v5678_v55 = vpop.eup %5677 }
0x2a97   :  { %4214 = vrot.lane.b32.xlu0 %v5678_v55, %s5912_s27 }
0x2a98   :  { %v5680_v63 = vpop.eup %5679 }
0x2a99   :  { %v4205_v21 = vadd.f32 1.0, %v5680_v63 }
0x2a9b   :  { %5681 = vrcp.f32 %v4205_v21 }
0x2aa5   :  { %v5682_v32 = vpop.eup %5681 }
0x2aa6   :  { %v4212_v33 = vmul.f32 %v5682_v32, %v4210_v37 }
0x2b09   :  { %v4215_v27 = vpop.permute.xlu0 %4214 }
0x2b0a   :  { %v4217_v60 = vmul.f32 %v5682_v32, %v4215_v27 }
0x2b0c   :  { %4219 = vrot.lane.b32.xlu1 %v4217_v60, %s5928_s12 }
0x2b7e   :  { %v4220_v41 = vpop.permute.xlu1 %4219 }
0x2b7f   :  { %v4222_v40 = vadd.f32 %v4220_v41, %v4212_v33 }
0x2b81   :  { %5683 = vtanh.f32 %v4222_v40 }
0x2b8b   :  { %v5684_v43 = vpop.eup %5683 }
0x2b8c   :  { %4225 = vrot.lane.b32.xlu1 %v5684_v43, %s5912_s27 }
0x2bfe   :  { %v4226_v47 = vpop.permute.xlu1 %4225 }
0x2bff   :  { %v4228_v50 = vmul.f32 %v5682_v32, %v4226_v47 }
0x2c01   :  { %v4229_v48 = vpack.c.bf16 %v4228_v50, %v4228_v50 }
0x2c03   :  { %v4231_v38 = vrot.slane %v4229_v48, 3 }
0x2c05   :  { %4232 = vrot.lane.b32.xlu0 %v4231_v38, %s5928_s12 }
0x2c77   :  { %v4233_v51 = vpop.permute.xlu0 %4232 }
0x2c78   :  { %5300 = vmatmul.mubr.msk.bf16.vlgmr.msra.gmra.mrb[88].mxu0 %vm216_vm1, %v4233_v51 }
0x2c79   :  { %5304 = vmatpush3.bf16.msra.mxu0 %v5447_v53  ;;  %5307 = vmatprep.mubr.msk.bf16.mxu0 %vm216_vm1, %v4289_v56 }
0x2c7a   :  { %5305 = vmatprep.subr.bf16.mxu0 %v5448_v58 }
0x2c7d   :  { %5306 = vmatpush3.bf16.msra.mxu0 %v5448_v58 }
0x2c7e   :  { %5319 = vmatprep.subr.bf16.mxu0 %v5924_v1 }
0x2c80   :  { %5308 = vmatmul.mubr.msk.bf16.vlgmr.msra.gmra.mrb[92].mxu0 %vm216_vm1, %v4290_v34 }
0x2c81   :  { %5323 = vmatprep.mubr.msk.bf16.mxu0 %vm5925_vm0, %v5924_v1 }
0x2d4b   :  { %v7133_v57 = vpop.f32.mrb[88].mxu0 }
0x2d4c   :  { %v4369_v56 = vrot.slane %v7133_v57, %v6098_v8  ;;  %v5301_v24 = vpop.f32.mrb[89].mxu0 }
0x2d4d   :  { %v4286_v62 = vpop.f32.mrb[90].mxu0 }
0x2d4e   :  { %v4370_v34 = vcombine.high %v4369_v56, %v4369_v56  ;;  %v5302_v36 = vpop.f32.mrb[91].mxu0  ;;  %v4377_v31 = vrot.slane %v4369_v56, %v6098_v8 }
0x2d50   :  { %v4384_v13 = vrot.slane %v4370_v34, %v6098_v8  ;;  %v4388_v0 = vrot.slane %v4377_v31, %v6188_v25 }
0x2d52   :  { %v4392_v4 = vrot.slane %v4384_v13, %v6188_v25 }
0x2d53   :  { %v5309_v26 = vpop.f32.mrb[92].mxu0 }
0x2d54   :  { %v4360_v42 = vadd.f32 %v5309_v26, %v6163_v12  ;;  %v4343_v52 = vpop.f32.mrb[93].mxu0 }
0x2d55   :  { %v4358_v7 = vadd.f32 %v4343_v52, %v6166_v14  ;;  %v5310_v22 = vpop.f32.mrb[94].mxu0 }
0x2d56   :  { %v4397_v17 = vadd.f32 %v4392_v4, %v4360_v42  ;;  %v4361_v55 = vadd.f32 %v5310_v22, %v6169_v16  ;;  %v4346_v59 = vpop.f32.mrb[95].mxu0 }
0x2d57   :  { %v4395_v63 = vadd.f32 %v4388_v0, %v4358_v7  ;;  %v4359_v21 = vadd.f32 %v4346_v59, %v6172_v18  ;;  %v5451_v7 = vld [vmem:[#allocation13] sm:$0xff]  }
0x2d58   :  { %5685 = vtanh.f32 %v4397_v17  ;;  %v4398_v8 = vadd.f32 %v4392_v4, %v4361_v55  ;;  %5320 = vmatpush3.bf16.msra.mxu0 %v5451_v7 }
0x2d59   :  { %5687 = vtanh.f32 %v4395_v63  ;;  %v4396_v32 = vadd.f32 %v4388_v0, %v4359_v21  ;;  %v5452_v0 = vld [vmem:[#allocation13 + $0x8] sm:$0xff]   ;;  %5321 = vmatprep.subr.bf16.mxu0 %v5924_v1 }
0x2d5a   :  { %5689 = vtanh.f32 %v4398_v8 }
0x2d5b   :  { %5691 = vtanh.f32 %v4396_v32 }
0x2d5c   :  { %5322 = vmatpush3.bf16.msra.mxu0 %v5452_v0 }
0x2d62   :  { %v5686_v12 = vpop.eup %5685 }
0x2d63   :  { %v5688_v27 = vpop.eup %5687 }
0x2d64   :  { %v5690_v60 = vpop.eup %5689 }
0x2d65   :  { %v5692_v14 = vpop.eup %5691  ;;  %v4404_v37 = vpack.c.bf16 %v5690_v60, %v5686_v12 }
0x2d66   :  { %v4403_v25 = vpack.c.bf16 %v5692_v14, %v5688_v27 }
0x2d68   :  { %5315 = vmatprep.mubr.msk.bf16.mxu1 %vm216_vm1, %v4403_v25 }
0x2d69   :  { %5316 = vmatmul.mubr.msk.bf16.vlgmr.msra.gmra.mrb[64].mxu1 %vm216_vm1, %v4404_v37 }
0x2e3c   :  { %v5317_v16 = vpop.f32.mrb[64].mxu1 }
0x2e3d   :  { %v4457_v33 = vpop.f32.mrb[65].mxu1  ;;  %v4478_v53 = vsel %vm216_vm1, %v5317_v16, -inf }
0x2e3e   :  { %v5318_v41 = vpop.f32.mrb[66].mxu1  ;;  %v4472_v18 = vsel %vm216_vm1, %v4457_v33, -inf }
0x2e3f   :  { %4473 = vmax.xlane.f32.xlu1 %v4472_v18  ;;  %v4460_v40 = vpop.f32.mrb[67].mxu1  ;;  %v4481_v45 = vsel %vm216_vm1, %v5318_v41, -inf }
0x2e40   :  { %v4475_v54 = vsel %vm216_vm1, %v4460_v40, -inf }
0x2e41   :  { %4476 = vmax.xlane.f32.xlu0 %v4475_v54 }
0x2e43   :  { %4482 = vmax.xlane.f32.xlu1 %v4481_v45 }
0x2e45   :  { %4479 = vmax.xlane.f32.xlu0 %v4478_v53 }
0x2ecc   :  { %v4474_v43 = vpop.xlane.xlu1 %4473 }
0x2ecd   :  { %v4484_v47 = vsub.f32 %v4457_v33, %v4474_v43 }
0x2ece   :  { %v4477_v50 = vpop.xlane.xlu0 %4476 }
0x2ecf   :  { %v4488_v48 = vmul.f32 1.442695, %v4484_v47  ;;  %v4485_v38 = vsub.f32 %v4460_v40, %v4477_v50 }
0x2ed0   :  { %v4483_v58 = vpop.xlane.xlu1 %4482 }
0x2ed1   :  { %5693 = vpow2.f32 %v4488_v48  ;;  %v4490_v51 = vmul.f32 1.442695, %v4485_v38  ;;  %v4487_v35 = vsub.f32 %v5318_v41, %v4483_v58 }
0x2ed2   :  { %v4480_v6 = vpop.xlane.xlu0 %4479 }
0x2ed3   :  { %5695 = vpow2.f32 %v4490_v51  ;;  %v4494_v56 = vmul.f32 1.442695, %v4487_v35  ;;  %v4486_v24 = vsub.f32 %v5317_v16, %v4480_v6 }
0x2ed5   :  { %5697 = vpow2.f32 %v4494_v56  ;;  %v4492_v62 = vmul.f32 1.442695, %v4486_v24 }
0x2ed7   :  { %5699 = vpow2.f32 %v4492_v62 }
0x2edb   :  { %v5694_v34 = vpop.eup %5693 }
0x2edc   :  { %v4496_v36 = vsel %vm216_vm1, %v5694_v34, 0.0 }
0x2edd   :  { %v5696_v13 = vpop.eup %5695  ;;  %4497 = vadd.xlane.f32.xlu0 %v4496_v36 }
0x2ede   :  { %v4499_v31 = vsel %vm216_vm1, %v5696_v13, 0.0 }
0x2edf   :  { %v5698_v26 = vpop.eup %5697  ;;  %4500 = vadd.xlane.f32.xlu1 %v4499_v31 }
0x2ee0   :  { %v4505_v4 = vsel %vm216_vm1, %v5698_v26, 0.0 }
0x2ee1   :  { %v5700_v42 = vpop.eup %5699 }
0x2ee2   :  { %v4502_v52 = vsel %vm216_vm1, %v5700_v42, 0.0 }
0x2ee3   :  { %4506 = vadd.xlane.f32.xlu1 %v4505_v4  ;;  %4503 = vadd.xlane.f32.xlu0 %v4502_v52 }
0x2ef4   :  { %1373 = vrot.lane.b32.xlu1 %v6325_v49, %s5930_s9 }
0x2ef8   :  { %1909 = vrot.lane.b32.xlu1 %v6456_v29, %s5930_s9 }
0x2ef9   :  { %838 = vrot.lane.b32.xlu0 %v6183_v23, %s5930_s9 }
0x2efc   :  { %2977 = vrot.lane.b32.xlu1 %v6746_v46, %s5930_s9 }
0x2efd   :  { %2445 = vrot.lane.b32.xlu0 %v6587_v3, %s5930_s9 }
0x2f00   :  { %4048 = vrot.lane.b32.xlu1 %v7008_v44, %s5930_s9 }
0x2f01   :  { %3512 = vrot.lane.b32.xlu0 %v6877_v11, %s5930_s9 }
0x2f05   :  { %4558 = vrot.lane.b32.xlu0 %v7133_v57, %s5930_s9 }
0x2f6a   :  { %v4498_v49 = vpop.xlane.xlu0 %4497 }
0x2f6b   :  { %5701 = vrcp.f32 %v4498_v49 }
0x2f6c   :  { %v4501_v29 = vpop.xlane.xlu1 %4500 }
0x2f6d   :  { %5703 = vrcp.f32 %v4501_v29 }
0x2f70   :  { %v4507_v23 = vpop.xlane.xlu1 %4506  ;;  %v4504_v46 = vpop.xlane.xlu0 %4503 }
0x2f71   :  { %5705 = vrcp.f32 %v4507_v23 }
0x2f72   :  { %5707 = vrcp.f32 %v4504_v46 }
0x2f74   :  { %v1374_v3 = vpop.permute.xlu1 %1373  ;;  %v839_v44 = vpop.permute.xlu0 %838 }
0x2f75   :  { %v5702_v11 = vpop.eup %5701  ;;  %v1414_v57 = vadd.f32 %v6408_v19, %v1374_v3  ;;  %v879_v22 = vadd.f32 %v6293_v2, %v839_v44 }
0x2f76   :  { %v4512_v17 = vmul.f32 %v5702_v11, %v5694_v34 }
0x2f77   :  { %v5704_v55 = vpop.eup %5703  ;;  %1420 = vst.msk [vmem:[#allocation14 + $0x2] sm:$0x3] %vm884_vm4, %v1414_v57  ;;  %885 = vst.msk [vmem:[#allocation14] sm:$0x3] %vm884_vm4, %v879_v22 }
0x2f78   :  { %v4516_v1 = vmul.f32 %v7054_v20, %v4512_v17  ;;  %v4513_v59 = vmul.f32 %v5704_v55, %v5696_v13  ;;  %v1910_v63 = vpop.permute.xlu1 %1909  ;;  %v2446_v21 = vpop.permute.xlu0 %2445 }
0x2f79   :  { %v1950_v8 = vadd.f32 %v6539_v28, %v1910_v63  ;;  %v2486_v32 = vadd.f32 %v6698_v5, %v2446_v21 }
0x2f7a   :  { %v4517_v12 = vmul.f32 %v7060_v61, %v4513_v59  ;;  %v4520_v27 = vsel %vm216_vm1, %v4516_v1, 0.0 }
0x2f7b   :  { %v5706_v19 = vpop.eup %5705  ;;  %1956 = vst.msk [vmem:[#allocation14 + $0x4] sm:$0x3] %vm884_vm4, %v1950_v8  ;;  %2492 = vst.msk [vmem:[#allocation14 + $0x6] sm:$0x3] %vm884_vm4, %v2486_v32 }
0x2f7c   :  { %v5708_v2 = vpop.eup %5707  ;;  %v4521_v60 = vsel %vm216_vm1, %v4517_v12, 0.0  ;;  %v4515_v20 = vmul.f32 %v5706_v19, %v5698_v26  ;;  %v2978_v14 = vpop.permute.xlu1 %2977 }
0x2f7d   :  { %v3513_v37 = vpop.permute.xlu0 %3512  ;;  %v4522_v25 = vadd.f32 %v4521_v60, %v4520_v27  ;;  %v4514_v16 = vmul.f32 %v5708_v2, %v5700_v42  ;;  %v3018_v28 = vadd.f32 %v6829_v9, %v2978_v14 }
0x2f7e   :  { %v3553_v5 = vadd.f32 %v6960_v30, %v3513_v37  ;;  %v4519_v61 = vmul.f32 %v7084_v10, %v4515_v20 }
0x2f7f   :  { %v4523_v33 = vrot.slane %v4522_v25, 4  ;;  %v4518_v41 = vmul.f32 %v7076_v15, %v4514_v16  ;;  %3024 = vst.msk [vmem:[#allocation14 + $0x8] sm:$0x3] %vm884_vm4, %v3018_v28 }
0x2f80   :  { %3559 = vst.msk [vmem:[#allocation14 + $0xa] sm:$0x3] %vm884_vm4, %v3553_v5  ;;  %v4530_v18 = vsel %vm216_vm1, %v4519_v61, 0.0  ;;  %v4049_v40 = vpop.permute.xlu1 %4048 }
0x2f81   :  { %v4524_v54 = vadd.f32 %v4523_v33, %v4522_v25  ;;  %v4529_v45 = vsel %vm216_vm1, %v4518_v41, 0.0  ;;  %v4089_v53 = vadd.f32 %v7107_v39, %v4049_v40  ;;  %v4559_v34 = vpop.permute.xlu0 %4558 }
0x2f82   :  { %v4531_v9 = vadd.f32 %v4530_v18, %v4529_v45 }
0x2f83   :  { %v4525_v43 = vrot.slane %v4524_v54, 2  ;;  %4095 = vst.msk [vmem:[#allocation14 + $0xc] sm:$0x3] %vm884_vm4, %v4089_v53 }
0x2f84   :  { %v4532_v30 = vrot.slane %v4531_v9, 4 }
0x2f85   :  { %v4526_v10 = vadd.f32 %v4525_v43, %v4524_v54 }
0x2f86   :  { %v4533_v47 = vadd.f32 %v4532_v30, %v4531_v9 }
0x2f87   :  { %v4527_v15 = vrot.slane %v4526_v10, 1 }
0x2f88   :  { %v4534_v50 = vrot.slane %v4533_v47, 2 }
0x2f89   :  { %v4528_v48 = vadd.f32 %v4527_v15, %v4526_v10 }
0x2f8a   :  { %v4535_v38 = vadd.f32 %v4534_v50, %v4533_v47 }
0x2f8b   :  { %v4538_v35 = vpack.c.bf16 %v4528_v48, %v4528_v48 }
0x2f8c   :  { %v4536_v58 = vrot.slane %v4535_v38, 1 }
0x2f8d   :  { %v4542_v56 = vunpack.c.l.b16 %v4538_v35 }
0x2f8e   :  { %v4537_v51 = vadd.f32 %v4536_v58, %v4535_v38 }
0x2f90   :  { %v4539_v6 = vpack.c.bf16 %v4537_v51, %v4537_v51 }
0x2f92   :  { %v4543_v24 = vunpack.c.l.b16 %v4539_v6 }
0x2f94   :  { %v4544_v62 = vsel %vm823_vm3, %v4543_v24, %v4542_v56 }
0x2f95   :  { %v4545_v39 = vpack.c.b16 %v4544_v62, %v4544_v62 }
0x2f97   :  { %5324 = vmatmul.mubr.msk.bf16.vlgmr.msra.gmra.mrb[96].mxu0 %vm216_vm1, %v4545_v39 }
0x306a   :  { %v4598_v36 = vpop.f32.mrb[96].mxu0 }
0x306b   :  { %v4599_v13 = vadd.f32 %v4598_v36, %v4559_v34  ;;  %v5325_v31 = vpop.f32.mrb[97].mxu0 }
0x306c   :  { %v4601_v26 = vpop.f32.mrb[98].mxu0 }
0x306d   :  { %4605 = vst.msk [vmem:[#allocation14 + $0xe] sm:$0x3] %vm884_vm4, %v4599_v13  ;;  %v5326_v42 = vpop.f32.mrb[99].mxu0 }
0x306e   :  { %5890 = shalt.err (!%p5887_p4)
}
0x306f   :  { %s5891_s15 = scalar_lea.hbm %s7214_s11, 256 }
0x3070   :  { %p5892_p5 = scmp.ne.s32.totalorder %s7214_s11, %s5891_s15  ;;  %p5895_p6 = scmp.lt.u32.totalorder %s5891_s15, %s7214_s11 }
0x3072   :  { %p5897_p7 = pnand %p5895_p6, %p5892_p5 }
0x3074   :  { %5900 = shalt.err (!%p5897_p7)
}
0x3075   :  { %s5932_s4 = smov 2  }
0x3076   :  { %4617 = dma.vmem_to_hbm [thread:$0]  %s4612_s28, 256, %s7214_s11, [#allocation4], %s5928_s12, %s5928_s12, %s5932_s4  }
0x3077   :  { %5909 = dma.done.wait [#allocation4], 256  }
0x3078   :  { %5910 = vsyncadd [#allocation4], 4294967040 }
0x3079   :  { %4621 = vsyncpa [#allocation3], 1 }
0x307a   :  { %4622 = vsyncpa [#allocation6], 1 }
0x307b   :  { %4623 = vsyncpa [#allocation9], 1 }
0x307c   :  { %4624 = vsyncpa [#allocation12], 1 }
0x307d   :  { %4625 = vsyncpa [#allocation4], 1 }

</bundles_post_ra>
